<compile_context>
chip_gen: v5e
topology: v5e:2x2
jax: 0.10.0
libtpu: 0.0.40
codegen_flags: <defaults>
</compile_context>

<pallas_src>
import jax
import jax.numpy as jnp
from jax import lax
from jax.experimental import pallas as pl
from jax.experimental.pallas import tpu as pltpu

NEG_SLOPE = 0.02


def imnet_decoder_kernel(z_ref, *refs):
    out_ref = refs[-1]
    wb = refs[:-1]

    # ---- Layer 1: (tm, z_dim) tile, contract last dims -> (out1, tm) --------
    z_tile = z_ref[...].astype(jnp.bfloat16)          # (tm, z_dim)
    w1 = wb[0][...]                                    # (out1, z_dim) bf16
    y = lax.dot_general(w1, z_tile,
                        dimension_numbers=(((1,), (1,)), ((), ())),
                        preferred_element_type=jnp.float32)
    y = y + wb[1][...]                                 # f32 bias add
    x = jnp.maximum(y, NEG_SLOPE * y)                  # leaky_relu in f32
    x = x.astype(jnp.bfloat16)                         # bf16 activation carry

    # ---- Layers 2..6: feature-major y^T = W @ x^T + b ------------------------
    for i in range(1, 6):
        w_ref = wb[2 * i]       # (out, in) bf16
        b_ref = wb[2 * i + 1]   # (out, 1)  f32
        y = jnp.dot(w_ref[...], x, preferred_element_type=jnp.float32) + b_ref[...]
        act = jnp.maximum(y, NEG_SLOPE * y)            # f32
        # keep the last hidden activation in f32 (feeds the VPU reduce below)
        x = act.astype(jnp.bfloat16) if i < 5 else act

    # ---- Layer 7 (16 -> 1): VPU multiply + sublane reduce --------------------
    w7 = wb[12][...]            # (16, 1) f32
    b7 = wb[13][...]            # (1, 1)  f32
    l7 = jnp.sum(x * w7, axis=0, keepdims=True) + b7   # (1, tm)

    # torch.max(torch.min(l7, l7*0.01 + 0.99), l7*0.01)
    l7 = jnp.maximum(jnp.minimum(l7, l7 * 0.01 + 0.99), l7 * 0.01)
    out_ref[...] = l7.astype(out_ref.dtype)            # lane-dense (1, tm) store


def pack_params(params):
    """One-time cast/reshape of PyTorch-layout (W:[out,in], b:[out]) params into
    the kernel layout.  Hoist this out of the per-call hot path."""
    flat = []
    n = len(params)
    for li, (w, b) in enumerate(params):
        if li < n - 1:
            flat.append(jnp.asarray(w, jnp.bfloat16))                  # (out, in)
            flat.append(jnp.asarray(b, jnp.float32).reshape(-1, 1))    # (out, 1)
        else:
            # (1,16) -> (16,1) is a valid transpose only because one dim is 1
            flat.append(jnp.asarray(w, jnp.float32).reshape(-1, 1))    # (16, 1)
            flat.append(jnp.asarray(b, jnp.float32).reshape(1, 1))     # (1, 1)
    return flat


def _choose_tile(N, tm):
    """Clamp tm to a multiple of 128; ensure >= 2 grid blocks when possible so
    the single 'parallel' grid axis keeps both v7x TensorCores busy."""
    cdiv = lambda a, b: -(-a // b)
    tm = max(128, (tm // 128) * 128)
    if cdiv(N, tm) < 2 and N > 128:
        tm = max(128, ((cdiv(N, 2) + 127) // 128) * 128)
    return tm, cdiv(N, tm)


def imnet_decoder(z, packed, *, tm=2048):
    """z: [N, z_dim] float32.  packed: output of pack_params().  Returns [N, 1] f32."""
    N, z_dim = z.shape
    tm, n_blocks = _choose_tile(N, tm)
    N_pad = n_blocks * tm
    if N_pad != N:
        z = jnp.pad(z, ((0, N_pad - N), (0, 0)))   # zero rows pass through harmlessly

    # Input tile in native layout (no wrapper transpose); weights/biases have
    # constant index maps -> resident in VMEM, never re-DMA'd per grid step.
    in_specs = [pl.BlockSpec((tm, z_dim), lambda i: (i, 0))]
    for arr in packed:
        in_specs.append(pl.BlockSpec(arr.shape, lambda i: (0, 0)))

    # Advisory cost estimate for XLA's scheduler.
    flops = 0
    bytes_accessed = z.size * z.dtype.itemsize + N_pad * 4
    for li in range(0, len(packed), 2):
        w, b = packed[li], packed[li + 1]
        flops += 2 * w.shape[0] * w.shape[1] * N_pad
        bytes_accessed += w.size * w.dtype.itemsize + b.size * b.dtype.itemsize

    out = pl.pallas_call(
        imnet_decoder_kernel,
        out_shape=jax.ShapeDtypeStruct((1, N_pad), jnp.float32),
        grid_spec=pltpu.PrefetchScalarGridSpec(
            num_scalar_prefetch=0,
            grid=(n_blocks,),
            in_specs=in_specs,
            out_specs=pl.BlockSpec((1, tm), lambda i: (0, i)),
        ),
        compiler_params=pltpu.CompilerParams(
            dimension_semantics=("parallel",)),
        cost_estimate=pl.CostEstimate(flops=int(flops), transcendentals=0,
                                      bytes_accessed=int(bytes_accessed)),
    )(z, *packed)

    return out[0, :N][:, None]        # (N, 1)


def init_params(key, z_dim, df_dim):
    """Deterministic synthetic init matching IMNETDecoder.__init__ (PyTorch layout)."""
    dims = [
        (df_dim * 8, z_dim),
        (df_dim * 8, df_dim * 8),
        (df_dim * 8, df_dim * 8),
        (df_dim * 4, df_dim * 8),
        (df_dim * 2, df_dim * 4),
        (df_dim * 1, df_dim * 2),
        (1,          df_dim * 1),
    ]
    params = []
    keys = jax.random.split(key, len(dims))
    for i, ((d_out, d_in), k) in enumerate(zip(dims, keys)):
        mean = 1e-5 if i == len(dims) - 1 else 0.0
        w = mean + 0.02 * jax.random.normal(k, (d_out, d_in), dtype=jnp.float32)
        b = jnp.zeros((d_out,), dtype=jnp.float32)
        params.append((w, b))
    return params


def reference_forward(z, params):
    x = z
    for i, (w, b) in enumerate(params):
        y = x @ w.T + b
        if i < len(params) - 1:
            x = jnp.where(y > 0, y, NEG_SLOPE * y)
        else:
            x = jnp.maximum(jnp.minimum(y, y * 0.01 + 0.99), y * 0.01)
    return x


if __name__ == "__main__":
    z_dim, df_dim = 32, 16   # df_dim*8 = 128 hidden width
    N = 1000                 # not a multiple of the tile -> exercises padding +
                             # tile clamping (tm 2048 -> 512, 2 even blocks)

    key = jax.random.PRNGKey(0)
    k_z, k_p = jax.random.split(key)
    z = jax.random.normal(k_z, (N, z_dim), dtype=jnp.float32)
    params = init_params(k_p, z_dim, df_dim)

    packed = pack_params(params)                 # hoisted out of the hot path
    out = imnet_decoder(z, packed)               # tm auto-clamped -> grid=(2,)
    out = jax.block_until_ready(out)

    ref = reference_forward(z, params)
    assert out.shape == (N, 1)
    # bf16 matmul operands / bf16 activation carry (f32 accumulation) -> loose tol.
    assert jnp.allclose(out, ref, atol=2e-3, rtol=2e-2), "mismatch vs reference"

    print("KERNEL_OK")
</pallas_src>

<mosaic_0001>
module attributes {stable_mosaic.version = 11 : i64} {
  func.func @imnet_decoder_kernel(%arg0: i32, %arg1: memref<512x32xf32, #tpu.memory_space<vmem>>, %arg2: memref<128x32xbf16, #tpu.memory_space<vmem>>, %arg3: memref<128x1xf32, #tpu.memory_space<vmem>>, %arg4: memref<128x128xbf16, #tpu.memory_space<vmem>>, %arg5: memref<128x1xf32, #tpu.memory_space<vmem>>, %arg6: memref<128x128xbf16, #tpu.memory_space<vmem>>, %arg7: memref<128x1xf32, #tpu.memory_space<vmem>>, %arg8: memref<64x128xbf16, #tpu.memory_space<vmem>>, %arg9: memref<64x1xf32, #tpu.memory_space<vmem>>, %arg10: memref<32x64xbf16, #tpu.memory_space<vmem>>, %arg11: memref<32x1xf32, #tpu.memory_space<vmem>>, %arg12: memref<16x32xbf16, #tpu.memory_space<vmem>>, %arg13: memref<16x1xf32, #tpu.memory_space<vmem>>, %arg14: memref<16x1xf32, #tpu.memory_space<vmem>>, %arg15: memref<1x1xf32, #tpu.memory_space<vmem>>, %arg16: memref<1x512xf32, #tpu.memory_space<vmem>>) attributes {dimension_semantics = [#tpu.dimension_semantics<parallel>], iteration_bounds = array<i64: 2>, scalar_prefetch = 0 : i64, scratch_operands = 0 : i64, tpu.core_type = #tpu.core_type<tc>, window_params = [{transform_indices = @transform_0, window_bounds = array<i64: 512, 32>}, {pipeline_mode = #tpu.pipeline_mode<synchronous>, transform_indices = @transform_1, window_bounds = array<i64: 128, 32>}, {pipeline_mode = #tpu.pipeline_mode<synchronous>, transform_indices = @transform_2, window_bounds = array<i64: 128, 1>}, {pipeline_mode = #tpu.pipeline_mode<synchronous>, transform_indices = @transform_3, window_bounds = array<i64: 128, 128>}, {pipeline_mode = #tpu.pipeline_mode<synchronous>, transform_indices = @transform_4, window_bounds = array<i64: 128, 1>}, {pipeline_mode = #tpu.pipeline_mode<synchronous>, transform_indices = @transform_5, window_bounds = array<i64: 128, 128>}, {pipeline_mode = #tpu.pipeline_mode<synchronous>, transform_indices = @transform_6, window_bounds = array<i64: 128, 1>}, {pipeline_mode = #tpu.pipeline_mode<synchronous>, transform_indices = @transform_7, window_bounds = array<i64: 64, 128>}, {pipeline_mode = #tpu.pipeline_mode<synchronous>, transform_indices = @transform_8, window_bounds = array<i64: 64, 1>}, {pipeline_mode = #tpu.pipeline_mode<synchronous>, transform_indices = @transform_9, window_bounds = array<i64: 32, 64>}, {pipeline_mode = #tpu.pipeline_mode<synchronous>, transform_indices = @transform_10, window_bounds = array<i64: 32, 1>}, {pipeline_mode = #tpu.pipeline_mode<synchronous>, transform_indices = @transform_11, window_bounds = array<i64: 16, 32>}, {pipeline_mode = #tpu.pipeline_mode<synchronous>, transform_indices = @transform_12, window_bounds = array<i64: 16, 1>}, {pipeline_mode = #tpu.pipeline_mode<synchronous>, transform_indices = @transform_13, window_bounds = array<i64: 16, 1>}, {pipeline_mode = #tpu.pipeline_mode<synchronous>, transform_indices = @transform_14, window_bounds = array<i64: 1, 1>}, {transform_indices = @transform_15, window_bounds = array<i64: 1, 512>}]} {
    %c0 = arith.constant 0 : index
    %c0_0 = arith.constant 0 : index
    %0 = vector.load %arg1[%c0, %c0_0] : memref<512x32xf32, #tpu.memory_space<vmem>>, vector<512x32xf32>
    %1 = arith.truncf %0 : vector<512x32xf32> to vector<512x32xbf16>
    %c0_1 = arith.constant 0 : index
    %c0_2 = arith.constant 0 : index
    %2 = vector.load %arg2[%c0_1, %c0_2] : memref<128x32xbf16, #tpu.memory_space<vmem>>, vector<128x32xbf16>
    %cst = arith.constant dense<0.000000e+00> : vector<128x512xf32>
    %3 = tpu.matmul %2, %1, %cst {dimension_numbers = #tpu.dot_dimension_numbers<[1], [1], [0], [0], [0, 0, 1, 0], [], []>} : vector<128x32xbf16>, vector<512x32xbf16>, vector<128x512xf32> -> vector<128x512xf32>
    %c0_3 = arith.constant 0 : index
    %c0_4 = arith.constant 0 : index
    %4 = vector.load %arg3[%c0_3, %c0_4] : memref<128x1xf32, #tpu.memory_space<vmem>>, vector<128x1xf32>
    %5 = vector.broadcast %4 : vector<128x1xf32> to vector<128x512xf32>
    %6 = arith.addf %3, %5 : vector<128x512xf32>
    %cst_5 = arith.constant 2.000000e-02 : f32
    %7 = vector.broadcast %cst_5 : f32 to vector<128x512xf32>
    %8 = arith.mulf %7, %6 : vector<128x512xf32>
    %9 = arith.maximumf %6, %8 : vector<128x512xf32>
    %10 = arith.truncf %9 : vector<128x512xf32> to vector<128x512xbf16>
    %c0_6 = arith.constant 0 : index
    %c0_7 = arith.constant 0 : index
    %11 = vector.load %arg4[%c0_6, %c0_7] : memref<128x128xbf16, #tpu.memory_space<vmem>>, vector<128x128xbf16>
    %cst_8 = arith.constant dense<0.000000e+00> : vector<128x512xf32>
    %12 = tpu.matmul %11, %10, %cst_8 {dimension_numbers = #tpu.dot_dimension_numbers<[1], [0], [0], [1], [0, 0, 1, 1], [], []>} : vector<128x128xbf16>, vector<128x512xbf16>, vector<128x512xf32> -> vector<128x512xf32>
    %c0_9 = arith.constant 0 : index
    %c0_10 = arith.constant 0 : index
    %13 = vector.load %arg5[%c0_9, %c0_10] : memref<128x1xf32, #tpu.memory_space<vmem>>, vector<128x1xf32>
    %14 = vector.broadcast %13 : vector<128x1xf32> to vector<128x512xf32>
    %15 = arith.addf %12, %14 : vector<128x512xf32>
    %cst_11 = arith.constant 2.000000e-02 : f32
    %16 = vector.broadcast %cst_11 : f32 to vector<128x512xf32>
    %17 = arith.mulf %16, %15 : vector<128x512xf32>
    %18 = arith.maximumf %15, %17 : vector<128x512xf32>
    %19 = arith.truncf %18 : vector<128x512xf32> to vector<128x512xbf16>
    %c0_12 = arith.constant 0 : index
    %c0_13 = arith.constant 0 : index
    %20 = vector.load %arg6[%c0_12, %c0_13] : memref<128x128xbf16, #tpu.memory_space<vmem>>, vector<128x128xbf16>
    %cst_14 = arith.constant dense<0.000000e+00> : vector<128x512xf32>
    %21 = tpu.matmul %20, %19, %cst_14 {dimension_numbers = #tpu.dot_dimension_numbers<[1], [0], [0], [1], [0, 0, 1, 1], [], []>} : vector<128x128xbf16>, vector<128x512xbf16>, vector<128x512xf32> -> vector<128x512xf32>
    %c0_15 = arith.constant 0 : index
    %c0_16 = arith.constant 0 : index
    %22 = vector.load %arg7[%c0_15, %c0_16] : memref<128x1xf32, #tpu.memory_space<vmem>>, vector<128x1xf32>
    %23 = vector.broadcast %22 : vector<128x1xf32> to vector<128x512xf32>
    %24 = arith.addf %21, %23 : vector<128x512xf32>
    %cst_17 = arith.constant 2.000000e-02 : f32
    %25 = vector.broadcast %cst_17 : f32 to vector<128x512xf32>
    %26 = arith.mulf %25, %24 : vector<128x512xf32>
    %27 = arith.maximumf %24, %26 : vector<128x512xf32>
    %28 = arith.truncf %27 : vector<128x512xf32> to vector<128x512xbf16>
    %c0_18 = arith.constant 0 : index
    %c0_19 = arith.constant 0 : index
    %29 = vector.load %arg8[%c0_18, %c0_19] : memref<64x128xbf16, #tpu.memory_space<vmem>>, vector<64x128xbf16>
    %cst_20 = arith.constant dense<0.000000e+00> : vector<64x512xf32>
    %30 = tpu.matmul %29, %28, %cst_20 {dimension_numbers = #tpu.dot_dimension_numbers<[1], [0], [0], [1], [0, 0, 1, 1], [], []>} : vector<64x128xbf16>, vector<128x512xbf16>, vector<64x512xf32> -> vector<64x512xf32>
    %c0_21 = arith.constant 0 : index
    %c0_22 = arith.constant 0 : index
    %31 = vector.load %arg9[%c0_21, %c0_22] : memref<64x1xf32, #tpu.memory_space<vmem>>, vector<64x1xf32>
    %32 = vector.broadcast %31 : vector<64x1xf32> to vector<64x512xf32>
    %33 = arith.addf %30, %32 : vector<64x512xf32>
    %cst_23 = arith.constant 2.000000e-02 : f32
    %34 = vector.broadcast %cst_23 : f32 to vector<64x512xf32>
    %35 = arith.mulf %34, %33 : vector<64x512xf32>
    %36 = arith.maximumf %33, %35 : vector<64x512xf32>
    %37 = arith.truncf %36 : vector<64x512xf32> to vector<64x512xbf16>
    %c0_24 = arith.constant 0 : index
    %c0_25 = arith.constant 0 : index
    %38 = vector.load %arg10[%c0_24, %c0_25] : memref<32x64xbf16, #tpu.memory_space<vmem>>, vector<32x64xbf16>
    %cst_26 = arith.constant dense<0.000000e+00> : vector<32x512xf32>
    %39 = tpu.matmul %38, %37, %cst_26 {dimension_numbers = #tpu.dot_dimension_numbers<[1], [0], [0], [1], [0, 0, 1, 1], [], []>} : vector<32x64xbf16>, vector<64x512xbf16>, vector<32x512xf32> -> vector<32x512xf32>
    %c0_27 = arith.constant 0 : index
    %c0_28 = arith.constant 0 : index
    %40 = vector.load %arg11[%c0_27, %c0_28] : memref<32x1xf32, #tpu.memory_space<vmem>>, vector<32x1xf32>
    %41 = vector.broadcast %40 : vector<32x1xf32> to vector<32x512xf32>
    %42 = arith.addf %39, %41 : vector<32x512xf32>
    %cst_29 = arith.constant 2.000000e-02 : f32
    %43 = vector.broadcast %cst_29 : f32 to vector<32x512xf32>
    %44 = arith.mulf %43, %42 : vector<32x512xf32>
    %45 = arith.maximumf %42, %44 : vector<32x512xf32>
    %46 = arith.truncf %45 : vector<32x512xf32> to vector<32x512xbf16>
    %c0_30 = arith.constant 0 : index
    %c0_31 = arith.constant 0 : index
    %47 = vector.load %arg12[%c0_30, %c0_31] : memref<16x32xbf16, #tpu.memory_space<vmem>>, vector<16x32xbf16>
    %cst_32 = arith.constant dense<0.000000e+00> : vector<16x512xf32>
    %48 = tpu.matmul %47, %46, %cst_32 {dimension_numbers = #tpu.dot_dimension_numbers<[1], [0], [0], [1], [0, 0, 1, 1], [], []>} : vector<16x32xbf16>, vector<32x512xbf16>, vector<16x512xf32> -> vector<16x512xf32>
    %c0_33 = arith.constant 0 : index
    %c0_34 = arith.constant 0 : index
    %49 = vector.load %arg13[%c0_33, %c0_34] : memref<16x1xf32, #tpu.memory_space<vmem>>, vector<16x1xf32>
    %50 = vector.broadcast %49 : vector<16x1xf32> to vector<16x512xf32>
    %51 = arith.addf %48, %50 : vector<16x512xf32>
    %cst_35 = arith.constant 2.000000e-02 : f32
    %52 = vector.broadcast %cst_35 : f32 to vector<16x512xf32>
    %53 = arith.mulf %52, %51 : vector<16x512xf32>
    %54 = arith.maximumf %51, %53 : vector<16x512xf32>
    %c0_36 = arith.constant 0 : index
    %c0_37 = arith.constant 0 : index
    %55 = vector.load %arg14[%c0_36, %c0_37] : memref<16x1xf32, #tpu.memory_space<vmem>>, vector<16x1xf32>
    %c0_38 = arith.constant 0 : index
    %c0_39 = arith.constant 0 : index
    %56 = vector.load %arg15[%c0_38, %c0_39] : memref<1x1xf32, #tpu.memory_space<vmem>>, vector<1x1xf32>
    %57 = vector.broadcast %55 : vector<16x1xf32> to vector<16x512xf32>
    %58 = arith.mulf %54, %57 : vector<16x512xf32>
    %cst_40 = arith.constant dense<0.000000e+00> : vector<512xf32>
    %59 = vector.multi_reduction <add>, %58, %cst_40 [0] : vector<16x512xf32> to vector<512xf32>
    %60 = vector.shape_cast %59 : vector<512xf32> to vector<1x512xf32>
    %61 = vector.broadcast %56 : vector<1x1xf32> to vector<1x512xf32>
    %62 = arith.addf %60, %61 : vector<1x512xf32>
    %cst_41 = arith.constant 0.00999999977 : f32
    %63 = vector.broadcast %cst_41 : f32 to vector<1x512xf32>
    %64 = arith.mulf %62, %63 : vector<1x512xf32>
    %cst_42 = arith.constant 9.900000e-01 : f32
    %65 = vector.broadcast %cst_42 : f32 to vector<1x512xf32>
    %66 = arith.addf %64, %65 : vector<1x512xf32>
    %67 = arith.minimumf %62, %66 : vector<1x512xf32>
    %cst_43 = arith.constant 0.00999999977 : f32
    %68 = vector.broadcast %cst_43 : f32 to vector<1x512xf32>
    %69 = arith.mulf %62, %68 : vector<1x512xf32>
    %70 = arith.maximumf %67, %69 : vector<1x512xf32>
    %c0_44 = arith.constant 0 : index
    %c0_45 = arith.constant 0 : index
    %71 = vector.load %arg16[%c0_44, %c0_45] : memref<1x512xf32, #tpu.memory_space<vmem>>, vector<1x512xf32>
    tpu.vector_store %arg16[%c0_44, %c0_45], %70 {strides = array<i32>} : memref<1x512xf32, #tpu.memory_space<vmem>>, vector<1x512xf32>,
    return
  }
  func.func @transform_0(%arg0: i32) -> (i32, i32) {
    %c0_i32 = arith.constant 0 : i32
    %c0_i32_0 = arith.constant 0 : i32
    return %arg0, %c0_i32 : i32, i32
  }
  func.func @transform_1(%arg0: i32) -> (i32, i32) {
    %c0_i32 = arith.constant 0 : i32
    %c0_i32_0 = arith.constant 0 : i32
    %c0_i32_1 = arith.constant 0 : i32
    return %c0_i32, %c0_i32_0 : i32, i32
  }
  func.func @transform_2(%arg0: i32) -> (i32, i32) {
    %c0_i32 = arith.constant 0 : i32
    %c0_i32_0 = arith.constant 0 : i32
    %c0_i32_1 = arith.constant 0 : i32
    return %c0_i32, %c0_i32_0 : i32, i32
  }
  func.func @transform_3(%arg0: i32) -> (i32, i32) {
    %c0_i32 = arith.constant 0 : i32
    %c0_i32_0 = arith.constant 0 : i32
    %c0_i32_1 = arith.constant 0 : i32
    return %c0_i32, %c0_i32_0 : i32, i32
  }
  func.func @transform_4(%arg0: i32) -> (i32, i32) {
    %c0_i32 = arith.constant 0 : i32
    %c0_i32_0 = arith.constant 0 : i32
    %c0_i32_1 = arith.constant 0 : i32
    return %c0_i32, %c0_i32_0 : i32, i32
  }
  func.func @transform_5(%arg0: i32) -> (i32, i32) {
    %c0_i32 = arith.constant 0 : i32
    %c0_i32_0 = arith.constant 0 : i32
    %c0_i32_1 = arith.constant 0 : i32
    return %c0_i32, %c0_i32_0 : i32, i32
  }
  func.func @transform_6(%arg0: i32) -> (i32, i32) {
    %c0_i32 = arith.constant 0 : i32
    %c0_i32_0 = arith.constant 0 : i32
    %c0_i32_1 = arith.constant 0 : i32
    return %c0_i32, %c0_i32_0 : i32, i32
  }
  func.func @transform_7(%arg0: i32) -> (i32, i32) {
    %c0_i32 = arith.constant 0 : i32
    %c0_i32_0 = arith.constant 0 : i32
    %c0_i32_1 = arith.constant 0 : i32
    return %c0_i32, %c0_i32_0 : i32, i32
  }
  func.func @transform_8(%arg0: i32) -> (i32, i32) {
    %c0_i32 = arith.constant 0 : i32
    %c0_i32_0 = arith.constant 0 : i32
    %c0_i32_1 = arith.constant 0 : i32
    return %c0_i32, %c0_i32_0 : i32, i32
  }
  func.func @transform_9(%arg0: i32) -> (i32, i32) {
    %c0_i32 = arith.constant 0 : i32
    %c0_i32_0 = arith.constant 0 : i32
    %c0_i32_1 = arith.constant 0 : i32
    return %c0_i32, %c0_i32_0 : i32, i32
  }
  func.func @transform_10(%arg0: i32) -> (i32, i32) {
    %c0_i32 = arith.constant 0 : i32
    %c0_i32_0 = arith.constant 0 : i32
    %c0_i32_1 = arith.constant 0 : i32
    return %c0_i32, %c0_i32_0 : i32, i32
  }
  func.func @transform_11(%arg0: i32) -> (i32, i32) {
    %c0_i32 = arith.constant 0 : i32
    %c0_i32_0 = arith.constant 0 : i32
    %c0_i32_1 = arith.constant 0 : i32
    return %c0_i32, %c0_i32_0 : i32, i32
  }
  func.func @transform_12(%arg0: i32) -> (i32, i32) {
    %c0_i32 = arith.constant 0 : i32
    %c0_i32_0 = arith.constant 0 : i32
    %c0_i32_1 = arith.constant 0 : i32
    return %c0_i32, %c0_i32_0 : i32, i32
  }
  func.func @transform_13(%arg0: i32) -> (i32, i32) {
    %c0_i32 = arith.constant 0 : i32
    %c0_i32_0 = arith.constant 0 : i32
    %c0_i32_1 = arith.constant 0 : i32
    return %c0_i32, %c0_i32_0 : i32, i32
  }
  func.func @transform_14(%arg0: i32) -> (i32, i32) {
    %c0_i32 = arith.constant 0 : i32
    %c0_i32_0 = arith.constant 0 : i32
    %c0_i32_1 = arith.constant 0 : i32
    return %c0_i32, %c0_i32_0 : i32, i32
  }
  func.func @transform_15(%arg0: i32) -> (i32, i32) {
    %c0_i32 = arith.constant 0 : i32
    %c0_i32_0 = arith.constant 0 : i32
    return %c0_i32, %arg0 : i32, i32
  }
}

</mosaic_0001>

<bundles_post_ra>
// kernel: tpu_custom_call.1
= control target key start
LH: loop header
LB: loop body
LE: loop exit
PB: predicated region body
PF: predicated region fallthrough
CT: control target
= control target key end

     0   :  { %s5240_s0 = inlined_call_operand.vmem [shape: f32[1024,32], index: 0, kind: input, shape index: {}]   ;;  %s5241_s1 = inlined_call_operand.vmem [shape: bf16[128,32], index: 1, kind: input, shape index: {}]   ;;  %s5242_s2 = inlined_call_operand.vmem [shape: f32[128,1], index: 2, kind: input, shape index: {}]   ;;  %s5243_s3 = inlined_call_operand.vmem [shape: bf16[128,128], index: 3, kind: input, shape index: {}]   ;;  %s5244_s4 = inlined_call_operand.vmem [shape: f32[128,1], index: 4, kind: input, shape index: {}]   ;;  %s5245_s5 = inlined_call_operand.vmem [shape: bf16[128,128], index: 5, kind: input, shape index: {}]   ;;  %s5246_s6 = inlined_call_operand.vmem [shape: f32[128,1], index: 6, kind: input, shape index: {}]   ;;  %s5247_s7 = inlined_call_operand.vmem [shape: bf16[64,128], index: 7, kind: input, shape index: {}]   ;;  %s5248_s8 = inlined_call_operand.vmem [shape: f32[64,1], index: 8, kind: input, shape index: {}]   ;;  %s5249_s9 = inlined_call_operand.vmem [shape: bf16[32,64], index: 9, kind: input, shape index: {}]   ;;  %s5250_s10 = inlined_call_operand.vmem [shape: f32[32,1], index: 10, kind: input, shape index: {}]   ;;  %s5251_s11 = inlined_call_operand.vmem [shape: bf16[16,32], index: 11, kind: input, shape index: {}]   ;;  %s5252_s12 = inlined_call_operand.vmem [shape: f32[16,1], index: 12, kind: input, shape index: {}]   ;;  %s5253_s13 = inlined_call_operand.vmem [shape: f32[16,1], index: 13, kind: input, shape index: {}]   ;;  %s5254_s14 = inlined_call_operand.<no memory space> [shape: f32[1,1], index: 14, kind: input, shape index: {}]   ;;  %s5255_s15 = inlined_call_operand.hbm [shape: f32[1,1024], index: 15, kind: output, shape index: {}]  }
   0x1   :  { %5354 = sst [smem:[#allocation66_spill]] %s5240_s0  ;;  %v20_v0 = vstv %s5254_s14 }
   0x2   :  { %5355 = sst [smem:[#allocation67_spill]] %s5241_s1  ;;  %21 = vst [vmem:[#allocation2] sm:$0x1] %v20_v0 }
   0x3   :  { %22 = vsyncpa [#allocation4], 0 }
   0x4   :  { %24 = vsyncpa [#allocation4 + $0x1], 0  ;;  %s3357_s20 = smov 0   ;;  %s3359_s21 = smov 0  }
   0x5   :  { %s3361_s22 = smov 0   ;;  %s3363_s23 = smov 0  }
   0x6 LB: > { %5356 = sst [smem:[#allocation6_spill]] %s3267_s22  ;;  %s3378_s14 = sadd.s32 4294967295, %s3271_s23   ;;  %s3271_s23 = sphi %s3363_s23, %s5683_s23   ;;  %s3267_s22 = sphi %s3361_s22, %s5680_s22   ;;  %s3263_s21 = sphi %s3359_s21, %s5682_s21   ;;  %s3259_s20 = sphi %s3357_s20, %s5681_s20  }
   0x7   : > { %s2956_s24 = sadd.s32 4294967294, %s3271_s23   ;;  %s3382_s25 = sadd.s32 1, %s3271_s23  }
   0x8   : > { %s357_s26 = sadd.s32 1, %s3267_s22  ;;  %s354_s27 = ssub.s32 %s3271_s23, %s3382_s25 }
   0x9   : > { %p367_p0 = scmp.ne.s32.totalorder %s3267_s22, %s3263_s21  ;;  %p355_p1 = scmp.eq.s32.totalorder %s354_s27, 0 }
   0xa   : > { %p368_p2 = scmp.eq.s32.totalorder %s3378_s14, 1  ;;  %p373_p3 = scmp.ne.s32.totalorder %s3263_s21, %s3259_s20 }
   0xb   : > { %p374_p4 = scmp.eq.s32.totalorder %s2956_s24, 1  ;;  %p2959_p7 = scmp.ge.s32.totalorder %s3271_s23, 1 }
   0xc   : > { %s3393_s28 = scalar_select %p355_p1, %s3267_s22, %s357_s26  }
   0xd   : > { %p3395_p5 = por %p368_p2, %p367_p0  ;;  %p3399_p6 = por %p374_p4, %p373_p3 }
   0xe   : > { %5357 = sst [smem:[#allocation7_spill]] %s3393_s28  ;;  %p443_p8 = scmp.lt.s32.totalorder %s3271_s23, 3 }
  0x10   : > { %p444_p9 = pnand %p2959_p7, %p443_p8 }
  0x12   : > { %447 = sbr.rel (%p444_p9) target bundleno = 1534 (0x5fe), region = 80 }
  0x17   : > { %s2961_s16 = sshll.u32 %s3378_s14, 6  ;;  %v625_v1 = vld [vmem:[%s5242_s2 + $0x70] sm:$0xff]  ;;  %v623_v2 = vld [vmem:[%s5242_s2 + $0x60] sm:$0xff]  ;;  %v3273_v3 = vmov 0   ;;  %s5360_s0 = sld [smem:[#allocation66_spill]]  ;;  %v626_v4 = vld [vmem:[%s5242_s2 + $0x78] sm:$0xff] }
  0x18   : > { %p492_p10 = scmp.lt.s32.totalorder %s2961_s16, 127  ;;  %3206 = vset.pattern.permute.xlu0 %v3273_v3  ;;  %3207 = vset.pattern.permute.xlu1 %v3273_v3  ;;  %v624_v5 = vld [vmem:[%s5242_s2 + $0x68] sm:$0xff]  ;;  %vm747_vm0 = vcmask 261120   ;;  %v619_v47 = vld [vmem:[%s5242_s2 + $0x40] sm:$0xff]  ;;  %v618_v62 = vld [vmem:[%s5242_s2 + $0x38] sm:$0xff]  ;;  %s5361_s1 = sld [smem:[#allocation67_spill]] }
  0x19   : > { %699 = vperm.xlu0 %3206, %v625_v1   ;;  %689 = vperm.xlu1 %3207, %v623_v2   ;;  %v620_v48 = vld [vmem:[%s5242_s2 + $0x48] sm:$0xff]  ;;  %v615_v1 = vld [vmem:[%s5242_s2 + $0x20] sm:$0xff]  ;;  %vm2570_vm1 = vcmask 523264   ;;  %s488_s28 = sand.u32 1, %s3263_s21   ;;  %vm2869_vm2 = vcmask 1040384   ;;  %vm2871_vm3 = vcmask 1042434  }
  0x1a   : > { %s5685_s16 = smov (!%p492_p10, %s2961_s16), 127  ;;  %3208 = vset.pattern.permute.xlu2 %v3273_v3  ;;  %s2960_s24 = sshll.u32 %s488_s28, 2  ;;  %vm2873_vm4 = vcmask 1041408  }
  0x1b   : > { %s2962_s26 = sshll.u32 %s5685_s16, 3  ;;  %s490_s18 = scalar_lea.vmem [#allocation3], %s2960_s24 }
  0x1c   : > { %s2894_s19 = sshll.u32 %s490_s18, 4  ;;  %s2882_s16 = scalar_lea.sflag [#allocation4], %s488_s28  ;;  %s2895_s19 = int_to_ptr.vmem [resolvable:$true] %s2894_s19 }
  0x1d   : > { %s3415_s22 = scalar_lea.vmem %s5360_s0, %s2962_s26  ;;  %s3132_s26 = sshll.u32 %s3378_s14, 2 }
  0x1e   : > { %v513_v6 = vld [vmem:[%s3415_s22 + $0x70] sm:$0xff]  ;;  %v514_v7 = vld [vmem:[%s3415_s22 + $0x78] sm:$0xff]  ;;  %v511_v17 = vld [vmem:[%s3415_s22 + $0x60] sm:$0xff]  ;;  %s2892_s17 = scalar_lea.hbm %s5255_s15, %s3132_s26  ;;  %s3229_s0 = scalar_lea.hbm %s5255_s15, 8 }
  0x1f   : > { %v529_v8 = vld [vmem:[%s3415_s22 + $0xf0] sm:$0xff]  ;;  %v570_v9 = vpack.c.bf16 %v514_v7, %v513_v6  ;;  %v530_v10 = vld [vmem:[%s3415_s22 + $0xf8] sm:$0xff]  ;;  %v512_v20 = vld [vmem:[%s3415_s22 + $0x68] sm:$0xff]  ;;  %s2896_s14 = sshll.u32 %s2892_s17, 4  ;;  %s2897_s14 = int_to_ptr.hbm [resolvable:$true] %s2896_s14 }
  0x20   : > { %v545_v11 = vld [vmem:[%s3415_s22 + $0x170] sm:$0xff]  ;;  %v546_v12 = vld [vmem:[%s3415_s22 + $0x178] sm:$0xff]  ;;  %v578_v13 = vpack.c.bf16 %v530_v10, %v529_v8  ;;  %v527_v21 = vld [vmem:[%s3415_s22 + $0xe0] sm:$0xff]  ;;  %v569_v29 = vpack.c.bf16 %v512_v20, %v511_v17 }
  0x21   : > { %v586_v14 = vpack.c.bf16 %v546_v12, %v545_v11  ;;  %v561_v15 = vld [vmem:[%s3415_s22 + $0x1f0] sm:$0xff]  ;;  %v562_v16 = vld [vmem:[%s3415_s22 + $0x1f8] sm:$0xff]  ;;  %v794_v18 = vsel %vm747_vm0, %v570_v9, 0  ;;  %v528_v22 = vld [vmem:[%s3415_s22 + $0xe8] sm:$0xff]  ;;  %704 = vperm.xlu0 %3206, %v626_v4   ;;  %694 = vperm.xlu1 %3207, %v624_v5  }
  0x22   : > { %v594_v19 = vpack.c.bf16 %v562_v16, %v561_v15  ;;  %868 = vmatpush.bf16.xpose.msra.mxu0 %v794_v18  ;;  %v818_v23 = vsel %vm747_vm0, %v578_v13, 0  ;;  %v543_v25 = vld [vmem:[%s3415_s22 + $0x160] sm:$0xff]  ;;  %v544_v26 = vld [vmem:[%s3415_s22 + $0x168] sm:$0xff]  ;;  %v577_v31 = vpack.c.bf16 %v528_v22, %v527_v21  ;;  %v791_v34 = vsel %vm747_vm0, %v569_v29, 0  ;;  %v509_v37 = vld [vmem:[%s3415_s22 + $0x50] sm:$0xff] }
  0x23   : > { %v842_v24 = vsel %vm747_vm0, %v586_v14, 0  ;;  %v559_v27 = vld [vmem:[%s3415_s22 + $0x1e0] sm:$0xff]  ;;  %917 = vmatpush.bf16.xpose.msra.mxu1 %v818_v23  ;;  %v560_v30 = vld [vmem:[%s3415_s22 + $0x1e8] sm:$0xff]  ;;  %v585_v32 = vpack.c.bf16 %v544_v26, %v543_v25  ;;  %v510_v38 = vld [vmem:[%s3415_s22 + $0x58] sm:$0xff] }
  0x24   : > { %966 = vmatpush.bf16.xpose.msra.mxu2 %v842_v24  ;;  %v866_v28 = vsel %vm747_vm0, %v594_v19, 0  ;;  %v593_v33 = vpack.c.bf16 %v560_v30, %v559_v27  ;;  %v815_v35 = vsel %vm747_vm0, %v577_v31, 0  ;;  %v525_v39 = vld [vmem:[%s3415_s22 + $0xd0] sm:$0xff]  ;;  %v526_v41 = vld [vmem:[%s3415_s22 + $0xd8] sm:$0xff]  ;;  %v568_v46 = vpack.c.bf16 %v510_v38, %v509_v37  ;;  %v507_v53 = vld [vmem:[%s3415_s22 + $0x40] sm:$0xff] }
  0x25   : > { %1015 = vmatpush.bf16.xpose.msra.mxu3 %v866_v28  ;;  %v839_v36 = vsel %vm747_vm0, %v585_v32, 0  ;;  %v541_v42 = vld [vmem:[%s3415_s22 + $0x150] sm:$0xff]  ;;  %v542_v43 = vld [vmem:[%s3415_s22 + $0x158] sm:$0xff]  ;;  %v576_v49 = vpack.c.bf16 %v526_v41, %v525_v39  ;;  %v508_v56 = vld [vmem:[%s3415_s22 + $0x48] sm:$0xff] }
  0x26   : > { %v863_v40 = vsel %vm747_vm0, %v593_v33, 0  ;;  %v557_v44 = vld [vmem:[%s3415_s22 + $0x1d0] sm:$0xff]  ;;  %v558_v45 = vld [vmem:[%s3415_s22 + $0x1d8] sm:$0xff]  ;;  %v584_v50 = vpack.c.bf16 %v542_v43, %v541_v42  ;;  %v788_v52 = vsel %vm747_vm0, %v568_v46, 0  ;;  %v523_v57 = vld [vmem:[%s3415_s22 + $0xc0] sm:$0xff]  ;;  %v567_v2 = vpack.c.bf16 %v508_v56, %v507_v53 }
  0x27   : > { %v592_v51 = vpack.c.bf16 %v558_v45, %v557_v44  ;;  %v812_v54 = vsel %vm747_vm0, %v576_v49, 0  ;;  %v524_v58 = vld [vmem:[%s3415_s22 + $0xc8] sm:$0xff]  ;;  %v539_v60 = vld [vmem:[%s3415_s22 + $0x140] sm:$0xff]  ;;  %v505_v7 = vld [vmem:[%s3415_s22 + $0x30] sm:$0xff] }
  0x28   : > { %v836_v55 = vsel %vm747_vm0, %v584_v50, 0  ;;  %v540_v61 = vld [vmem:[%s3415_s22 + $0x148] sm:$0xff]  ;;  %v555_v63 = vld [vmem:[%s3415_s22 + $0x1c0] sm:$0xff]  ;;  %v575_v3 = vpack.c.bf16 %v524_v58, %v523_v57  ;;  %v785_v6 = vsel %vm747_vm0, %v567_v2, 0  ;;  %v506_v10 = vld [vmem:[%s3415_s22 + $0x38] sm:$0xff] }
  0x29   : > { %669 = vperm.xlu0 %3206, %v619_v47   ;;  %674 = vperm.xlu1 %3207, %v620_v48   ;;  %v860_v59 = vsel %vm747_vm0, %v592_v51, 0  ;;  %v556_v0 = vld [vmem:[%s3415_s22 + $0x1c8] sm:$0xff]  ;;  %v583_v4 = vpack.c.bf16 %v540_v61, %v539_v60  ;;  %v521_v11 = vld [vmem:[%s3415_s22 + $0xb0] sm:$0xff]  ;;  %v522_v12 = vld [vmem:[%s3415_s22 + $0xb8] sm:$0xff]  ;;  %v566_v20 = vpack.c.bf16 %v506_v10, %v505_v7 }
  0x2a   : > { %869 = vmatpush.bf16.xpose.msra.mxu0 %v791_v34  ;;  %v591_v5 = vpack.c.bf16 %v556_v0, %v555_v63  ;;  %v809_v8 = vsel %vm747_vm0, %v575_v3, 0  ;;  %v537_v14 = vld [vmem:[%s3415_s22 + $0x130] sm:$0xff]  ;;  %v538_v15 = vld [vmem:[%s3415_s22 + $0x138] sm:$0xff]  ;;  %v574_v21 = vpack.c.bf16 %v522_v12, %v521_v11  ;;  %v503_v26 = vld [vmem:[%s3415_s22 + $0x20] sm:$0xff] }
  0x2b   : > { %918 = vmatpush.bf16.xpose.msra.mxu1 %v815_v35  ;;  %v833_v9 = vsel %vm747_vm0, %v583_v4, 0  ;;  %v613_v16 = vld [vmem:[%s5242_s2 + $0x10] sm:$0xff]  ;;  %v554_v18 = vld [vmem:[%s3415_s22 + $0x1b8] sm:$0xff]  ;;  %v582_v22 = vpack.c.bf16 %v538_v15, %v537_v14  ;;  %v782_v25 = vsel %vm747_vm0, %v566_v20, 0  ;;  %v504_v29 = vld [vmem:[%s3415_s22 + $0x28] sm:$0xff] }
  0x2c   : > { %967 = vmatpush.bf16.xpose.msra.mxu2 %v839_v36  ;;  %v857_v13 = vsel %vm747_vm0, %v591_v5, 0  ;;  %v553_v17 = vld [vmem:[%s3415_s22 + $0x1b0] sm:$0xff]  ;;  %v614_v19 = vld [vmem:[%s5242_s2 + $0x18] sm:$0xff]  ;;  %v806_v27 = vsel %vm747_vm0, %v574_v21, 0  ;;  %v519_v30 = vld [vmem:[%s3415_s22 + $0xa0] sm:$0xff]  ;;  %v565_v38 = vpack.c.bf16 %v504_v29, %v503_v26 }
  0x2d   : > { %1016 = vmatpush.bf16.xpose.msra.mxu3 %v863_v40  ;;  %v621_v23 = vld [vmem:[%s5242_s2 + $0x50] sm:$0xff]  ;;  %v590_v24 = vpack.c.bf16 %v554_v18, %v553_v17  ;;  %v830_v28 = vsel %vm747_vm0, %v582_v22, 0  ;;  %v520_v31 = vld [vmem:[%s3415_s22 + $0xa8] sm:$0xff]  ;;  %v535_v33 = vld [vmem:[%s3415_s22 + $0x120] sm:$0xff] }
  0x2e   : > { %679 = vperm.xlu2 %3208, %v621_v23   ;;  %v536_v34 = vld [vmem:[%s3415_s22 + $0x128] sm:$0xff]  ;;  %v551_v36 = vld [vmem:[%s3415_s22 + $0x1a0] sm:$0xff]  ;;  %v1254_v39 = vld [vmem:[%s5244_s4 + $0x70] sm:$0xff]  ;;  %v573_v41 = vpack.c.bf16 %v520_v31, %v519_v30  ;;  %v779_v44 = vsel %vm747_vm0, %v565_v38, 0 }
  0x2f   : > { %v854_v32 = vsel %vm747_vm0, %v590_v24, 0  ;;  %v612_v35 = vld [vmem:[%s5242_s2 + $0x8] sm:$0xff]  ;;  %v622_v40 = vld [vmem:[%s5242_s2 + $0x58] sm:$0xff]  ;;  %v581_v42 = vpack.c.bf16 %v536_v34, %v535_v33  ;;  %v501_v45 = vld [vmem:[%s3415_s22 + $0x10] sm:$0xff] }
  0x30   : > { %v552_v37 = vld [vmem:[%s3415_s22 + $0x1a8] sm:$0xff]  ;;  %v502_v46 = vld [vmem:[%s3415_s22 + $0x18] sm:$0xff]  ;;  %v803_v47 = vsel %vm747_vm0, %v573_v41, 0  ;;  %v517_v49 = vld [vmem:[%s3415_s22 + $0x90] sm:$0xff] }
  0x31   : > { %664 = vperm.xlu0 %3206, %v618_v62   ;;  %649 = vperm.xlu1 %3207, %v615_v1   ;;  %v589_v43 = vpack.c.bf16 %v552_v37, %v551_v36  ;;  %v827_v48 = vsel %vm747_vm0, %v581_v42, 0  ;;  %v518_v50 = vld [vmem:[%s3415_s22 + $0x98] sm:$0xff]  ;;  %v533_v51 = vld [vmem:[%s3415_s22 + $0x110] sm:$0xff]  ;;  %v1253_v57 = vld [vmem:[%s5244_s4 + $0x68] sm:$0xff] }
  0x32   : > { %870 = vmatpush.bf16.xpose.msra.mxu0 %v788_v52  ;;  %v534_v53 = vld [vmem:[%s3415_s22 + $0x118] sm:$0xff]  ;;  %v617_v58 = vld [vmem:[%s5242_s2 + $0x30] sm:$0xff]  ;;  %v572_v60 = vpack.c.bf16 %v518_v50, %v517_v49  ;;  %v499_v0 = vld [vmem:[%s3415_s22] sm:$0xff] }
  0x33   : > { %919 = vmatpush.bf16.xpose.msra.mxu1 %v812_v54  ;;  %v851_v52 = vsel %vm747_vm0, %v589_v43, 0  ;;  %v549_v54 = vld [vmem:[%s3415_s22 + $0x190] sm:$0xff]  ;;  %v550_v56 = vld [vmem:[%s3415_s22 + $0x198] sm:$0xff]  ;;  %v580_v61 = vpack.c.bf16 %v534_v53, %v533_v51  ;;  %v500_v3 = vld [vmem:[%s3415_s22 + $0x8] sm:$0xff] }
  0x34   : > { %968 = vmatpush.bf16.xpose.msra.mxu2 %v836_v55  ;;  %v1252_v55 = vld [vmem:[%s5244_s4 + $0x60] sm:$0xff]  ;;  %v588_v62 = vpack.c.bf16 %v550_v56, %v549_v54  ;;  %v800_v1 = vsel %vm747_vm0, %v572_v60, 0  ;;  %v516_v5 = vld [vmem:[%s3415_s22 + $0x88] sm:$0xff]  ;;  %v563_v12 = vpack.c.bf16 %v500_v3, %v499_v0  ;;  %v1246_v22 = vld [vmem:[%s5244_s4 + $0x30] sm:$0xff] }
  0x35   : > { %1017 = vmatpush.bf16.xpose.msra.mxu3 %v860_v59  ;;  %v564_v59 = vpack.c.bf16 %v502_v46, %v501_v45  ;;  %v824_v2 = vsel %vm747_vm0, %v580_v61, 0  ;;  %v515_v4 = vld [vmem:[%s3415_s22 + $0x80] sm:$0xff]  ;;  %v548_v11 = vld [vmem:[%s3415_s22 + $0x188] sm:$0xff]  ;;  %v1247_v23 = vld [vmem:[%s5244_s4 + $0x38] sm:$0xff] }
  0x36   : > { %684 = vperm.xlu2 %3208, %v622_v40   ;;  %v531_v7 = vld [vmem:[%s3415_s22 + $0x100] sm:$0xff]  ;;  %v616_v14 = vld [vmem:[%s5242_s2 + $0x28] sm:$0xff]  ;;  %v571_v15 = vpack.c.bf16 %v516_v5, %v515_v4  ;;  %v773_v18 = vsel %vm747_vm0, %v563_v12, 0  ;;  %v1250_v31 = vld [vmem:[%s5244_s4 + $0x50] sm:$0xff] }
  0x37   : > { %v776_v63 = vsel %vm747_vm0, %v564_v59, 0  ;;  %v547_v10 = vld [vmem:[%s3415_s22 + $0x180] sm:$0xff]  ;;  %v1245_v26 = vld [vmem:[%s5244_s4 + $0x28] sm:$0xff]  ;;  %v1771_v33 = vld [vmem:[%s5246_s6 + $0x78] sm:$0xff] }
  0x38   : > { %v587_v17 = vpack.c.bf16 %v548_v11, %v547_v10  ;;  %v611_v24 = vld [vmem:[%s5242_s2] sm:$0xff]  ;;  %v1241_v30 = vld [vmem:[%s5244_s4 + $0x8] sm:$0xff]  ;;  %v1766_v36 = vld [vmem:[%s5246_s6 + $0x50] sm:$0xff] }
  0x39   : > { %639 = vperm.xlu0 %3206, %v613_v16   ;;  %644 = vperm.xlu1 %3207, %v614_v19   ;;  %v797_v19 = vsel %vm747_vm0, %v571_v15, 0  ;;  %v1240_v29 = vld [vmem:[%s5244_s4] sm:$0xff]  ;;  %v1767_v37 = vld [vmem:[%s5246_s6 + $0x58] sm:$0xff]  ;;  %v1765_v40 = vld [vmem:[%s5246_s6 + $0x48] sm:$0xff] }
  0x3a   : > { %871 = vmatpush.bf16.xpose.msra.mxu0 %v785_v6  ;;  %v848_v6 = vsel %vm747_vm0, %v588_v62, 0  ;;  %v845_v21 = vsel %vm747_vm0, %v587_v17, 0  ;;  %v1768_v34 = vld [vmem:[%s5246_s6 + $0x60] sm:$0xff]  ;;  %v1762_v41 = vld [vmem:[%s5246_s6 + $0x30] sm:$0xff]  ;;  %v1243_v42 = vld [vmem:[%s5244_s4 + $0x18] sm:$0xff] }
  0x3b   : > { %920 = vmatpush.bf16.xpose.msra.mxu1 %v809_v8  ;;  %v532_v8 = vld [vmem:[%s3415_s22 + $0x108] sm:$0xff]  ;;  %v1244_v38 = vld [vmem:[%s5244_s4 + $0x20] sm:$0xff]  ;;  %v1770_v45 = vld [vmem:[%s5246_s6 + $0x70] sm:$0xff]  ;;  %s3223_s22 = sshra.s32 %s2897_s14, 4  ;;  %s3224_s22 = int_to_ptr.hbm [resolvable:$true] %s3223_s22 }
  0x3c   : > { %969 = vmatpush.bf16.xpose.msra.mxu2 %v833_v9  ;;  %v1251_v9 = vld [vmem:[%s5244_s4 + $0x58] sm:$0xff]  ;;  %v579_v16 = vpack.c.bf16 %v532_v8, %v531_v7  ;;  %v1760_v43 = vld [vmem:[%s5246_s6 + $0x20] sm:$0xff]  ;;  %v1769_v49 = vld [vmem:[%s5246_s6 + $0x68] sm:$0xff]  ;;  %s3225_s26 = scalar_lea.hbm %s3224_s22, 4  ;;  %p3230_p0 = scmp.lt.s32.totalorder %s3224_s22, %s5255_s15 }
  0x3d   : > { %1018 = vmatpush.bf16.xpose.msra.mxu3 %v857_v13  ;;  %v1248_v13 = vld [vmem:[%s5244_s4 + $0x40] sm:$0xff]  ;;  %v3138_v46 = vld [vmem:[%s5361_s1 + $0x18] sm:$0xff]  ;;  %v2270_v50 = vld [vmem:[%s5248_s8 + $0x30] sm:$0xff]  ;;  %p3226_p11 = scmp.ne.s32.totalorder %s3224_s22, %s3225_s26  ;;  %p3231_p1 = scmp.lt.s32.totalorder %s3229_s0, %s3225_s26 }
  0x3e   : > { %659 = vperm.xlu2 %3208, %v617_v58   ;;  %v821_v20 = vsel %vm747_vm0, %v579_v16, 0  ;;  %v2271_v51 = vld [vmem:[%s5248_s8 + $0x38] sm:$0xff]  ;;  %v3139_v53 = vld [vmem:[%s5361_s1 + $0x20] sm:$0xff]  ;;  %v2269_v54 = vld [vmem:[%s5248_s8 + $0x28] sm:$0xff] }
  0x3f   : > { %v1763_v56 = vld [vmem:[%s5246_s6 + $0x38] sm:$0xff]  ;;  %v2265_v58 = vld [vmem:[%s5248_s8 + $0x8] sm:$0xff]  ;;  %v1758_v59 = vld [vmem:[%s5246_s6 + $0x10] sm:$0xff]  ;;  %p3227_p12 = pnand %p3226_p11, %p3395_p5  ;;  %p3232_p2 = por %p3231_p1, %p3230_p0 }
  0x40   : > { %v3140_v60 = vld [vmem:[%s5361_s1 + $0x28] sm:$0xff]  ;;  %v2539_v61 = vld [vmem:[%s5250_s10 + $0x18] sm:$0xff]  ;;  %v2536_v62 = vld [vmem:[%s5250_s10] sm:$0xff] }
  0x41   : > { %634 = vperm.xlu0 %3206, %v612_v35   ;;  %1328 = vperm.xlu1 %3207, %v1254_v39   ;;  %v1249_v35 = vld [vmem:[%s5244_s4 + $0x48] sm:$0xff]  ;;  %v3137_v39 = vld [vmem:[%s5361_s1 + $0x10] sm:$0xff]  ;;  %v2695_v0 = vld [vmem:[%s5252_s12] sm:$0xff]  ;;  %p3228_p13 = pneg %p3227_p12 }
  0x42   : > { %872 = vmatpush.bf16.xpose.msra.mxu0 %v782_v25  ;;  %v3135_v25 = vld [vmem:[%s5361_s1] sm:$0xff]  ;;  %v3141_v3 = vld [vmem:[%s5361_s1 + $0x30] sm:$0xff]  ;;  %v2788_v4 = vld [vmem:[%s5253_s13 + $0x8] sm:$0xff] }
  0x43   : > { %921 = vmatpush.bf16.xpose.msra.mxu1 %v806_v27  ;;  %v1242_v27 = vld [vmem:[%s5244_s4 + $0x10] sm:$0xff]  ;;  %v2789_v5 = vld [vmem:[#allocation2] sm:$0x1]  ;;  %v3142_v7 = vld [vmem:[%s5361_s1 + $0x38] sm:$0xff]  ;;  %p3233_p3 = pnand %p3232_p2, %p3228_p13 }
  0x44   : > { %970 = vmatpush.bf16.xpose.msra.mxu2 %v830_v28  ;;  %v1255_v28 = vld [vmem:[%s5244_s4 + $0x78] sm:$0xff]  ;;  %v2538_v8 = vld [vmem:[%s5250_s10 + $0x10] sm:$0xff]  ;;  %v2787_v12 = vld [vmem:[%s5253_s13] sm:$0xff] }
  0x45   : > { %1019 = vmatpush.bf16.xpose.msra.mxu3 %v854_v32  ;;  %v3136_v32 = vld [vmem:[%s5361_s1 + $0x8] sm:$0xff] }
  0x46   : > { %654 = vperm.xlu2 %3208, %v616_v14  }
  0x49   : > { %1318 = vperm.xlu0 %3206, %v1252_v55   ;;  %1323 = vperm.xlu1 %3207, %v1253_v57   ;;  %v2266_v55 = vld [vmem:[%s5248_s8 + $0x10] sm:$0xff]  ;;  %v2264_v57 = vld [vmem:[%s5248_s8] sm:$0xff] }
  0x4a   : > { %873 = vmatpush.bf16.xpose.msra.mxu0 %v779_v44  ;;  %v1761_v44 = vld [vmem:[%s5246_s6 + $0x28] sm:$0xff] }
  0x4b   : > { %922 = vmatpush.bf16.xpose.msra.mxu1 %v803_v47  ;;  %v1759_v47 = vld [vmem:[%s5246_s6 + $0x18] sm:$0xff] }
  0x4c   : > { %971 = vmatpush.bf16.xpose.msra.mxu2 %v827_v48  ;;  %v1756_v48 = vld [vmem:[%s5246_s6] sm:$0xff] }
  0x4d   : > { %1020 = vmatpush.bf16.xpose.msra.mxu3 %v851_v52  ;;  %v1764_v52 = vld [vmem:[%s5246_s6 + $0x40] sm:$0xff] }
  0x4e   : > { %629 = vperm.xlu2 %3208, %v611_v24  }
  0x51   : > { %1313 = vperm.xlu0 %3206, %v1251_v9   ;;  %1298 = vperm.xlu1 %3207, %v1248_v13   ;;  %v2537_v9 = vld [vmem:[%s5250_s10 + $0x8] sm:$0xff] }
  0x52   : > { %874 = vmatpush.bf16.xpose.msra.mxu0 %v776_v63  ;;  %v1757_v63 = vld [vmem:[%s5246_s6 + $0x8] sm:$0xff] }
  0x53   : > { %923 = vmatpush.bf16.xpose.msra.mxu1 %v800_v1  ;;  %v2696_v1 = vld [vmem:[%s5252_s12 + $0x8] sm:$0xff] }
  0x54   : > { %972 = vmatpush.bf16.xpose.msra.mxu2 %v824_v2  ;;  %v2268_v2 = vld [vmem:[%s5248_s8 + $0x20] sm:$0xff] }
  0x55   : > { %1021 = vmatpush.bf16.xpose.msra.mxu3 %v848_v6  ;;  %v2267_v6 = vld [vmem:[%s5248_s8 + $0x18] sm:$0xff] }
  0x56   : > { %1333 = vperm.xlu2 %3208, %v1255_v28  }
  0x59   : > { %1288 = vperm.xlu0 %3206, %v1246_v22   ;;  %1293 = vperm.xlu1 %3207, %v1247_v23  }
  0x5a   : > { %875 = vmatpush.bf16.xpose.msra.mxu0 %v773_v18 }
  0x5b   : > { %924 = vmatpush.bf16.xpose.msra.mxu1 %v797_v19 }
  0x5c   : > { %973 = vmatpush.bf16.xpose.msra.mxu2 %v821_v20 }
  0x5d   : > { %1022 = vmatpush.bf16.xpose.msra.mxu3 %v845_v21 }
  0x5e   : > { %1308 = vperm.xlu2 %3208, %v1250_v31  }
  0x61   : > { %2995 = vmatmul.msk.bf16.vlgmr.msra.gmra.mxu0 %vm747_vm0, %v3135_v25  ;;  %1283 = vperm.xlu0 %3206, %v1245_v26  }
  0x62   : > { %3003 = vmatmul.msk.bf16.vlgmr.msra.gmra.mxu1 %vm747_vm0, %v3135_v25  ;;  %1268 = vperm.xlu1 %3207, %v1242_v27  }
  0x63   : > { %3011 = vmatmul.msk.bf16.vlgmr.msra.gmra.mxu2 %vm747_vm0, %v3135_v25 }
  0x64   : > { %3019 = vmatmul.msk.bf16.vlgmr.msra.gmra.mxu3 %vm747_vm0, %v3135_v25 }
  0x66   : > { %1303 = vperm.xlu2 %3208, %v1249_v35  }
  0x69   : > { %1258 = vperm.xlu0 %3206, %v1240_v29  }
  0x6a   : > { %1263 = vperm.xlu1 %3207, %v1241_v30  }
  0x6e   : > { %1278 = vperm.xlu2 %3208, %v1244_v38  }
  0x71   : > { %2996 = vmatmul.msk.bf16.gmra.mxu0 %vm747_vm0, %v3136_v32  ;;  %1849 = vperm.xlu0 %3206, %v1771_v33  }
  0x72   : > { %3004 = vmatmul.msk.bf16.gmra.mxu1 %vm747_vm0, %v3136_v32  ;;  %1834 = vperm.xlu1 %3207, %v1768_v34  }
  0x73   : > { %3012 = vmatmul.msk.bf16.gmra.mxu2 %vm747_vm0, %v3136_v32 }
  0x74   : > { %3020 = vmatmul.msk.bf16.gmra.mxu3 %vm747_vm0, %v3136_v32 }
  0x76   : > { %1273 = vperm.xlu2 %3208, %v1243_v42  }
  0x79   : > { %1824 = vperm.xlu0 %3206, %v1766_v36  }
  0x7a   : > { %1829 = vperm.xlu1 %3207, %v1767_v37  }
  0x7e   : > { %1844 = vperm.xlu2 %3208, %v1770_v45  }
  0x81   : > { %2997 = vmatmul.msk.bf16.gmra.mxu0 %vm747_vm0, %v3137_v39  ;;  %1819 = vperm.xlu0 %3206, %v1765_v40  }
  0x82   : > { %3005 = vmatmul.msk.bf16.gmra.mxu1 %vm747_vm0, %v3137_v39  ;;  %1804 = vperm.xlu1 %3207, %v1762_v41  }
  0x83   : > { %3013 = vmatmul.msk.bf16.gmra.mxu2 %vm747_vm0, %v3137_v39 }
  0x84   : > { %3021 = vmatmul.msk.bf16.gmra.mxu3 %vm747_vm0, %v3137_v39 }
  0x86   : > { %1839 = vperm.xlu2 %3208, %v1769_v49  }
  0x88   : > { %v3811_v41 = vpop.permute.xlu2 %679 }
  0x89   : > { %1794 = vperm.xlu0 %3206, %v1760_v43  }
  0x8a   : > { %1799 = vperm.xlu1 %3207, %v1761_v44  }
  0x8b   : > { %v3801_v36 = vpop.permute.xlu0 %699  ;;  %v3817_v44 = vpop.permute.xlu1 %689 }
  0x8e   : > { %1814 = vperm.xlu2 %3208, %v1764_v52  }
  0x90   : > { %v3825_v49 = vpop.permute.xlu2 %684 }
  0x91   : > { %2998 = vmatmul.msk.bf16.gmra.mxu0 %vm747_vm0, %v3138_v46  ;;  %1789 = vperm.xlu0 %3206, %v1759_v47  }
  0x92   : > { %3006 = vmatmul.msk.bf16.gmra.mxu1 %vm747_vm0, %v3138_v46  ;;  %1774 = vperm.xlu1 %3207, %v1756_v48  }
  0x93   : > { %3014 = vmatmul.msk.bf16.gmra.mxu2 %vm747_vm0, %v3138_v46  ;;  %v3815_v43 = vpop.permute.xlu0 %704 }
  0x94   : > { %3022 = vmatmul.msk.bf16.gmra.mxu3 %vm747_vm0, %v3138_v46 }
  0x96   : > { %1809 = vperm.xlu2 %3208, %v1763_v56  }
  0x98   : > { %v3839_v56 = vpop.permute.xlu2 %659 }
  0x99   : > { %2304 = vperm.xlu0 %3206, %v2270_v50   ;;  %5375 = vst [vmem:[#allocation21_spill] sm:$0xff] %v3839_v56 }
  0x9a   : > { %2309 = vperm.xlu1 %3207, %v2271_v51  }
  0x9b   : > { %v3827_v50 = vpop.permute.xlu0 %669 }
  0x9e   : > { %1784 = vperm.xlu2 %3208, %v1758_v59  }
  0xa1   : > { %2999 = vmatmul.msk.bf16.gmra.mxu0 %vm747_vm0, %v3139_v53  ;;  %2299 = vperm.xlu0 %3206, %v2269_v54   ;;  %v3835_v54 = vpop.permute.xlu1 %694 }
  0xa2   : > { %3007 = vmatmul.msk.bf16.gmra.mxu1 %vm747_vm0, %v3139_v53  ;;  %2284 = vperm.xlu1 %3207, %v2266_v55  }
  0xa3   : > { %3015 = vmatmul.msk.bf16.gmra.mxu2 %vm747_vm0, %v3139_v53 }
  0xa4   : > { %3023 = vmatmul.msk.bf16.gmra.mxu3 %vm747_vm0, %v3139_v53 }
  0xa6   : > { %1779 = vperm.xlu2 %3208, %v1757_v63   ;;  %v3853_v63 = vpop.permute.xlu2 %654 }
  0xa7   : > { %5377 = vst [vmem:[#allocation23_spill] sm:$0xff] %v3853_v63 }
  0xa9   : > { %2274 = vperm.xlu0 %3206, %v2264_v57   ;;  %v3841_v57 = vpop.permute.xlu0 %664 }
  0xaa   : > { %2279 = vperm.xlu1 %3207, %v2265_v58  }
  0xae   : > { %2294 = vperm.xlu2 %3208, %v2268_v2  }
  0xb1   : > { %3000 = vmatmul.msk.bf16.gmra.mxu0 %vm747_vm0, %v3140_v60  ;;  %2557 = vperm.xlu0 %3206, %v2539_v61  }
  0xb2   : > { %3008 = vmatmul.msk.bf16.gmra.mxu1 %vm747_vm0, %v3140_v60  ;;  %2542 = vperm.xlu1 %3207, %v2536_v62   ;;  %v3851_v62 = vpop.permute.xlu1 %674 }
  0xb3   : > { %3016 = vmatmul.msk.bf16.gmra.mxu2 %vm747_vm0, %v3140_v60 }
  0xb4   : > { %3024 = vmatmul.msk.bf16.gmra.mxu3 %vm747_vm0, %v3140_v60 }
  0xb6   : > { %2289 = vperm.xlu2 %3208, %v2267_v6  }
  0xb9   : > { %2699 = vperm.xlu0 %3206, %v2695_v0  }
  0xba   : > { %2704 = vperm.xlu1 %3207, %v2696_v1  }
  0xbe   : > { %2552 = vperm.xlu2 %3208, %v2538_v8  }
  0xc1   : > { %3001 = vmatmul.msk.bf16.gmra.mxu0 %vm747_vm0, %v3141_v3  ;;  %2797 = vperm.xlu0 %3206, %v2788_v4  }
  0xc2   : > { %3009 = vmatmul.msk.bf16.gmra.mxu1 %vm747_vm0, %v3141_v3  ;;  %2838 = vperm.xlu1 %3207, %v2789_v5   ;;  %v3865_v5 = vpop.permute.xlu1 %649 }
  0xc3   : > { %3017 = vmatmul.msk.bf16.gmra.mxu2 %vm747_vm0, %v3141_v3  ;;  %5380 = vst [vmem:[#allocation26_spill] sm:$0xff] %v3865_v5 }
  0xc4   : > { %3025 = vmatmul.msk.bf16.gmra.mxu3 %vm747_vm0, %v3141_v3  ;;  %v3861_v3 = vpop.permute.xlu0 %639 }
  0xc5   : > { %5379 = vst [vmem:[#allocation25_spill] sm:$0xff] %v3861_v3 }
  0xc6   : > { %2547 = vperm.xlu2 %3208, %v2537_v9   ;;  %v3873_v9 = vpop.permute.xlu2 %629 }
  0xc7   : > { %5381 = vst [vmem:[#allocation27_spill] sm:$0xff] %v3873_v9 }
  0xce   : > { %2792 = vperm.xlu2 %3208, %v2787_v12  }
  0xd1   : > { %3002 = vmatmul.msk.bf16.gmra.mxu0 %vm747_vm0, %v3142_v7 }
  0xd2   : > { %3010 = vmatmul.msk.bf16.gmra.mxu1 %vm747_vm0, %v3142_v7 }
  0xd3   : > { %3018 = vmatmul.msk.bf16.gmra.mxu2 %vm747_vm0, %v3142_v7 }
  0xd4   : > { %3026 = vmatmul.msk.bf16.gmra.mxu3 %vm747_vm0, %v3142_v7 }
  0xde   : > { %v3752_v10 = vpop.f32.mrf.mxu0 }
  0xdf   : > { %v3754_v11 = vpop.f32.mrf.mxu1 }
  0xe6   : > { %v3759_v13 = vpop.f32.mrf.mxu2  ;;  %v3763_v15 = vpop.f32.mrf.mxu0 }
  0xe7   : > { %v3761_v14 = vpop.f32.mrf.mxu3  ;;  %v3765_v16 = vpop.f32.mrf.mxu1 }
  0xe8   : > { %5362 = vst [vmem:[#allocation8_spill] sm:$0xff] %v3761_v14  ;;  %v3879_v14 = vadd.f32 %v3752_v10, %v3873_v9 }
  0xea   : > { %5382 = vst [vmem:[#allocation28_spill] sm:$0xff] %v3879_v14 }
  0xee   : > { %v3767_v17 = vpop.f32.mrf.mxu2  ;;  %v882_v19 = vpop.f32.mrf.mxu0 }
  0xef   : > { %5363 = vst [vmem:[#allocation9_spill] sm:$0xff] %v3767_v17  ;;  %v3769_v18 = vpop.f32.mrf.mxu3  ;;  %v931_v20 = vpop.f32.mrf.mxu1 }
  0xf0   : > { %5364 = vst [vmem:[#allocation10_spill] sm:$0xff] %v3769_v18  ;;  %v3883_v18 = vadd.f32 %v3754_v11, %v3873_v9  ;;  %v3901_v10 = vadd.f32 %v931_v20, %v3861_v3  ;;  %v3903_v11 = vpop.permute.xlu1 %644 }
  0xf1   : > { %5390 = vst [vmem:[#allocation36_spill] sm:$0xff] %v3903_v11 }
  0xf2   : > { %5383 = vst [vmem:[#allocation29_spill] sm:$0xff] %v3883_v18 }
  0xf3   : > { %5389 = vst [vmem:[#allocation35_spill] sm:$0xff] %v3901_v10 }
  0xf6   : > { %v3771_v21 = vpop.f32.mrf.mxu2  ;;  %v3775_v23 = vpop.f32.mrf.mxu0 }
  0xf7   : > { %v3773_v22 = vpop.f32.mrf.mxu3  ;;  %v3777_v24 = vpop.f32.mrf.mxu1 }
  0xf8   : > { %5365 = vst [vmem:[#allocation11_spill] sm:$0xff] %v3773_v22  ;;  %v3885_v22 = vpop.permute.xlu0 %634 }
  0xf9   : > { %5384 = vst [vmem:[#allocation30_spill] sm:$0xff] %v3885_v22  ;;  %v3889_v17 = vadd.f32 %v3763_v15, %v3885_v22  ;;  %v3912_v15 = vadd.f32 %v3765_v16, %v3885_v22 }
  0xfb   : > { %5385 = vst [vmem:[#allocation31_spill] sm:$0xff] %v3889_v17 }
  0xfc   : > { %5392 = vst [vmem:[#allocation38_spill] sm:$0xff] %v3912_v15 }
  0xfe   : > { %v3779_v25 = vpop.f32.mrf.mxu2  ;;  %v3783_v27 = vpop.f32.mrf.mxu0 }
  0xff   : > { %5366 = vst [vmem:[#allocation12_spill] sm:$0xff] %v3779_v25  ;;  %v3781_v26 = vpop.f32.mrf.mxu3  ;;  %v3785_v28 = vpop.f32.mrf.mxu1  ;;  %v3898_v25 = vmul.f32 0.02, %v3883_v18 }
 0x100   : > { %5367 = vst [vmem:[#allocation13_spill] sm:$0xff] %v3781_v26  ;;  %v3892_v26 = vadd.f32 %v882_v19, %v3861_v3  ;;  %v3916_v19 = vadd.f32 %v3775_v23, %v3903_v11 }
 0x101   : > { %5388 = vst [vmem:[#allocation34_spill] sm:$0xff] %v3898_v25  ;;  %v3963_v25 = vmul.f32 0.02, %v3912_v15 }
 0x102   : > { %5386 = vst [vmem:[#allocation32_spill] sm:$0xff] %v3892_v26  ;;  %v3923_v20 = vmul.f32 0.02, %v3892_v26 }
 0x103   : > { %5393 = vst [vmem:[#allocation39_spill] sm:$0xff] %v3916_v19 }
 0x104   : > { %5394 = vst [vmem:[#allocation40_spill] sm:$0xff] %v3923_v20 }
 0x105   : > { %5403 = vst [vmem:[#allocation49_spill] sm:$0xff] %v3963_v25 }
 0x106   : > { %v3787_v29 = vpop.f32.mrf.mxu2  ;;  %v3791_v31 = vpop.f32.mrf.mxu0 }
 0x107   : > { %v3789_v30 = vpop.f32.mrf.mxu3  ;;  %v3793_v32 = vpop.f32.mrf.mxu1  ;;  %v4041_v20 = vadd.f32 %v3787_v29, %v3865_v5 }
 0x108   : > { %5368 = vst [vmem:[#allocation14_spill] sm:$0xff] %v3789_v30  ;;  %v3895_v30 = vmul.f32 0.02, %v3879_v14 }
 0x109   : > { %5416 = vst [vmem:[#allocation62_spill] sm:$0xff] %v4041_v20 }
 0x10a   : > { %5387 = vst [vmem:[#allocation33_spill] sm:$0xff] %v3895_v30 }
 0x10e   : > { %v3795_v33 = vpop.f32.mrf.mxu2  ;;  %v3799_v35 = vpop.f32.mrf.mxu0 }
 0x10f   : > { %5369 = vst [vmem:[#allocation15_spill] sm:$0xff] %v3795_v33  ;;  %v3797_v34 = vpop.f32.mrf.mxu3  ;;  %v3803_v37 = vpop.f32.mrf.mxu1  ;;  %v3956_v23 = vadd.f32 %v3799_v35, %v3839_v56 }
 0x110   : > { %5370 = vst [vmem:[#allocation16_spill] sm:$0xff] %v3797_v34  ;;  %v3960_v22 = vadd.f32 %v3803_v37, %v3839_v56 }
 0x111   : > { %5401 = vst [vmem:[#allocation47_spill] sm:$0xff] %v3956_v23  ;;  %v4006_v30 = vmul.f32 0.02, %v3956_v23 }
 0x112   : > { %5402 = vst [vmem:[#allocation48_spill] sm:$0xff] %v3960_v22 }
 0x113   : > { %5412 = vst [vmem:[#allocation58_spill] sm:$0xff] %v4006_v30 }
 0x116   : > { %v3805_v38 = vpop.f32.mrf.mxu2  ;;  %v3809_v40 = vpop.f32.mrf.mxu0 }
 0x117   : > { %v3807_v39 = vpop.f32.mrf.mxu3  ;;  %v3813_v42 = vpop.f32.mrf.mxu1  ;;  %v4065_v26 = vadd.f32 %v3805_v38, %v3839_v56 }
 0x118   : > { %5371 = vst [vmem:[#allocation17_spill] sm:$0xff] %v3807_v39  ;;  %v3908_v39 = vmul.f32 0.02, %v3889_v17  ;;  %v4009_v17 = vmul.f32 0.02, %v3960_v22 }
 0x119   : > { %5418 = vst [vmem:[#allocation64_spill] sm:$0xff] %v4065_v26 }
 0x11a   : > { %5391 = vst [vmem:[#allocation37_spill] sm:$0xff] %v3908_v39  ;;  %v4000_v39 = vadd.f32 %v3771_v21, %v3861_v3 }
 0x11b   : > { %5413 = vst [vmem:[#allocation59_spill] sm:$0xff] %v4009_v17 }
 0x11c   : > { %5410 = vst [vmem:[#allocation56_spill] sm:$0xff] %v4000_v39 }
 0x11e   : > { %v3819_v45 = vpop.f32.mrf.mxu2  ;;  %v897_v47 = vpop.f32.mrf.mxu0 }
 0x11f   : > { %5372 = vst [vmem:[#allocation18_spill] sm:$0xff] %v3819_v45  ;;  %v3821_v46 = vpop.f32.mrf.mxu3  ;;  %v3823_v48 = vpop.f32.mrf.mxu1  ;;  %v3931_v45 = vadd.f32 %v3785_v28, %v3865_v5  ;;  %v3952_v28 = vadd.f32 %v3791_v31, %v3853_v63  ;;  %v3992_v31 = vadd.f32 %v3793_v32, %v3853_v63 }
 0x120   : > { %5373 = vst [vmem:[#allocation19_spill] sm:$0xff] %v3821_v46  ;;  %v3996_v35 = vadd.f32 %v3823_v48, %v3827_v50  ;;  %v4018_v48 = vadd.f32 %v3813_v42, %v3841_v57 }
 0x121   : > { %5396 = vst [vmem:[#allocation42_spill] sm:$0xff] %v3931_v45  ;;  %v3980_v37 = vmul.f32 0.02, %v3931_v45  ;;  %v4044_v25 = vmul.f32 0.02, %v3992_v31 }
 0x122   : > { %5400 = vst [vmem:[#allocation46_spill] sm:$0xff] %v3952_v28 }
 0x123   : > { %5407 = vst [vmem:[#allocation53_spill] sm:$0xff] %v3980_v37 }
 0x124   : > { %5409 = vst [vmem:[#allocation55_spill] sm:$0xff] %v3992_v31 }
 0x125   : > { %5415 = vst [vmem:[#allocation61_spill] sm:$0xff] %v4018_v48 }
 0x126   : > { %v3829_v51 = vpop.f32.mrf.mxu2  ;;  %v3833_v53 = vpop.f32.mrf.mxu0  ;;  %5417 = vst [vmem:[#allocation63_spill] sm:$0xff] %v4044_v25 }
 0x127   : > { %v3831_v52 = vpop.f32.mrf.mxu3  ;;  %v3837_v55 = vpop.f32.mrf.mxu1  ;;  %v4022_v21 = vadd.f32 %v3833_v53, %v3851_v62  ;;  %v4097_v37 = vadd.f32 %v3829_v51, %v3827_v50 }
 0x128   : > { %5374 = vst [vmem:[#allocation20_spill] sm:$0xff] %v3831_v52  ;;  %v3927_v52 = vadd.f32 %v3783_v27, %v3865_v5  ;;  %v3948_v27 = vadd.f32 %v3759_v13, %v3873_v9  ;;  %v3970_v13 = vadd.f32 %v3809_v40, %v3841_v57  ;;  %v4059_v29 = vadd.f32 %v3837_v55, %v3851_v62 }
 0x129   : > { %v4071_v3 = vmul.f32 0.02, %v4022_v21 }
 0x12a   : > { %5395 = vst [vmem:[#allocation41_spill] sm:$0xff] %v3927_v52  ;;  %v3977_v18 = vmul.f32 0.02, %v3927_v52  ;;  %v4014_v32 = vmul.f32 0.02, %v3970_v13 }
 0x12b   : > { %5399 = vst [vmem:[#allocation45_spill] sm:$0xff] %v3948_v27  ;;  %v3983_v27 = vadd.f32 %v897_v47, %v3827_v50  ;;  %v4003_v47 = vmul.f32 0.02, %v3952_v28 }
 0x12c   : > { %5405 = vst [vmem:[#allocation51_spill] sm:$0xff] %v3970_v13 }
 0x12d   : > { %5406 = vst [vmem:[#allocation52_spill] sm:$0xff] %v3977_v18  ;;  %v4033_v39 = vmul.f32 0.02, %v3983_v27 }
 0x12e   : > { %v3843_v58 = vpop.f32.mrf.mxu2  ;;  %v3847_v60 = vpop.f32.mrf.mxu0  ;;  %5411 = vst [vmem:[#allocation57_spill] sm:$0xff] %v4003_v47 }
 0x12f   : > { %v3845_v59 = vpop.f32.mrf.mxu3  ;;  %v3849_v61 = vpop.f32.mrf.mxu1  ;;  %5414 = vst [vmem:[#allocation60_spill] sm:$0xff] %v4014_v32  ;;  %v4037_v42 = vadd.f32 %v3847_v60, %v3811_v41 }
 0x130   : > { %5376 = vst [vmem:[#allocation22_spill] sm:$0xff] %v3845_v59  ;;  %v3940_v59 = vmul.f32 0.02, %v3901_v10  ;;  %v4051_v10 = vadd.f32 %v3849_v61, %v3811_v41  ;;  %v4068_v61 = vmul.f32 0.02, %v4018_v48 }
 0x132   : > { %5397 = vst [vmem:[#allocation43_spill] sm:$0xff] %v3940_v59  ;;  %v4047_v59 = vmul.f32 0.02, %v3996_v35 }
 0x133   : > { %5419 = vst [vmem:[#allocation65_spill] sm:$0xff] %v4068_v61 }
 0x136   : > { %v3855_v0 = vpop.f32.mrf.mxu2  ;;  %v3859_v2 = vpop.f32.mrf.mxu0 }
 0x137   : > { %v3857_v1 = vpop.f32.mrf.mxu3  ;;  %v3863_v4 = vpop.f32.mrf.mxu1 }
 0x138   : > { %5378 = vst [vmem:[#allocation24_spill] sm:$0xff] %v3857_v1  ;;  %v3944_v1 = vadd.f32 %v3777_v24, %v3903_v11  ;;  %v3966_v24 = vmul.f32 0.02, %v3916_v19 }
 0x13a   : > { %5398 = vst [vmem:[#allocation44_spill] sm:$0xff] %v3944_v1  ;;  %v3988_v40 = vmul.f32 0.02, %v3944_v1 }
 0x13b   : > { %5404 = vst [vmem:[#allocation50_spill] sm:$0xff] %v3966_v24  ;;  %v4078_v24 = vmul.f32 0.02, %v4037_v42 }
 0x13c   : > { %5408 = vst [vmem:[#allocation54_spill] sm:$0xff] %v3988_v40  ;;  %v4088_v40 = vmul.f32 0.02, %v4051_v10 }
 0x13e   : > { %v3867_v6 = vpop.f32.mrf.mxu2  ;;  %v3871_v8 = vpop.f32.mrf.mxu0 }
 0x13f   : > { %v3869_v7 = vpop.f32.mrf.mxu3  ;;  %v3875_v12 = vpop.f32.mrf.mxu1  ;;  %v4082_v19 = vadd.f32 %v3871_v8, %v3817_v44  ;;  %v4100_v8 = vmul.f32 0.02, %v4059_v29 }
 0x140   : > { %v4092_v60 = vadd.f32 %v3875_v12, %v3817_v44  ;;  %v4110_v12 = vadd.f32 %v3843_v58, %v3851_v62 }
 0x141   : > { %v1112_v28 = vmul.f32 0.02, %v4082_v19 }
 0x142   : > { %v1113_v5 = vmul.f32 0.02, %v4092_v60 }
 0x144   : > { %v1177_v30 = vmax.f32 %v4092_v60, %v1113_v5  ;;  %v5420_v60 = vld [vmem:[#allocation24_spill] sm:$0xff] }
 0x146   : > { %v3905_v34 = vpop.f32.mrf.mxu2  ;;  %v3920_v46 = vpop.f32.mrf.mxu0 }
 0x147   : > { %v3918_v33 = vpop.f32.mrf.mxu3  ;;  %v3933_v16 = vpop.f32.mrf.mxu1  ;;  %v910_v1 = vadd.f32 %v3920_v46, %v3835_v54  ;;  %v1006_v63 = vadd.f32 %v3905_v34, %v3817_v44 }
 0x148   : > { %v959_v51 = vadd.f32 %v3933_v16, %v3835_v54 }
 0x149   : > { %v1116_v31 = vmul.f32 0.02, %v910_v1 }
 0x14e   : > { %v4011_v14 = vpop.f32.mrf.mxu2  ;;  %v912_v15 = vpop.f32.mrf.mxu0 }
 0x14f   : > { %v4024_v9 = vpop.f32.mrf.mxu3  ;;  %v961_v53 = vpop.f32.mrf.mxu1  ;;  %v913_v38 = vadd.f32 %v912_v15, %v3801_v36  ;;  %v4104_v15 = vadd.f32 %v3859_v2, %v3825_v49  ;;  %v4130_v2 = vadd.f32 %v3855_v0, %v3811_v41  ;;  %v1008_v0 = vadd.f32 %v4011_v14, %v3835_v54 }
 0x150   : > { %v962_v55 = vadd.f32 %v961_v53, %v3801_v36  ;;  %v4114_v53 = vadd.f32 %v3863_v4, %v3825_v49  ;;  %v1176_v4 = vmax.f32 %v4082_v19, %v1112_v28  ;;  %v1180_v19 = vmax.f32 %v910_v1, %v1116_v31 }
 0x151   : > { %v1120_v18 = vmul.f32 0.02, %v913_v38  ;;  %v1108_v46 = vmul.f32 0.02, %v4104_v15  ;;  %v1055_v14 = vadd.f32 %v3918_v33, %v3817_v44  ;;  %v1114_v44 = vmul.f32 0.02, %v1006_v63 }
 0x152   : > { %v1121_v16 = vmul.f32 0.02, %v962_v55  ;;  %v1109_v17 = vmul.f32 0.02, %v4114_v53  ;;  %v1216_v33 = vpack.c.bf16 %v1180_v19, %v1176_v4  ;;  %v5423_v4 = vmax.f32 %v4051_v10, %v4088_v40 }
 0x153   : > { %v1184_v32 = vmax.f32 %v913_v38, %v1120_v18  ;;  %v1172_v34 = vmax.f32 %v4104_v15, %v1108_v46  ;;  %v5421_v15 = vld [vmem:[#allocation22_spill] sm:$0xff]  ;;  %v1102_v10 = vmul.f32 0.02, %v4110_v12 }
 0x154   : > { %v1185_v23 = vmax.f32 %v962_v55, %v1121_v16  ;;  %v1115_v55 = vmul.f32 0.02, %v1055_v14  ;;  %v1165_v16 = vmax.f32 %v4059_v29, %v4100_v8 }
 0x156   : > { %v1010_v45 = vpop.f32.mrf.mxu2  ;;  %v914_v47 = vpop.f32.mrf.mxu0 }
 0x157   : > { %v1059_v20 = vpop.f32.mrf.mxu3  ;;  %v915_v58 = vadd.f32 %v914_v47, %v3815_v43  ;;  %v963_v52 = vpop.f32.mrf.mxu1  ;;  %v1117_v47 = vmul.f32 0.02, %v959_v51  ;;  %v1011_v22 = vadd.f32 %v1010_v45, %v3801_v36  ;;  %v1057_v45 = vadd.f32 %v4024_v9, %v3835_v54 }
 0x158   : > { %v964_v11 = vadd.f32 %v963_v52, %v3815_v43  ;;  %v1060_v13 = vadd.f32 %v1059_v20, %v3801_v36  ;;  %v1003_v54 = vadd.f32 %v3867_v6, %v3825_v49  ;;  %v1118_v9 = vmul.f32 0.02, %v1008_v0 }
 0x159   : > { %v1124_v25 = vmul.f32 0.02, %v915_v58  ;;  %v1122_v18 = vmul.f32 0.02, %v1011_v22  ;;  %v1181_v5 = vmax.f32 %v959_v51, %v1117_v47  ;;  %v5424_v47 = vld [vmem:[#allocation18_spill] sm:$0xff] }
 0x15a   : > { %v1125_v26 = vmul.f32 0.02, %v964_v11  ;;  %v1123_v28 = vmul.f32 0.02, %v1060_v13 }
 0x15b   : > { %v1188_v52 = vmax.f32 %v915_v58, %v1124_v25 }
 0x15c   : > { %v1189_v56 = vmax.f32 %v964_v11, %v1125_v26  ;;  %v1173_v11 = vmax.f32 %v4114_v53, %v1109_v17  ;;  %v1187_v6 = vmax.f32 %v1060_v13, %v1123_v28  ;;  %v4158_v17 = vadd.f32 %v5421_v15, %v3851_v62  ;;  %v5443_v15 = vld [vmem:[#allocation64_spill] sm:$0xff] }
 0x15d   : > { %v1220_v61 = vpack.c.bf16 %v1188_v52, %v1184_v32  ;;  %v1186_v32 = vmax.f32 %v1011_v22, %v1122_v18  ;;  %v1110_v53 = vmul.f32 0.02, %v1003_v54  ;;  %v5422_v22 = vmax.f32 %v4037_v42, %v4078_v24 }
 0x15e   : > { %v1012_v48 = vpop.f32.mrf.mxu2  ;;  %v1221_v20 = vpack.c.bf16 %v1189_v56, %v1185_v23  ;;  %v1052_v56 = vadd.f32 %v3869_v7, %v3825_v49  ;;  %v1119_v23 = vmul.f32 0.02, %v1057_v45  ;;  %v1182_v7 = vmax.f32 %v1008_v0, %v1118_v9  ;;  %v5425_v0 = vld [vmem:[#allocation20_spill] sm:$0xff]  ;;  %v5432_v9 = vld [vmem:[#allocation23_spill] sm:$0xff] }
 0x15f   : > { %v1013_v36 = vadd.f32 %v1012_v48, %v3815_v43  ;;  %v1061_v25 = vpop.f32.mrf.mxu3  ;;  %1384 = vmatpush.bf16.msrb.mxu0 %v1220_v61  ;;  %v1050_v61 = vadd.f32 %v5420_v60, %v3811_v41  ;;  %v1106_v41 = vmul.f32 0.02, %v4130_v2  ;;  %v1178_v13 = vmax.f32 %v1006_v63, %v1114_v44  ;;  %v5426_v63 = vld [vmem:[#allocation19_spill] sm:$0xff] }
 0x160   : > { %v1062_v26 = vadd.f32 %v1061_v25, %v3815_v43  ;;  %1433 = vmatpush.bf16.msrb.mxu1 %v1221_v20  ;;  %v1217_v43 = vpack.c.bf16 %v1181_v5, %v1177_v30  ;;  %v1111_v51 = vmul.f32 0.02, %v1052_v56  ;;  %v1212_v30 = vpack.c.bf16 %v1172_v34, %v5422_v22  ;;  %v5431_v34 = vld [vmem:[#allocation61_spill] sm:$0xff]  ;;  %v5440_v60 = vld [vmem:[#allocation51_spill] sm:$0xff] }
 0x161   : > { %v1126_v1 = vmul.f32 0.02, %v1013_v36  ;;  %v1183_v58 = vmax.f32 %v1057_v45, %v1119_v23  ;;  %v1213_v62 = vpack.c.bf16 %v1173_v11, %v5423_v4  ;;  %v4171_v52 = vadd.f32 %v5424_v47, %v3841_v57  ;;  %v5447_v22 = vld [vmem:[#allocation63_spill] sm:$0xff] }
 0x162   : > { %v1127_v31 = vmul.f32 0.02, %v1062_v26  ;;  %v1045_v24 = vadd.f32 %v5425_v0, %v3827_v50  ;;  %v1107_v42 = vmul.f32 0.02, %v1050_v61  ;;  %v1179_v45 = vmax.f32 %v1055_v14, %v1115_v55 }
 0x163   : > { %v1190_v48 = vmax.f32 %v1013_v36, %v1126_v1  ;;  %1385 = vmatpush.bf16.msrb.mxu0 %v1216_v33  ;;  %v4177_v19 = vadd.f32 %v5426_v63, %v3841_v57  ;;  %v1218_v40 = vpack.c.bf16 %v1182_v7, %v1178_v13  ;;  %v1174_v29 = vmax.f32 %v1003_v54, %v1110_v53  ;;  %v5433_v1 = vld [vmem:[#allocation15_spill] sm:$0xff]  ;;  %v5444_v7 = vld [vmem:[#allocation48_spill] sm:$0xff] }
 0x164   : > { %v1191_v38 = vmax.f32 %v1062_v26, %v1127_v31  ;;  %1434 = vmatpush.bf16.msrb.mxu1 %v1217_v43  ;;  %v1103_v8 = vmul.f32 0.02, %v4158_v17  ;;  %v1219_v18 = vpack.c.bf16 %v1183_v58, %v1179_v45  ;;  %v5427_v36 = vmax.f32 %v3983_v27, %v4033_v39  ;;  %v5430_v26 = vld [vmem:[#allocation65_spill] sm:$0xff]  ;;  %v5438_v43 = vld [vmem:[#allocation58_spill] sm:$0xff]  ;;  %v5450_v13 = vld [vmem:[#allocation12_spill] sm:$0xff] }
 0x165   : > { %v1222_v49 = vpack.c.bf16 %v1190_v48, %v1186_v32  ;;  %v5428_v50 = vmax.f32 %v4022_v21, %v4071_v3  ;;  %v1175_v20 = vmax.f32 %v1052_v56, %v1111_v51  ;;  %v1098_v5 = vmul.f32 0.02, %v4097_v37  ;;  %v5434_v27 = vld [vmem:[#allocation21_spill] sm:$0xff]  ;;  %v5437_v32 = vld [vmem:[#allocation47_spill] sm:$0xff] }
 0x166   : > { %v1223_v46 = vpack.c.bf16 %v1191_v38, %v1187_v6  ;;  %v1170_v57 = vmax.f32 %v4130_v2, %v1106_v41  ;;  %v5429_v14 = vmax.f32 %v3996_v35, %v4047_v59  ;;  %v1157_v54 = vmax.f32 %v5431_v34, %v5430_v26  ;;  %v5435_v3 = vld [vmem:[#allocation17_spill] sm:$0xff]  ;;  %v5436_v2 = vld [vmem:[#allocation16_spill] sm:$0xff]  ;;  %v5445_v51 = vld [vmem:[#allocation59_spill] sm:$0xff] }
 0x167   : > { %1482 = vmatpush.bf16.msrb.mxu2 %v1222_v49  ;;  %1386 = vmatpush.bf16.msrb.mxu0 %v1212_v30  ;;  %v1208_v25 = vpack.c.bf16 %v5428_v50, %v5427_v36  ;;  %v4196_v39 = vadd.f32 %v5433_v1, %v5432_v9  ;;  %v1040_v21 = vadd.f32 %v5435_v3, %v5434_v27  ;;  %v1099_v11 = vmul.f32 0.02, %v1045_v24  ;;  %v5448_v30 = vld [vmem:[#allocation55_spill] sm:$0xff]  ;;  %v5449_v41 = vld [vmem:[#allocation36_spill] sm:$0xff]  ;;  %v5457_v50 = vld [vmem:[#allocation46_spill] sm:$0xff] }
 0x168   : > { %1531 = vmatpush.bf16.msrb.mxu3 %v1223_v46  ;;  %1435 = vmatpush.bf16.msrb.mxu1 %v1213_v62  ;;  %v1209_v28 = vpack.c.bf16 %v1165_v16, %v5429_v14  ;;  %v1171_v56 = vmax.f32 %v1050_v61, %v1107_v42  ;;  %v4202_v23 = vadd.f32 %v5436_v2, %v5432_v9  ;;  %v1094_v59 = vmul.f32 0.02, %v4171_v52  ;;  %v5441_v61 = vld [vmem:[#allocation60_spill] sm:$0xff]  ;;  %v5451_v62 = vld [vmem:[#allocation26_spill] sm:$0xff]  ;;  %v5462_v34 = vld [vmem:[#allocation53_spill] sm:$0xff] }
 0x169   : > { %v1214_v35 = vpack.c.bf16 %v1174_v29, %v1170_v57  ;;  %v1166_v31 = vmax.f32 %v4110_v12, %v1102_v10  ;;  %v1095_v33 = vmul.f32 0.02, %v4177_v19  ;;  %v5439_v48 = vmax.f32 %v5437_v32, %v5438_v43  ;;  %v5452_v16 = vld [vmem:[#allocation14_spill] sm:$0xff]  ;;  %v5465_v1 = vld [vmem:[#allocation44_spill] sm:$0xff]  ;;  %v5468_v2 = vld [vmem:[#allocation25_spill] sm:$0xff] }
 0x16a   : > { %v1215_v44 = vpack.c.bf16 %v1175_v20, %v1171_v56  ;;  %v5442_v55 = vmax.f32 %v5440_v60, %v5441_v61  ;;  %v1167_v38 = vmax.f32 %v4158_v17, %v1103_v8  ;;  %v1090_v53 = vmul.f32 0.02, %v5443_v15  ;;  %v5454_v8 = vld [vmem:[#allocation41_spill] sm:$0xff]  ;;  %v5460_v57 = vld [vmem:[#allocation62_spill] sm:$0xff] }
 0x16b   : > { %1483 = vmatpush.bf16.msrb.mxu2 %v1218_v40  ;;  %1387 = vmatpush.bf16.msrb.mxu0 %v1208_v25  ;;  %v1162_v49 = vmax.f32 %v4097_v37, %v1098_v5  ;;  %v5446_v12 = vmax.f32 %v5444_v7, %v5445_v51  ;;  %v1149_v58 = vmax.f32 %v5448_v30, %v5447_v22  ;;  %v1091_v17 = vmul.f32 0.02, %v1040_v21  ;;  %v5453_v37 = vld [vmem:[#allocation13_spill] sm:$0xff]  ;;  %v5461_v26 = vld [vmem:[#allocation42_spill] sm:$0xff]  ;;  %v5477_v51 = vld [vmem:[#allocation56_spill] sm:$0xff] }
 0x16c   : > { %1532 = vmatpush.bf16.msrb.mxu3 %v1219_v18  ;;  %1436 = vmatpush.bf16.msrb.mxu1 %v1209_v28  ;;  %v1204_v6 = vpack.c.bf16 %v5442_v55, %v5439_v48  ;;  %v4223_v4 = vadd.f32 %v5450_v13, %v5449_v41  ;;  %v1035_v47 = vadd.f32 %v5452_v16, %v5451_v62  ;;  %v1086_v45 = vmul.f32 0.02, %v4196_v39  ;;  %v5455_v18 = vld [vmem:[#allocation52_spill] sm:$0xff]  ;;  %v5458_v25 = vld [vmem:[#allocation57_spill] sm:$0xff]  ;;  %v5464_v9 = vld [vmem:[#allocation54_spill] sm:$0xff] }
 0x16d   : > { %v1205_v46 = vpack.c.bf16 %v1157_v54, %v5446_v12  ;;  %v1163_v0 = vmax.f32 %v1045_v24, %v1099_v11  ;;  %v1032_v42 = vadd.f32 %v5453_v37, %v5449_v41  ;;  %v1210_v63 = vpack.c.bf16 %v1166_v31, %v1162_v49  ;;  %v5466_v3 = vld [vmem:[#allocation30_spill] sm:$0xff]  ;;  %v5467_v11 = vld [vmem:[#allocation9_spill] sm:$0xff]  ;;  %v5471_v55 = vld [vmem:[#allocation32_spill] sm:$0xff] }
 0x16e   : > { %v1158_v10 = vmax.f32 %v4171_v52, %v1094_v59  ;;  %v1087_v40 = vmul.f32 0.02, %v4202_v23  ;;  %v5456_v36 = vmax.f32 %v5454_v8, %v5455_v18  ;;  %v5459_v24 = vmax.f32 %v5457_v50, %v5458_v25  ;;  %v5469_v59 = vld [vmem:[#allocation11_spill] sm:$0xff]  ;;  %v5481_v41 = vld [vmem:[#allocation49_spill] sm:$0xff]  ;;  %v5482_v13 = vld [vmem:[#allocation38_spill] sm:$0xff] }
 0x16f   : > { %1484 = vmatpush.bf16.msrb.mxu2 %v1214_v35  ;;  %1388 = vmatpush.bf16.msrb.mxu0 %v1204_v6  ;;  %v1211_v29 = vpack.c.bf16 %v1167_v38, %v1163_v0  ;;  %v1159_v5 = vmax.f32 %v4177_v19, %v1095_v33  ;;  %v1082_v14 = vmul.f32 0.02, %v5460_v57  ;;  %v1154_v28 = vmax.f32 %v5443_v15, %v1090_v53  ;;  %v5470_v33 = vld [vmem:[#allocation10_spill] sm:$0xff]  ;;  %v5472_v6 = vld [vmem:[#allocation40_spill] sm:$0xff]  ;;  %v5474_v15 = vld [vmem:[#allocation39_spill] sm:$0xff] }
 0x170   : > { %1533 = vmatpush.bf16.msrb.mxu3 %v1215_v44  ;;  %1437 = vmatpush.bf16.msrb.mxu1 %v1205_v46  ;;  %v1200_v20 = vpack.c.bf16 %v5459_v24, %v5456_v36  ;;  %v5463_v52 = vmax.f32 %v5461_v26, %v5462_v34  ;;  %v1141_v27 = vmax.f32 %v5465_v1, %v5464_v9  ;;  %v1083_v31 = vmul.f32 0.02, %v1035_v47  ;;  %v5475_v53 = vld [vmem:[#allocation50_spill] sm:$0xff]  ;;  %v5478_v22 = vld [vmem:[#allocation35_spill] sm:$0xff]  ;;  %v5485_v8 = vld [vmem:[#allocation28_spill] sm:$0xff] }
 0x171   : > { %v978_v56 = vadd.f32 %v5467_v11, %v5466_v3  ;;  %v1030_v35 = vadd.f32 %v5469_v59, %v5468_v2  ;;  %v1155_v19 = vmax.f32 %v1040_v21, %v1091_v17  ;;  %v1027_v44 = vadd.f32 %v5470_v33, %v5466_v3  ;;  %v5479_v30 = vld [vmem:[#allocation43_spill] sm:$0xff]  ;;  %v5484_v17 = vld [vmem:[#allocation8_spill] sm:$0xff]  ;;  %v5486_v18 = vld [vmem:[#allocation33_spill] sm:$0xff] }
 0x172   : > { %v1201_v54 = vpack.c.bf16 %v1149_v58, %v5463_v52  ;;  %v1078_v32 = vmul.f32 0.02, %v4223_v4  ;;  %v1206_v43 = vpack.c.bf16 %v1158_v10, %v1154_v28  ;;  %v1150_v48 = vmax.f32 %v4196_v39, %v1086_v45  ;;  %v5483_v16 = vld [vmem:[#allocation27_spill] sm:$0xff]  ;;  %v5489_v25 = vld [vmem:[#allocation37_spill] sm:$0xff]  ;;  %v5493_v26 = vld [vmem:[#allocation34_spill] sm:$0xff] }
 0x173   : > { %1485 = vmatpush.bf16.msrb.mxu2 %v1210_v63  ;;  %1389 = vmatpush.bf16.msrb.mxu0 %v1200_v20  ;;  %v1079_v60 = vmul.f32 0.02, %v1032_v42  ;;  %v1207_v61 = vpack.c.bf16 %v1159_v5, %v1155_v19  ;;  %v5473_v38 = vmax.f32 %v5471_v55, %v5472_v6  ;;  %v5476_v49 = vmax.f32 %v5474_v15, %v5475_v53  ;;  %v5488_v50 = vld [vmem:[#allocation31_spill] sm:$0xff]  ;;  %v5492_v28 = vld [vmem:[#allocation29_spill] sm:$0xff] }
 0x174   : > { %1534 = vmatpush.bf16.msrb.mxu3 %v1211_v29  ;;  %1438 = vmatpush.bf16.msrb.mxu1 %v1201_v54  ;;  %v1151_v7 = vmax.f32 %v4202_v23, %v1087_v40  ;;  %v1074_v12 = vmul.f32 0.02, %v5477_v51  ;;  %v1146_v46 = vmax.f32 %v5460_v57, %v1082_v14  ;;  %v5480_v58 = vmax.f32 %v5478_v22, %v5479_v30  ;;  %v5491_v57 = vld [vmem:[#allocation45_spill] sm:$0xff]  ;;  %v3147_v33 = vld [vmem:[%s5243_s3 + $0x20] sm:$0xff] }
 0x175   : > { %v1196_v21 = vpack.c.bf16 %v5476_v49, %v5473_v38  ;;  %v1133_v62 = vmax.f32 %v5482_v13, %v5481_v41  ;;  %v1025_v0 = vadd.f32 %v5484_v17, %v5483_v16  ;;  %v1075_v37 = vmul.f32 0.02, %v1030_v35  ;;  %v3146_v19 = vld [vmem:[%s5243_s3 + $0x18] sm:$0xff] }
 0x176   : > { %v1197_v39 = vpack.c.bf16 %v1141_v27, %v5480_v58  ;;  %v1147_v45 = vmax.f32 %v1035_v47, %v1083_v31  ;;  %v1070_v23 = vmul.f32 0.02, %v978_v56  ;;  %v1202_v63 = vpack.c.bf16 %v1150_v48, %v1146_v46 }
 0x177   : > { %1486 = vmatpush.bf16.msrb.mxu2 %v1206_v43  ;;  %1390 = vmatpush.bf16.msrb.mxu0 %v1196_v21  ;;  %v1142_v10 = vmax.f32 %v4223_v4, %v1078_v32  ;;  %v1071_v40 = vmul.f32 0.02, %v1027_v44  ;;  %v5487_v36 = vmax.f32 %v5485_v8, %v5486_v18  ;;  %v5490_v24 = vmax.f32 %v5488_v50, %v5489_v25  ;;  %v3143_v4 = vld [vmem:[%s5243_s3] sm:$0xff]  ;;  %v3149_v32 = vld [vmem:[%s5243_s3 + $0x30] sm:$0xff]  ;;  %v3150_v43 = vld [vmem:[%s5243_s3 + $0x38] sm:$0xff]  ;;  %v4367_v8 = vpop.permute.xlu0 %1318  ;;  %v4375_v25 = vpop.permute.xlu2 %1333 }
 0x178   : > { %1535 = vmatpush.bf16.msrb.mxu3 %v1207_v61  ;;  %1439 = vmatpush.bf16.msrb.mxu1 %v1197_v39  ;;  %v1203_v29 = vpack.c.bf16 %v1151_v7, %v1147_v45  ;;  %v1143_v5 = vmax.f32 %v1032_v42, %v1079_v60  ;;  %v1066_v14 = vmul.f32 0.02, %v5491_v57  ;;  %v1138_v47 = vmax.f32 %v5477_v51, %v1074_v12 }
 0x179   : > { %v1192_v20 = vpack.c.bf16 %v5490_v24, %v5487_v36  ;;  %v5494_v34 = vmax.f32 %v5492_v28, %v5493_v26  ;;  %v1067_v54 = vmul.f32 0.02, %v1025_v0  ;;  %v1139_v9 = vmax.f32 %v1030_v35, %v1075_v37  ;;  %v3144_v35 = vld [vmem:[%s5243_s3 + $0x8] sm:$0xff] }
 0x17a   : > { %v1198_v1 = vpack.c.bf16 %v1142_v10, %v1138_v47  ;;  %v1134_v42 = vmax.f32 %v978_v56, %v1070_v23  ;;  %v1135_v3 = vmax.f32 %v1027_v44, %v1071_v40  ;;  %v1130_v11 = vmax.f32 %v5491_v57, %v1066_v14  ;;  %v3145_v56 = vld [vmem:[%s5243_s3 + $0x10] sm:$0xff]  ;;  %v3148_v44 = vld [vmem:[%s5243_s3 + $0x28] sm:$0xff]  ;;  %v4359_v23 = vpop.permute.xlu1 %1328 }
 0x17b   : > { %1487 = vmatpush.bf16.msrb.mxu2 %v1202_v63  ;;  %v1193_v52 = vpack.c.bf16 %v1133_v62, %v5494_v34  ;;  %1391 = vmatpush.bf16.msrb.mxu0 %v1192_v20  ;;  %v1199_v27 = vpack.c.bf16 %v1143_v5, %v1139_v9  ;;  %v1131_v2 = vmax.f32 %v1025_v0, %v1067_v54 }
 0x17c   : > { %1536 = vmatpush.bf16.msrb.mxu3 %v1203_v29  ;;  %v1194_v59 = vpack.c.bf16 %v1134_v42, %v1130_v11 }
 0x17d   : > { %1440 = vmatpush.bf16.msrb.mxu1 %v1193_v52  ;;  %v1195_v31 = vpack.c.bf16 %v1135_v3, %v1131_v2 }
 0x17e   : > { %1392 = vmatmul.bf16.vlgmr.msrb.gmra.mxu0 %v3143_v4 }
 0x17f   : > { %1488 = vmatpush.bf16.msrb.mxu2 %v1198_v1  ;;  %v4385_v14 = vpop.permute.xlu0 %1313  ;;  %v4391_v26 = vpop.permute.xlu2 %1308 }
 0x180   : > { %1537 = vmatpush.bf16.msrb.mxu3 %v1199_v27  ;;  %1441 = vmatmul.bf16.vlgmr.msrb.gmra.mxu1 %v3143_v4 }
 0x182   : > { %v4373_v50 = vpop.permute.xlu1 %1323 }
 0x183   : > { %1489 = vmatpush.bf16.msrb.mxu2 %v1194_v59 }
 0x184   : > { %1538 = vmatpush.bf16.msrb.mxu3 %v1195_v31 }
 0x186   : > { %1490 = vmatmul.bf16.vlgmr.msrb.gmra.mxu2 %v3143_v4 }
 0x187   : > { %1539 = vmatmul.bf16.vlgmr.msrb.gmra.mxu3 %v3143_v4  ;;  %v4399_v54 = vpop.permute.xlu0 %1288  ;;  %v4407_v27 = vpop.permute.xlu2 %1303 }
 0x188   : > { %5512 = vst [vmem:[#allocation48_spill] sm:$0xff] %v4399_v54 }
 0x18a   : > { %v4387_v47 = vpop.permute.xlu1 %1298 }
 0x18e   : > { %1397 = vmatmul.bf16.gmra.mxu0 %v3144_v35 }
 0x18f   : > { %v4415_v59 = vpop.permute.xlu0 %1283 }
 0x190   : > { %1446 = vmatmul.bf16.gmra.mxu1 %v3144_v35  ;;  %5514 = vst [vmem:[#allocation63_spill] sm:$0xff] %v4415_v59 }
 0x192   : > { %v4403_v1 = vpop.permute.xlu1 %1293 }
 0x193   : > { %5513 = vst [vmem:[#allocation59_spill] sm:$0xff] %v4403_v1 }
 0x196   : > { %1495 = vmatmul.bf16.gmra.mxu2 %v3144_v35 }
 0x197   : > { %1544 = vmatmul.bf16.gmra.mxu3 %v3144_v35 }
 0x19a   : > { %v4419_v35 = vpop.permute.xlu1 %1268 }
 0x19b   : > { %5515 = vst [vmem:[#allocation55_spill] sm:$0xff] %v4419_v35 }
 0x19e   : > { %1402 = vmatmul.bf16.gmra.mxu0 %v3145_v56 }
 0x1a0   : > { %1451 = vmatmul.bf16.gmra.mxu1 %v3145_v56 }
 0x1a6   : > { %1500 = vmatmul.bf16.gmra.mxu2 %v3145_v56 }
 0x1a7   : > { %1549 = vmatmul.bf16.gmra.mxu3 %v3145_v56 }
 0x1ae   : > { %1407 = vmatmul.bf16.gmra.mxu0 %v3146_v19 }
 0x1b0   : > { %1456 = vmatmul.bf16.gmra.mxu1 %v3146_v19 }
 0x1b6   : > { %1505 = vmatmul.bf16.gmra.mxu2 %v3146_v19 }
 0x1b7   : > { %1554 = vmatmul.bf16.gmra.mxu3 %v3146_v19 }
 0x1be   : > { %1412 = vmatmul.bf16.gmra.mxu0 %v3147_v33 }
 0x1c0   : > { %1461 = vmatmul.bf16.gmra.mxu1 %v3147_v33 }
 0x1c6   : > { %1510 = vmatmul.bf16.gmra.mxu2 %v3147_v33 }
 0x1c7   : > { %1559 = vmatmul.bf16.gmra.mxu3 %v3147_v33  ;;  %v4425_v33 = vpop.permute.xlu2 %1278 }
 0x1c8   : > { %5516 = vst [vmem:[#allocation36_spill] sm:$0xff] %v4425_v33 }
 0x1ce   : > { %1417 = vmatmul.bf16.gmra.mxu0 %v3148_v44 }
 0x1d0   : > { %1466 = vmatmul.bf16.gmra.mxu1 %v3148_v44 }
 0x1d6   : > { %1515 = vmatmul.bf16.gmra.mxu2 %v3148_v44 }
 0x1d7   : > { %1564 = vmatmul.bf16.gmra.mxu3 %v3148_v44 }
 0x1de   : > { %1422 = vmatmul.bf16.gmra.mxu0 %v3149_v32 }
 0x1e0   : > { %1471 = vmatmul.bf16.gmra.mxu1 %v3149_v32 }
 0x1e6   : > { %1520 = vmatmul.bf16.gmra.mxu2 %v3149_v32 }
 0x1e7   : > { %1569 = vmatmul.bf16.gmra.mxu3 %v3149_v32 }
 0x1ee   : > { %1427 = vmatmul.bf16.gmra.mxu0 %v3150_v43 }
 0x1f0   : > { %1476 = vmatmul.bf16.gmra.mxu1 %v3150_v43 }
 0x1f6   : > { %1525 = vmatmul.bf16.gmra.mxu2 %v3150_v43 }
 0x1f7   : > { %1574 = vmatmul.bf16.gmra.mxu3 %v3150_v43  ;;  %v4431_v43 = vpop.permute.xlu0 %1258 }
 0x1f8   : > { %5517 = vst [vmem:[#allocation12_spill] sm:$0xff] %v4431_v43 }
 0x1fb   : > { %v4307_v48 = vpop.f32.mrf.mxu0 }
 0x1fd   : > { %v4309_v60 = vpop.f32.mrf.mxu1 }
 0x203   : > { %v4311_v61 = vpop.f32.mrf.mxu0 }
 0x205   : > { %v4313_v55 = vpop.f32.mrf.mxu1 }
 0x209   : > { %v4315_v6 = vpop.f32.mrf.mxu2 }
 0x20a   : > { %5495 = vst [vmem:[#allocation24_spill] sm:$0xff] %v4315_v6  ;;  %v4317_v38 = vpop.f32.mrf.mxu3  ;;  %v4435_v6 = vadd.f32 %v4307_v48, %v4431_v43 }
 0x20b   : > { %5496 = vst [vmem:[#allocation22_spill] sm:$0xff] %v4317_v38  ;;  %v4319_v15 = vpop.f32.mrf.mxu0 }
 0x20c   : > { %5518 = vst [vmem:[#allocation26_spill] sm:$0xff] %v4435_v6  ;;  %v4455_v48 = vadd.f32 %v4319_v15, %v4419_v35 }
 0x20d   : > { %v4321_v53 = vpop.f32.mrf.mxu1 }
 0x20e   : > { %5524 = vst [vmem:[#allocation57_spill] sm:$0xff] %v4455_v48 }
 0x211   : > { %v4323_v49 = vpop.f32.mrf.mxu2 }
 0x212   : > { %5497 = vst [vmem:[#allocation18_spill] sm:$0xff] %v4323_v49  ;;  %v4325_v21 = vpop.f32.mrf.mxu3  ;;  %v4437_v49 = vpop.permute.xlu1 %1263 }
 0x213   : > { %5498 = vst [vmem:[#allocation20_spill] sm:$0xff] %v4325_v21  ;;  %v4327_v7 = vpop.f32.mrf.mxu0 }
 0x214   : > { %5519 = vst [vmem:[#allocation14_spill] sm:$0xff] %v4437_v49 }
 0x215   : > { %v4329_v51 = vpop.f32.mrf.mxu1 }
 0x219   : > { %v4331_v12 = vpop.f32.mrf.mxu2 }
 0x21a   : > { %5499 = vst [vmem:[#allocation19_spill] sm:$0xff] %v4331_v12  ;;  %v4333_v46 = vpop.f32.mrf.mxu3  ;;  %v4445_v12 = vadd.f32 %v4311_v61, %v4437_v49 }
 0x21b   : > { %5500 = vst [vmem:[#allocation65_spill] sm:$0xff] %v4333_v46  ;;  %v4335_v22 = vpop.f32.mrf.mxu0  ;;  %v4441_v46 = vadd.f32 %v4309_v60, %v4431_v43  ;;  %v4462_v60 = vadd.f32 %v4321_v53, %v4419_v35 }
 0x21c   : > { %5521 = vst [vmem:[#allocation41_spill] sm:$0xff] %v4445_v12 }
 0x21d   : > { %v4337_v30 = vpop.f32.mrf.mxu1  ;;  %5520 = vst [vmem:[#allocation13_spill] sm:$0xff] %v4441_v46  ;;  %v4475_v15 = vmul.f32 0.02, %v4441_v46 }
 0x21e   : > { %5526 = vst [vmem:[#allocation42_spill] sm:$0xff] %v4462_v60  ;;  %v4483_v53 = vadd.f32 %v4337_v30, %v4425_v33 }
 0x21f   : > { %5529 = vst [vmem:[#allocation44_spill] sm:$0xff] %v4475_v15 }
 0x220   : > { %5531 = vst [vmem:[#allocation9_spill] sm:$0xff] %v4483_v53 }
 0x221   : > { %v4339_v58 = vpop.f32.mrf.mxu2 }
 0x222   : > { %5501 = vst [vmem:[#allocation61_spill] sm:$0xff] %v4339_v58  ;;  %v4341_v39 = vpop.f32.mrf.mxu3  ;;  %v4451_v58 = vadd.f32 %v4313_v55, %v4437_v49  ;;  %v4479_v49 = vadd.f32 %v4335_v22, %v4425_v33 }
 0x223   : > { %5502 = vst [vmem:[#allocation23_spill] sm:$0xff] %v4341_v39  ;;  %v4343_v41 = vpop.f32.mrf.mxu0  ;;  %v4447_v39 = vpop.permute.xlu2 %1273 }
 0x224   : > { %5522 = vst [vmem:[#allocation52_spill] sm:$0xff] %v4447_v39  ;;  %v4466_v61 = vadd.f32 %v4327_v7, %v4447_v39  ;;  %v4470_v43 = vadd.f32 %v4329_v51, %v4447_v39  ;;  %v4487_v7 = vadd.f32 %v4343_v41, %v4415_v59  ;;  %v4492_v51 = vmul.f32 0.02, %v4445_v12 }
 0x225   : > { %v4345_v13 = vpop.f32.mrf.mxu1  ;;  %5523 = vst [vmem:[#allocation46_spill] sm:$0xff] %v4451_v58  ;;  %v4507_v41 = vmul.f32 0.02, %v4451_v58 }
 0x226   : > { %5527 = vst [vmem:[#allocation53_spill] sm:$0xff] %v4466_v61  ;;  %v4496_v39 = vadd.f32 %v4345_v13, %v4415_v59  ;;  %v4535_v13 = vmul.f32 0.02, %v4487_v7 }
 0x227   : > { %5528 = vst [vmem:[#allocation54_spill] sm:$0xff] %v4470_v43 }
 0x228   : > { %5530 = vst [vmem:[#allocation30_spill] sm:$0xff] %v4479_v49 }
 0x229   : > { %v4347_v62 = vpop.f32.mrf.mxu2  ;;  %5532 = vst [vmem:[#allocation25_spill] sm:$0xff] %v4487_v7 }
 0x22a   : > { %5503 = vst [vmem:[#allocation15_spill] sm:$0xff] %v4347_v62  ;;  %v4349_v16 = vpop.f32.mrf.mxu3  ;;  %v4510_v62 = vmul.f32 0.02, %v4455_v48 }
 0x22b   : > { %5504 = vst [vmem:[#allocation21_spill] sm:$0xff] %v4349_v16  ;;  %v4351_v17 = vpop.f32.mrf.mxu0  ;;  %v4458_v16 = vmul.f32 0.02, %v4435_v6  ;;  %v4540_v6 = vmul.f32 0.02, %v4496_v39 }
 0x22c   : > { %5533 = vst [vmem:[#allocation11_spill] sm:$0xff] %v4492_v51  ;;  %v4500_v22 = vadd.f32 %v4351_v17, %v4399_v54  ;;  %v4518_v17 = vmul.f32 0.02, %v4462_v60 }
 0x22d   : > { %v4353_v0 = vpop.f32.mrf.mxu1  ;;  %5525 = vst [vmem:[#allocation62_spill] sm:$0xff] %v4458_v16 }
 0x22e   : > { %5534 = vst [vmem:[#allocation10_spill] sm:$0xff] %v4496_v39  ;;  %v4504_v30 = vadd.f32 %v4353_v0, %v4399_v54  ;;  %v4524_v0 = vmul.f32 0.02, %v4470_v43  ;;  %v4543_v54 = vmul.f32 0.02, %v4500_v22 }
 0x22f   : > { %5536 = vst [vmem:[#allocation40_spill] sm:$0xff] %v4507_v41 }
 0x230   : > { %5535 = vst [vmem:[#allocation32_spill] sm:$0xff] %v4504_v30 }
 0x231   : > { %v4355_v37 = vpop.f32.mrf.mxu2  ;;  %5537 = vst [vmem:[#allocation39_spill] sm:$0xff] %v4510_v62 }
 0x232   : > { %5505 = vst [vmem:[#allocation17_spill] sm:$0xff] %v4355_v37  ;;  %v4357_v45 = vpop.f32.mrf.mxu3  ;;  %v4521_v37 = vmul.f32 0.02, %v4466_v61 }
 0x233   : > { %5506 = vst [vmem:[#allocation16_spill] sm:$0xff] %v4357_v45  ;;  %v1410_v63 = vpop.f32.mrf.mxu0 }
 0x234   : > { %v4513_v33 = vadd.f32 %v1410_v63, %v4403_v1  ;;  %5539 = vst [vmem:[#allocation56_spill] sm:$0xff] %v4518_v17  ;;  %v4529_v63 = vmul.f32 0.02, %v4479_v49 }
 0x235   : > { %v4361_v10 = vpop.f32.mrf.mxu1  ;;  %5540 = vst [vmem:[#allocation35_spill] sm:$0xff] %v4521_v37 }
 0x236   : > { %5538 = vst [vmem:[#allocation50_spill] sm:$0xff] %v4513_v33  ;;  %v4557_v16 = vadd.f32 %v4361_v10, %v4403_v1 }
 0x237   : > { %5541 = vst [vmem:[#allocation43_spill] sm:$0xff] %v4524_v0 }
 0x238   : > { %5542 = vst [vmem:[#allocation49_spill] sm:$0xff] %v4529_v63  ;;  %v4587_v58 = vmul.f32 0.02, %v4557_v16 }
 0x239   : > { %v4363_v40 = vpop.f32.mrf.mxu2  ;;  %5544 = vst [vmem:[#allocation27_spill] sm:$0xff] %v4535_v13 }
 0x23a   : > { %5507 = vst [vmem:[#allocation47_spill] sm:$0xff] %v4363_v40  ;;  %v4365_v29 = vpop.f32.mrf.mxu3  ;;  %v4532_v40 = vmul.f32 0.02, %v4483_v53 }
 0x23b   : > { %5508 = vst [vmem:[#allocation58_spill] sm:$0xff] %v4365_v29  ;;  %v4369_v18 = vpop.f32.mrf.mxu0  ;;  %v4546_v29 = vmul.f32 0.02, %v4504_v30 }
 0x23c   : > { %5543 = vst [vmem:[#allocation38_spill] sm:$0xff] %v4532_v40 }
 0x23d   : > { %v4371_v36 = vpop.f32.mrf.mxu1  ;;  %5545 = vst [vmem:[#allocation8_spill] sm:$0xff] %v4540_v6 }
 0x23e   : > { %5546 = vst [vmem:[#allocation28_spill] sm:$0xff] %v4546_v29  ;;  %v4599_v10 = vadd.f32 %v4371_v36, %v4387_v47 }
 0x240   : > { %v1613_v30 = vmul.f32 0.02, %v4599_v10 }
 0x241   : > { %v4377_v24 = vpop.f32.mrf.mxu2 }
 0x242   : > { %5509 = vst [vmem:[#allocation51_spill] sm:$0xff] %v4377_v24  ;;  %v4379_v20 = vpop.f32.mrf.mxu3 }
 0x243   : > { %5510 = vst [vmem:[#allocation60_spill] sm:$0xff] %v4379_v20  ;;  %v4381_v5 = vpop.f32.mrf.mxu0  ;;  %v4553_v20 = vmul.f32 0.02, %v4513_v33 }
 0x245   : > { %v4383_v57 = vpop.f32.mrf.mxu1  ;;  %5547 = vst [vmem:[#allocation33_spill] sm:$0xff] %v4553_v20 }
 0x249   : > { %v4389_v28 = vpop.f32.mrf.mxu2 }
 0x24a   : > { %v4393_v34 = vpop.f32.mrf.mxu3 }
 0x24b   : > { %5511 = vst [vmem:[#allocation64_spill] sm:$0xff] %v4393_v34  ;;  %v4395_v52 = vpop.f32.mrf.mxu0 }
 0x24d   : > { %v4397_v4 = vpop.f32.mrf.mxu1 }
 0x251   : > { %v4401_v9 = vpop.f32.mrf.mxu2 }
 0x252   : > { %v4405_v42 = vpop.f32.mrf.mxu3 }
 0x253   : > { %v4409_v3 = vpop.f32.mrf.mxu0 }
 0x255   : > { %v4411_v11 = vpop.f32.mrf.mxu1 }
 0x256   : > { %v1470_v36 = vadd.f32 %v4411_v11, %v4385_v14 }
 0x258   : > { %v1625_v34 = vmul.f32 0.02, %v1470_v36 }
 0x259   : > { %v4413_v2 = vpop.f32.mrf.mxu2 }
 0x25a   : > { %v4417_v31 = vpop.f32.mrf.mxu3 }
 0x25b   : > { %v4421_v56 = vpop.f32.mrf.mxu0 }
 0x25c   : > { %v1424_v12 = vadd.f32 %v4421_v56, %v4367_v8  ;;  %v1421_v56 = vadd.f32 %v4409_v3, %v4385_v14 }
 0x25d   : > { %v4423_v19 = vpop.f32.mrf.mxu1 }
 0x25e   : > { %v1628_v39 = vmul.f32 0.02, %v1424_v12  ;;  %v1624_v1 = vmul.f32 0.02, %v1421_v56 }
 0x261   : > { %v4427_v44 = vpop.f32.mrf.mxu2 }
 0x262   : > { %v4429_v32 = vpop.f32.mrf.mxu3 }
 0x263   : > { %v1425_v38 = vpop.f32.mrf.mxu0 }
 0x264   : > { %v1426_v46 = vadd.f32 %v1425_v38, %v4373_v50 }
 0x265   : > { %v1474_v21 = vpop.f32.mrf.mxu1 }
 0x266   : > { %v1475_v0 = vadd.f32 %v1474_v21, %v4373_v50  ;;  %v1632_v61 = vmul.f32 0.02, %v1426_v46 }
 0x268   : > { %v1633_v48 = vmul.f32 0.02, %v1475_v0  ;;  %v1696_v29 = vmax.f32 %v1426_v46, %v1632_v61 }
 0x269   : > { %v4472_v55 = vpop.f32.mrf.mxu2 }
 0x26a   : > { %v4489_v35 = vpop.f32.mrf.mxu3  ;;  %v1697_v20 = vmax.f32 %v1475_v0, %v1633_v48 }
 0x26b   : > { %v1428_v45 = vpop.f32.mrf.mxu0 }
 0x26c   : > { %v1429_v15 = vadd.f32 %v1428_v45, %v4359_v23  ;;  %v1414_v45 = vadd.f32 %v4369_v18, %v4387_v47  ;;  %v4606_v18 = vadd.f32 %v4383_v57, %v4407_v27  ;;  %v1468_v57 = vadd.f32 %v4397_v4, %v4391_v26 }
 0x26d   : > { %v1477_v59 = vpop.f32.mrf.mxu1 }
 0x26e   : > { %v1478_v51 = vadd.f32 %v1477_v59, %v4359_v23  ;;  %v1416_v59 = vadd.f32 %v4381_v5, %v4407_v27  ;;  %v1636_v43 = vmul.f32 0.02, %v1429_v15  ;;  %v1473_v5 = vadd.f32 %v4423_v19, %v4367_v8 }
 0x26f   : > { %v1419_v19 = vadd.f32 %v4395_v52, %v4391_v26  ;;  %v1612_v49 = vmul.f32 0.02, %v1414_v45 }
 0x270   : > { %v1637_v37 = vmul.f32 0.02, %v1478_v51  ;;  %v1616_v62 = vmul.f32 0.02, %v1416_v59  ;;  %v1629_v13 = vmul.f32 0.02, %v1473_v5 }
 0x271   : > { %v4566_v41 = vpop.f32.mrf.mxu2  ;;  %v1676_v46 = vmax.f32 %v1414_v45, %v1612_v49 }
 0x272   : > { %v4575_v17 = vpop.f32.mrf.mxu3  ;;  %v1701_v3 = vmax.f32 %v1478_v51, %v1637_v37  ;;  %v1680_v33 = vmax.f32 %v1416_v59, %v1616_v62  ;;  %v1673_v37 = vmax.f32 %v4557_v16, %v4587_v58  ;;  %v1693_v4 = vmax.f32 %v1473_v5, %v1629_v13  ;;  %v5559_v58 = vld [vmem:[#allocation48_spill] sm:$0xff]  ;;  %v5560_v16 = vld [vmem:[#allocation47_spill] sm:$0xff] }
 0x273   : > { %v1430_v24 = vpop.f32.mrf.mxu0  ;;  %v1677_v62 = vmax.f32 %v4599_v10, %v1613_v30  ;;  %v1573_v13 = vadd.f32 %v4575_v17, %v4373_v50 }
 0x274   : > { %v1431_v38 = vadd.f32 %v1430_v24, %v4375_v25  ;;  %v1724_v49 = vpack.c.bf16 %v1680_v33, %v1676_v46 }
 0x275   : > { %v1479_v60 = vpop.f32.mrf.mxu1  ;;  %v1635_v5 = vmul.f32 0.02, %v1573_v13 }
 0x276   : > { %v1480_v21 = vadd.f32 %v1479_v60, %v4375_v25  ;;  %v1640_v24 = vmul.f32 0.02, %v1431_v38  ;;  %v1700_v60 = vmax.f32 %v1429_v15, %v1636_v43  ;;  %v1617_v43 = vmul.f32 0.02, %v4606_v18 }
 0x277   : > { %v1620_v15 = vmul.f32 0.02, %v1419_v19 }
 0x278   : > { %v1641_v6 = vmul.f32 0.02, %v1480_v21  ;;  %v1704_v40 = vmax.f32 %v1431_v38, %v1640_v24  ;;  %v1692_v38 = vmax.f32 %v1424_v12, %v1628_v39  ;;  %v1524_v12 = vadd.f32 %v4566_v41, %v4373_v50 }
 0x279   : > { %v1526_v53 = vpop.f32.mrf.mxu2  ;;  %v1733_v39 = vpack.c.bf16 %v1697_v20, %v1693_v4  ;;  %v1681_v0 = vmax.f32 %v4606_v18, %v1617_v43  ;;  %v1684_v59 = vmax.f32 %v1419_v19, %v1620_v15  ;;  %v1571_v20 = vadd.f32 %v4489_v35, %v4367_v8  ;;  %v5549_v15 = vld [vmem:[#allocation50_spill] sm:$0xff] }
 0x27a   : > { %v1705_v7 = vmax.f32 %v1480_v21, %v1641_v6  ;;  %v1575_v63 = vpop.f32.mrf.mxu3  ;;  %v1736_v11 = vpack.c.bf16 %v1704_v40, %v1700_v60  ;;  %v1621_v6 = vmul.f32 0.02, %v1468_v57  ;;  %v1527_v51 = vadd.f32 %v1526_v53, %v4359_v23 }
 0x27b   : > { %v1688_v40 = vmax.f32 %v1421_v56, %v1624_v1  ;;  %v1576_v61 = vadd.f32 %v1575_v63, %v4359_v23  ;;  %v1732_v48 = vpack.c.bf16 %v1696_v29, %v1692_v38  ;;  %v1522_v23 = vadd.f32 %v4472_v55, %v4367_v8  ;;  %v5550_v38 = vld [vmem:[#allocation33_spill] sm:$0xff] }
 0x27c   : > { %v1737_v52 = vpack.c.bf16 %v1705_v7, %v1701_v3  ;;  %1900 = vmatpush.bf16.msra.mxu0 %v1736_v11  ;;  %v1689_v7 = vmax.f32 %v1470_v36, %v1625_v34  ;;  %v1685_v1 = vmax.f32 %v1468_v57, %v1621_v6  ;;  %v1638_v29 = vmul.f32 0.02, %v1527_v51 }
 0x27d   : > { %v1639_v41 = vmul.f32 0.02, %v1576_v61  ;;  %v1728_v10 = vpack.c.bf16 %v1688_v40, %v1684_v59  ;;  %v1519_v50 = vadd.f32 %v4427_v44, %v4385_v14  ;;  %v1634_v33 = vmul.f32 0.02, %v1524_v12  ;;  %v5553_v40 = vld [vmem:[#allocation32_spill] sm:$0xff] }
 0x27e   : > { %1949 = vmatpush.bf16.msra.mxu1 %v1737_v52  ;;  %v1729_v45 = vpack.c.bf16 %v1689_v7, %v1685_v1  ;;  %v4638_v55 = vadd.f32 %v4429_v32, %v4385_v14  ;;  %v1725_v18 = vpack.c.bf16 %v1681_v0, %v1677_v62  ;;  %v1517_v8 = vadd.f32 %v4413_v2, %v4391_v26  ;;  %v5556_v62 = vld [vmem:[#allocation59_spill] sm:$0xff] }
 0x27f   : > { %v1630_v35 = vmul.f32 0.02, %v1522_v23  ;;  %v1566_v44 = vadd.f32 %v4417_v31, %v4391_v26  ;;  %v1631_v24 = vmul.f32 0.02, %v1571_v20  ;;  %v1703_v36 = vmax.f32 %v1576_v61, %v1639_v41  ;;  %v5554_v61 = vld [vmem:[#allocation28_spill] sm:$0xff]  ;;  %v5557_v7 = vld [vmem:[#allocation51_spill] sm:$0xff] }
 0x280   : > { %1901 = vmatpush.bf16.msra.mxu0 %v1732_v48  ;;  %v4646_v14 = vadd.f32 %v4401_v9, %v4407_v27  ;;  %v1626_v32 = vmul.f32 0.02, %v1519_v50  ;;  %v1698_v60 = vmax.f32 %v1524_v12, %v1634_v33  ;;  %v4650_v2 = vadd.f32 %v4405_v42, %v4407_v27  ;;  %v5552_v27 = vld [vmem:[#allocation64_spill] sm:$0xff] }
 0x281   : > { %v1528_v53 = vpop.f32.mrf.mxu2  ;;  %v1627_v3 = vmul.f32 0.02, %v4638_v55  ;;  %v1699_v11 = vmax.f32 %v1573_v13, %v1635_v5  ;;  %v1512_v26 = vadd.f32 %v4389_v28, %v4387_v47  ;;  %v1622_v31 = vmul.f32 0.02, %v1517_v8 }
 0x282   : > { %v1529_v34 = vadd.f32 %v1528_v53, %v4375_v25  ;;  %v1577_v30 = vpop.f32.mrf.mxu3  ;;  %1950 = vmatpush.bf16.msra.mxu1 %v1733_v39  ;;  %v1694_v43 = vmax.f32 %v1522_v23, %v1630_v35  ;;  %v5548_v9 = vmax.f32 %v4500_v22, %v4543_v54  ;;  %v5551_v6 = vmax.f32 %v5549_v15, %v5550_v38  ;;  %v5561_v23 = vld [vmem:[#allocation30_spill] sm:$0xff]  ;;  %v5579_v38 = vld [vmem:[#allocation57_spill] sm:$0xff] }
 0x283   : > { %v1578_v63 = vadd.f32 %v1577_v30, %v4375_v25  ;;  %v1702_v25 = vmax.f32 %v1527_v51, %v1638_v29  ;;  %v1561_v4 = vadd.f32 %v5552_v27, %v4387_v47  ;;  %v1623_v51 = vmul.f32 0.02, %v1566_v44  ;;  %v5558_v47 = vld [vmem:[#allocation60_spill] sm:$0xff]  ;;  %v5562_v29 = vld [vmem:[#allocation49_spill] sm:$0xff]  ;;  %v5583_v27 = vld [vmem:[#allocation35_spill] sm:$0xff] }
 0x284   : > { %v1642_v17 = vmul.f32 0.02, %v1529_v34  ;;  %1902 = vmatpush.bf16.msra.mxu0 %v1728_v10  ;;  %v1720_v42 = vpack.c.bf16 %v5551_v6, %v5548_v9  ;;  %v1695_v46 = vmax.f32 %v1571_v20, %v1631_v24  ;;  %v5555_v28 = vmax.f32 %v5553_v40, %v5554_v61  ;;  %v5564_v30 = vld [vmem:[#allocation25_spill] sm:$0xff]  ;;  %v5565_v20 = vld [vmem:[#allocation27_spill] sm:$0xff]  ;;  %v5567_v10 = vld [vmem:[#allocation58_spill] sm:$0xff] }
 0x285   : > { %v1643_v21 = vmul.f32 0.02, %v1578_v63  ;;  %v4671_v54 = vadd.f32 %v5557_v7, %v5556_v62  ;;  %v1618_v22 = vmul.f32 0.02, %v4646_v14  ;;  %v1690_v12 = vmax.f32 %v1519_v50, %v1626_v32  ;;  %v5585_v40 = vld [vmem:[#allocation21_spill] sm:$0xff] }
 0x286   : > { %v1706_v56 = vmax.f32 %v1529_v34, %v1642_v17  ;;  %1951 = vmatpush.bf16.msra.mxu1 %v1729_v45  ;;  %v1721_v48 = vpack.c.bf16 %v1673_v37, %v5555_v28  ;;  %v1734_v39 = vpack.c.bf16 %v1698_v60, %v1694_v43  ;;  %v4676_v0 = vadd.f32 %v5558_v47, %v5556_v62  ;;  %v5568_v45 = vld [vmem:[#allocation9_spill] sm:$0xff]  ;;  %v5576_v60 = vld [vmem:[#allocation16_spill] sm:$0xff] }
 0x287   : > { %v1707_v19 = vmax.f32 %v1578_v63, %v1643_v21  ;;  %v1619_v59 = vmul.f32 0.02, %v4650_v2  ;;  %v1691_v13 = vmax.f32 %v4638_v55, %v1627_v3  ;;  %v1735_v53 = vpack.c.bf16 %v1699_v11, %v1695_v46  ;;  %v5569_v55 = vld [vmem:[#allocation38_spill] sm:$0xff]  ;;  %v5587_v62 = vld [vmem:[#allocation56_spill] sm:$0xff] }
 0x288   : > { %v1738_v57 = vpack.c.bf16 %v1706_v56, %v1702_v25  ;;  %1903 = vmatpush.bf16.msra.mxu0 %v1724_v49  ;;  %v1507_v37 = vadd.f32 %v5560_v16, %v5559_v58  ;;  %v1614_v49 = vmul.f32 0.02, %v1512_v26  ;;  %v1686_v1 = vmax.f32 %v1517_v8, %v1622_v31  ;;  %v5571_v21 = vld [vmem:[#allocation10_spill] sm:$0xff]  ;;  %v5574_v25 = vld [vmem:[#allocation63_spill] sm:$0xff]  ;;  %v5575_v56 = vld [vmem:[#allocation17_spill] sm:$0xff] }
 0x289   : > { %v1739_v52 = vpack.c.bf16 %v1707_v19, %v1703_v36  ;;  %v5563_v34 = vmax.f32 %v5561_v23, %v5562_v29  ;;  %v5566_v41 = vmax.f32 %v5564_v30, %v5565_v20  ;;  %v1556_v50 = vadd.f32 %v5567_v10, %v5559_v58  ;;  %v5578_v31 = vld [vmem:[#allocation15_spill] sm:$0xff]  ;;  %v5592_v47 = vld [vmem:[#allocation52_spill] sm:$0xff]  ;;  %v5597_v10 = vld [vmem:[#allocation26_spill] sm:$0xff] }
 0x28a   : > { %1952 = vmatpush.bf16.msra.mxu1 %v1725_v18  ;;  %1998 = vmatpush.bf16.msra.mxu2 %v1738_v57  ;;  %v1615_v33 = vmul.f32 0.02, %v1561_v4  ;;  %v1687_v17 = vmax.f32 %v1566_v44, %v1623_v51  ;;  %v5570_v5 = vmax.f32 %v5568_v45, %v5569_v55  ;;  %v5572_v18 = vld [vmem:[#allocation8_spill] sm:$0xff]  ;;  %v4698_v24 = vadd.f32 %v5575_v56, %v5574_v25  ;;  %v5596_v30 = vld [vmem:[#allocation19_spill] sm:$0xff] }
 0x28b   : > { %2047 = vmatpush.bf16.msra.mxu3 %v1739_v52  ;;  %v1716_v63 = vpack.c.bf16 %v5566_v41, %v5563_v34  ;;  %v5573_v8 = vmax.f32 %v5571_v21, %v5572_v18  ;;  %v1610_v36 = vmul.f32 0.02, %v4671_v54  ;;  %v1682_v19 = vmax.f32 %v4646_v14, %v1618_v22  ;;  %v5577_v52 = vld [vmem:[#allocation36_spill] sm:$0xff]  ;;  %v5580_v14 = vld [vmem:[#allocation39_spill] sm:$0xff]  ;;  %v5589_v22 = vld [vmem:[#allocation54_spill] sm:$0xff] }
 0x28c   : > { %1904 = vmatpush.bf16.msra.mxu0 %v1720_v42  ;;  %v1730_v32 = vpack.c.bf16 %v1690_v12, %v1686_v1  ;;  %v4704_v44 = vadd.f32 %v5576_v60, %v5574_v25  ;;  %v1611_v57 = vmul.f32 0.02, %v4676_v0  ;;  %v1683_v3 = vmax.f32 %v4650_v2, %v1619_v59  ;;  %v5582_v42 = vld [vmem:[#allocation53_spill] sm:$0xff]  ;;  %v5595_v34 = vld [vmem:[#allocation55_spill] sm:$0xff]  ;;  %v5605_v25 = vld [vmem:[#allocation44_spill] sm:$0xff] }
 0x28d   : > { %v1717_v35 = vpack.c.bf16 %v5573_v8, %v5570_v5  ;;  %v1731_v11 = vpack.c.bf16 %v1691_v13, %v1687_v17  ;;  %v1502_v43 = vadd.f32 %v5578_v31, %v5577_v52  ;;  %v1606_v9 = vmul.f32 0.02, %v1507_v37  ;;  %v5593_v59 = vld [vmem:[#allocation61_spill] sm:$0xff]  ;;  %v5601_v45 = vld [vmem:[#allocation11_spill] sm:$0xff]  ;;  %v5610_v60 = vld [vmem:[#allocation14_spill] sm:$0xff] }
 0x28e   : > { %1953 = vmatpush.bf16.msra.mxu1 %v1721_v48  ;;  %1999 = vmatpush.bf16.msra.mxu2 %v1734_v39  ;;  %v1678_v15 = vmax.f32 %v1512_v26, %v1614_v49  ;;  %v5581_v6 = vmax.f32 %v5579_v38, %v5580_v14  ;;  %v5584_v51 = vmax.f32 %v5582_v42, %v5583_v27  ;;  %v1607_v2 = vmul.f32 0.02, %v1556_v50  ;;  %v5586_v48 = vld [vmem:[#allocation42_spill] sm:$0xff]  ;;  %v5590_v26 = vld [vmem:[#allocation43_spill] sm:$0xff]  ;;  %v5600_v17 = vld [vmem:[#allocation41_spill] sm:$0xff] }
 0x28f   : > { %2048 = vmatpush.bf16.msra.mxu3 %v1735_v53  ;;  %v1551_v61 = vadd.f32 %v5585_v40, %v5577_v52  ;;  %v1679_v28 = vmax.f32 %v1561_v4, %v1615_v33  ;;  %v5588_v7 = vmax.f32 %v5586_v48, %v5587_v62  ;;  %v5591_v12 = vmax.f32 %v5589_v22, %v5590_v26  ;;  %v5594_v49 = vld [vmem:[#allocation23_spill] sm:$0xff]  ;;  %v5598_v33 = vld [vmem:[#allocation62_spill] sm:$0xff]  ;;  %v5603_v21 = vld [vmem:[#allocation65_spill] sm:$0xff] }
 0x290   : > { %1905 = vmatpush.bf16.msra.mxu0 %v1716_v63  ;;  %v1712_v46 = vpack.c.bf16 %v5584_v51, %v5581_v6  ;;  %v1499_v13 = vadd.f32 %v5593_v59, %v5592_v47  ;;  %v1602_v53 = vmul.f32 0.02, %v4698_v24  ;;  %v1674_v58 = vmax.f32 %v4671_v54, %v1610_v36  ;;  %v5607_v36 = vld [vmem:[#allocation46_spill] sm:$0xff]  ;;  %v5613_v42 = vld [vmem:[#allocation12_spill] sm:$0xff] }
 0x291   : > { %v1713_v39 = vpack.c.bf16 %v5591_v12, %v5588_v7  ;;  %v1726_v16 = vpack.c.bf16 %v1682_v19, %v1678_v15  ;;  %v1548_v1 = vadd.f32 %v5594_v49, %v5592_v47  ;;  %v1603_v4 = vmul.f32 0.02, %v4704_v44  ;;  %v5614_v27 = vld [vmem:[#allocation24_spill] sm:$0xff] }
 0x292   : > { %1954 = vmatpush.bf16.msra.mxu1 %v1717_v35  ;;  %2000 = vmatpush.bf16.msra.mxu2 %v1730_v32  ;;  %v1675_v23 = vmax.f32 %v4676_v0, %v1611_v57  ;;  %v1727_v29 = vpack.c.bf16 %v1683_v3, %v1679_v28  ;;  %v1497_v20 = vadd.f32 %v5596_v30, %v5595_v34  ;;  %v1598_v41 = vmul.f32 0.02, %v1502_v43  ;;  %v5604_v35 = vld [vmem:[#allocation13_spill] sm:$0xff]  ;;  %v5611_v57 = vld [vmem:[#allocation18_spill] sm:$0xff] }
 0x293   : > { %2049 = vmatpush.bf16.msra.mxu3 %v1731_v11  ;;  %v1670_v63 = vmax.f32 %v1507_v37, %v1606_v9  ;;  %v5599_v54 = vmax.f32 %v5597_v10, %v5598_v33  ;;  %v5602_v55 = vmax.f32 %v5600_v17, %v5601_v45  ;;  %v1546_v18 = vadd.f32 %v5603_v21, %v5595_v34  ;;  %v5608_v37 = vld [vmem:[#allocation40_spill] sm:$0xff]  ;;  %v3151_v9 = vld [vmem:[%s5245_s5] sm:$0xff]  ;;  %v3154_v34 = vld [vmem:[%s5245_s5 + $0x18] sm:$0xff] }
 0x294   : > { %1906 = vmatpush.bf16.msra.mxu0 %v1712_v46  ;;  %v1599_v0 = vmul.f32 0.02, %v1551_v61  ;;  %v1671_v8 = vmax.f32 %v1556_v50, %v1607_v2  ;;  %v5606_v56 = vmax.f32 %v5604_v35, %v5605_v25  ;;  %v5609_v19 = vmax.f32 %v5607_v36, %v5608_v37  ;;  %v5612_v50 = vld [vmem:[#allocation20_spill] sm:$0xff]  ;;  %v3155_v30 = vld [vmem:[%s5245_s5 + $0x20] sm:$0xff] }
 0x295   : > { %v1708_v5 = vpack.c.bf16 %v5602_v55, %v5599_v54  ;;  %v1494_v3 = vadd.f32 %v5611_v57, %v5610_v60  ;;  %v1594_v11 = vmul.f32 0.02, %v1499_v13  ;;  %v1666_v52 = vmax.f32 %v4698_v24, %v1602_v53  ;;  %v5615_v24 = vld [vmem:[#allocation22_spill] sm:$0xff] }
 0x296   : > { %1955 = vmatpush.bf16.msra.mxu1 %v1713_v39  ;;  %2001 = vmatpush.bf16.msra.mxu2 %v1726_v16  ;;  %v1709_v32 = vpack.c.bf16 %v5609_v19, %v5606_v56  ;;  %v1722_v31 = vpack.c.bf16 %v1674_v58, %v1670_v63  ;;  %v1543_v15 = vadd.f32 %v5612_v50, %v5610_v60  ;;  %v1595_v38 = vmul.f32 0.02, %v1548_v1  ;;  %v3158_v63 = vld [vmem:[%s5245_s5 + $0x38] sm:$0xff]  ;;  %v4808_v56 = vpop.permute.xlu1 %1834 }
 0x297   : > { %2050 = vmatpush.bf16.msra.mxu3 %v1727_v29  ;;  %v1667_v14 = vmax.f32 %v4704_v44, %v1603_v4  ;;  %v1723_v6 = vpack.c.bf16 %v1675_v23, %v1671_v8  ;;  %v1492_v51 = vadd.f32 %v5614_v27, %v5613_v42  ;;  %v1590_v46 = vmul.f32 0.02, %v1497_v20  ;;  %v3153_v29 = vld [vmem:[%s5245_s5 + $0x10] sm:$0xff]  ;;  %v4802_v8 = vpop.permute.xlu2 %1844 }
 0x298   : > { %1907 = vmatpush.bf16.msra.mxu0 %v1708_v5  ;;  %v1662_v40 = vmax.f32 %v1502_v43, %v1598_v41  ;;  %v1541_v2 = vadd.f32 %v5615_v24, %v5613_v42  ;;  %v1591_v28 = vmul.f32 0.02, %v1546_v18  ;;  %v1663_v48 = vmax.f32 %v1551_v61, %v1599_v0  ;;  %v3157_v41 = vld [vmem:[%s5245_s5 + $0x30] sm:$0xff] }
 0x299   : > { %v1586_v62 = vmul.f32 0.02, %v1494_v3  ;;  %v1658_v7 = vmax.f32 %v1499_v13, %v1594_v11  ;;  %v1587_v44 = vmul.f32 0.02, %v1543_v15  ;;  %v1659_v26 = vmax.f32 %v1548_v1, %v1595_v38  ;;  %v3152_v1 = vld [vmem:[%s5245_s5 + $0x8] sm:$0xff] }
 0x29a   : > { %1956 = vmatpush.bf16.msra.mxu1 %v1709_v32  ;;  %2002 = vmatpush.bf16.msra.mxu2 %v1722_v31  ;;  %v1718_v22 = vpack.c.bf16 %v1666_v52, %v1662_v40  ;;  %v1719_v12 = vpack.c.bf16 %v1667_v14, %v1663_v48  ;;  %v1582_v39 = vmul.f32 0.02, %v1492_v51  ;;  %v1654_v47 = vmax.f32 %v1497_v20, %v1590_v46  ;;  %v3156_v20 = vld [vmem:[%s5245_s5 + $0x28] sm:$0xff] }
 0x29b   : > { %2051 = vmatpush.bf16.msra.mxu3 %v1723_v6  ;;  %1908 = vmatmul.bf16.vlgmr.msra.gmra.mxu0 %v3151_v9  ;;  %v1583_v43 = vmul.f32 0.02, %v1541_v2  ;;  %v1655_v59 = vmax.f32 %v1546_v18, %v1591_v28  ;;  %v1650_v53 = vmax.f32 %v1494_v3, %v1586_v62  ;;  %v1651_v16 = vmax.f32 %v1543_v15, %v1587_v44 }
 0x29c   : > { %v1714_v58 = vpack.c.bf16 %v1658_v7, %v1654_v47  ;;  %v1646_v61 = vmax.f32 %v1492_v51, %v1582_v39 }
 0x29d   : > { %1957 = vmatmul.bf16.vlgmr.msra.gmra.mxu1 %v3151_v9  ;;  %v1715_v49 = vpack.c.bf16 %v1659_v26, %v1655_v59  ;;  %v1647_v4 = vmax.f32 %v1541_v2, %v1583_v43 }
 0x29e   : > { %2003 = vmatpush.bf16.msra.mxu2 %v1718_v22  ;;  %v1710_v13 = vpack.c.bf16 %v1650_v53, %v1646_v61  ;;  %v4824_v11 = vpop.permute.xlu1 %1829 }
 0x29f   : > { %2052 = vmatpush.bf16.msra.mxu3 %v1719_v12  ;;  %v1711_v23 = vpack.c.bf16 %v1651_v16, %v1647_v4  ;;  %v4816_v32 = vpop.permute.xlu2 %1839 }
 0x2a2   : > { %2004 = vmatpush.bf16.msra.mxu2 %v1714_v58 }
 0x2a3   : > { %2053 = vmatpush.bf16.msra.mxu3 %v1715_v49 }
 0x2a6   : > { %2005 = vmatpush.bf16.msra.mxu2 %v1710_v13  ;;  %v1805_v14 = vpop.permute.xlu1 %1804 }
 0x2a7   : > { %2054 = vmatpush.bf16.msra.mxu3 %v1711_v23 }
 0x2a9   : > { %2006 = vmatmul.bf16.vlgmr.msra.gmra.mxu2 %v3151_v9 }
 0x2aa   : > { %2055 = vmatmul.bf16.vlgmr.msra.gmra.mxu3 %v3151_v9  ;;  %v4830_v9 = vpop.permute.xlu2 %1814 }
 0x2ab   : > { %1913 = vmatmul.bf16.gmra.mxu0 %v3152_v1 }
 0x2ad   : > { %1962 = vmatmul.bf16.gmra.mxu1 %v3152_v1 }
 0x2b2   : > { %v1810_v51 = vpop.permute.xlu2 %1809 }
 0x2b9   : > { %2011 = vmatmul.bf16.gmra.mxu2 %v3152_v1 }
 0x2ba   : > { %2060 = vmatmul.bf16.gmra.mxu3 %v3152_v1 }
 0x2bb   : > { %1918 = vmatmul.bf16.gmra.mxu0 %v3153_v29 }
 0x2bd   : > { %1967 = vmatmul.bf16.gmra.mxu1 %v3153_v29 }
 0x2c9   : > { %2016 = vmatmul.bf16.gmra.mxu2 %v3153_v29 }
 0x2ca   : > { %2065 = vmatmul.bf16.gmra.mxu3 %v3153_v29 }
 0x2cb   : > { %1923 = vmatmul.bf16.gmra.mxu0 %v3154_v34 }
 0x2cd   : > { %1972 = vmatmul.bf16.gmra.mxu1 %v3154_v34 }
 0x2d9   : > { %2021 = vmatmul.bf16.gmra.mxu2 %v3154_v34 }
 0x2da   : > { %2070 = vmatmul.bf16.gmra.mxu3 %v3154_v34 }
 0x2db   : > { %1928 = vmatmul.bf16.gmra.mxu0 %v3155_v30 }
 0x2dd   : > { %1977 = vmatmul.bf16.gmra.mxu1 %v3155_v30 }
 0x2e9   : > { %2026 = vmatmul.bf16.gmra.mxu2 %v3155_v30 }
 0x2ea   : > { %2075 = vmatmul.bf16.gmra.mxu3 %v3155_v30 }
 0x2eb   : > { %1933 = vmatmul.bf16.gmra.mxu0 %v3156_v20 }
 0x2ed   : > { %1982 = vmatmul.bf16.gmra.mxu1 %v3156_v20 }
 0x2f9   : > { %2031 = vmatmul.bf16.gmra.mxu2 %v3156_v20 }
 0x2fa   : > { %2080 = vmatmul.bf16.gmra.mxu3 %v3156_v20 }
 0x2fb   : > { %1938 = vmatmul.bf16.gmra.mxu0 %v3157_v41 }
 0x2fd   : > { %1987 = vmatmul.bf16.gmra.mxu1 %v3157_v41 }
 0x309   : > { %2036 = vmatmul.bf16.gmra.mxu2 %v3157_v41 }
 0x30a   : > { %2085 = vmatmul.bf16.gmra.mxu3 %v3157_v41 }
 0x30b   : > { %1943 = vmatmul.bf16.gmra.mxu0 %v3158_v63 }
 0x30d   : > { %1992 = vmatmul.bf16.gmra.mxu1 %v3158_v63 }
 0x318   : > { %v4782_v10 = vpop.f32.mrf.mxu0 }
 0x319   : > { %2041 = vmatmul.bf16.gmra.mxu2 %v3158_v63 }
 0x31a   : > { %2090 = vmatmul.bf16.gmra.mxu3 %v3158_v63  ;;  %v4784_v33 = vpop.f32.mrf.mxu1 }
 0x320   : > { %v4786_v54 = vpop.f32.mrf.mxu0 }
 0x322   : > { %v4788_v17 = vpop.f32.mrf.mxu1 }
 0x328   : > { %v4790_v45 = vpop.f32.mrf.mxu0 }
 0x32a   : > { %v4792_v55 = vpop.f32.mrf.mxu1 }
 0x32c   : > { %v4794_v5 = vpop.f32.mrf.mxu2 }
 0x32d   : > { %5616 = vst [vmem:[#allocation31_spill] sm:$0xff] %v4794_v5  ;;  %v4796_v21 = vpop.f32.mrf.mxu3 }
 0x32e   : > { %5617 = vst [vmem:[#allocation37_spill] sm:$0xff] %v4796_v21 }
 0x330   : > { %v4798_v18 = vpop.f32.mrf.mxu0 }
 0x332   : > { %v4800_v0 = vpop.f32.mrf.mxu1 }
 0x334   : > { %v4804_v35 = vpop.f32.mrf.mxu2 }
 0x335   : > { %5618 = vst [vmem:[#allocation45_spill] sm:$0xff] %v4804_v35  ;;  %v4806_v25 = vpop.f32.mrf.mxu3 }
 0x336   : > { %5619 = vst [vmem:[#allocation29_spill] sm:$0xff] %v4806_v25 }
 0x338   : > { %v4810_v36 = vpop.f32.mrf.mxu0 }
 0x33a   : > { %v4812_v37 = vpop.f32.mrf.mxu1 }
 0x33c   : > { %v4814_v19 = vpop.f32.mrf.mxu2 }
 0x33d   : > { %5620 = vst [vmem:[#allocation34_spill] sm:$0xff] %v4814_v19  ;;  %v4818_v60 = vpop.f32.mrf.mxu3 }
 0x33e   : > { %5621 = vst [vmem:[#allocation50_spill] sm:$0xff] %v4818_v60 }
 0x340   : > { %v4820_v57 = vpop.f32.mrf.mxu0 }
 0x342   : > { %v4822_v3 = vpop.f32.mrf.mxu1 }
 0x344   : > { %v4826_v52 = vpop.f32.mrf.mxu2 }
 0x345   : > { %5622 = vst [vmem:[#allocation33_spill] sm:$0xff] %v4826_v52  ;;  %v4828_v31 = vpop.f32.mrf.mxu3 }
 0x346   : > { %5623 = vst [vmem:[#allocation64_spill] sm:$0xff] %v4828_v31 }
 0x348   : > { %v1924_v50 = vpop.f32.mrf.mxu0 }
 0x349   : > { %v1925_v42 = vadd.f32 %v1924_v50, %v1805_v14 }
 0x34a   : > { %v1973_v15 = vpop.f32.mrf.mxu1 }
 0x34b   : > { %v1974_v27 = vadd.f32 %v1973_v15, %v1805_v14  ;;  %v2120_v40 = vmul.f32 0.02, %v1925_v42 }
 0x34c   : > { %v4832_v38 = vpop.f32.mrf.mxu2 }
 0x34d   : > { %5624 = vst [vmem:[#allocation32_spill] sm:$0xff] %v4832_v38  ;;  %v4834_v6 = vpop.f32.mrf.mxu3  ;;  %v2121_v28 = vmul.f32 0.02, %v1974_v27  ;;  %v2184_v26 = vmax.f32 %v1925_v42, %v2120_v40 }
 0x34e   : > { %5625 = vst [vmem:[#allocation28_spill] sm:$0xff] %v4834_v6 }
 0x34f   : > { %v2185_v39 = vmax.f32 %v1974_v27, %v2121_v28 }
 0x350   : > { %v1926_v46 = vpop.f32.mrf.mxu0 }
 0x351   : > { %v1927_v24 = vadd.f32 %v1926_v46, %v1810_v51 }
 0x352   : > { %v1975_v2 = vpop.f32.mrf.mxu1 }
 0x353   : > { %v1976_v48 = vadd.f32 %v1975_v2, %v1810_v51  ;;  %v2124_v62 = vmul.f32 0.02, %v1927_v24 }
 0x354   : > { %v4836_v7 = vpop.f32.mrf.mxu2 }
 0x355   : > { %5626 = vst [vmem:[#allocation59_spill] sm:$0xff] %v4836_v7  ;;  %v2125_v22 = vmul.f32 0.02, %v1976_v48  ;;  %v4838_v44 = vpop.f32.mrf.mxu3  ;;  %v2188_v12 = vmax.f32 %v1927_v24, %v2124_v62 }
 0x356   : > { %5627 = vst [vmem:[#allocation51_spill] sm:$0xff] %v4838_v44 }
 0x357   : > { %v2189_v47 = vmax.f32 %v1976_v48, %v2125_v22  ;;  %v4840_v43 = vpack.c.bf16 %v2188_v12, %v2184_v26 }
 0x358   : > { %v4842_v59 = vpop.f32.mrf.mxu0 }
 0x359   : > { %5628 = vst [vmem:[#allocation60_spill] sm:$0xff] %v4840_v43  ;;  %v4844_v53 = vpack.c.bf16 %v2189_v47, %v2185_v39 }
 0x35a   : > { %v4846_v58 = vpop.f32.mrf.mxu1 }
 0x35b   : > { %5629 = vst [vmem:[#allocation48_spill] sm:$0xff] %v4844_v53 }
 0x35c   : > { %v2022_v16 = vpop.f32.mrf.mxu2 }
 0x35d   : > { %v2071_v49 = vpop.f32.mrf.mxu3  ;;  %v2023_v61 = vadd.f32 %v2022_v16, %v1805_v14 }
 0x35e   : > { %v2072_v13 = vadd.f32 %v2071_v49, %v1805_v14  ;;  %v4858_v14 = vpop.permute.xlu0 %1849 }
 0x35f   : > { %v2122_v29 = vmul.f32 0.02, %v2023_v61 }
 0x360   : > { %v4848_v4 = vpop.f32.mrf.mxu0  ;;  %v2123_v20 = vmul.f32 0.02, %v2072_v13 }
 0x361   : > { %v2186_v15 = vmax.f32 %v2023_v61, %v2122_v29 }
 0x362   : > { %v4850_v23 = vpop.f32.mrf.mxu1  ;;  %v2187_v46 = vmax.f32 %v2072_v13, %v2123_v20  ;;  %v4876_v13 = vpop.permute.xlu2 %1784 }
 0x363   : > { %5636 = vst [vmem:[#allocation9_spill] sm:$0xff] %v4876_v13  ;;  %v4934_v6 = vadd.f32 %v4790_v45, %v4876_v13  ;;  %v4942_v31 = vadd.f32 %v4792_v55, %v4876_v13 }
 0x364   : > { %v2024_v1 = vpop.f32.mrf.mxu2 }
 0x365   : > { %v2025_v34 = vadd.f32 %v2024_v1, %v1810_v51  ;;  %v2073_v30 = vpop.f32.mrf.mxu3 }
 0x366   : > { %v2074_v41 = vadd.f32 %v2073_v30, %v1810_v51  ;;  %v4870_v39 = vpop.permute.xlu0 %1824 }
 0x367   : > { %v2126_v63 = vmul.f32 0.02, %v2025_v34 }
 0x368   : > { %v2127_v50 = vmul.f32 0.02, %v2074_v41  ;;  %v4852_v27 = vpop.f32.mrf.mxu0 }
 0x369   : > { %v2190_v42 = vmax.f32 %v2025_v34, %v2126_v63  ;;  %v4880_v34 = vpop.permute.xlu1 %1799  ;;  %v1935_v55 = vadd.f32 %v4852_v27, %v4870_v39 }
 0x36a   : > { %v2191_v40 = vmax.f32 %v2074_v41, %v2127_v50  ;;  %v4854_v24 = vpop.f32.mrf.mxu1  ;;  %v4886_v63 = vpop.permute.xlu2 %1779 }
 0x36b   : > { %v4856_v2 = vpack.c.bf16 %v2190_v42, %v2186_v15  ;;  %5637 = vst [vmem:[#allocation38_spill] sm:$0xff] %v4886_v63  ;;  %v4892_v42 = vadd.f32 %v4786_v54, %v4886_v63  ;;  %v4908_v5 = vadd.f32 %v4788_v17, %v4886_v63 }
 0x36c   : > { %v4860_v28 = vpop.f32.mrf.mxu2  ;;  %v4862_v48 = vpack.c.bf16 %v2191_v40, %v2187_v46 }
 0x36d   : > { %5630 = vst [vmem:[#allocation47_spill] sm:$0xff] %v4856_v2  ;;  %v4864_v62 = vpop.f32.mrf.mxu3  ;;  %v4913_v54 = vmul.f32 0.02, %v4892_v42  ;;  %v4925_v17 = vmul.f32 0.02, %v4908_v5 }
 0x36e   : > { %5631 = vst [vmem:[#allocation30_spill] sm:$0xff] %v4860_v28  ;;  %v4878_v1 = vpop.permute.xlu0 %1819 }
 0x36f   : > { %5632 = vst [vmem:[#allocation49_spill] sm:$0xff] %v4862_v48  ;;  %v1981_v53 = vadd.f32 %v4850_v23, %v4878_v1 }
 0x370   : > { %5633 = vst [vmem:[#allocation25_spill] sm:$0xff] %v4864_v62  ;;  %v1936_v51 = vpop.f32.mrf.mxu0 }
 0x371   : > { %5638 = vst [vmem:[#allocation10_spill] sm:$0xff] %v4892_v42  ;;  %v4894_v40 = vpop.permute.xlu1 %1774 }
 0x372   : > { %v1985_v22 = vpop.f32.mrf.mxu1  ;;  %5639 = vst [vmem:[#allocation8_spill] sm:$0xff] %v4894_v40  ;;  %v4900_v21 = vadd.f32 %v4782_v10, %v4894_v40  ;;  %v4904_v2 = vadd.f32 %v4784_v33, %v4894_v40 }
 0x373   : > { %5642 = vst [vmem:[#allocation16_spill] sm:$0xff] %v4908_v5 }
 0x374   : > { %v4866_v26 = vpop.f32.mrf.mxu2  ;;  %5640 = vst [vmem:[#allocation63_spill] sm:$0xff] %v4900_v21  ;;  %v4919_v19 = vmul.f32 0.02, %v4900_v21  ;;  %v4922_v33 = vmul.f32 0.02, %v4904_v2 }
 0x375   : > { %5634 = vst [vmem:[#allocation27_spill] sm:$0xff] %v4866_v26  ;;  %v4868_v12 = vpop.f32.mrf.mxu3 }
 0x376   : > { %5635 = vst [vmem:[#allocation58_spill] sm:$0xff] %v4868_v12  ;;  %v4888_v15 = vpop.permute.xlu0 %1794 }
 0x377   : > { %5641 = vst [vmem:[#allocation17_spill] sm:$0xff] %v4904_v2 }
 0x378   : > { %v1939_v47 = vpop.f32.mrf.mxu0  ;;  %5643 = vst [vmem:[#allocation36_spill] sm:$0xff] %v4913_v54 }
 0x379   : > { %5644 = vst [vmem:[#allocation15_spill] sm:$0xff] %v4919_v19  ;;  %v1984_v19 = vadd.f32 %v4854_v24, %v4870_v39 }
 0x37a   : > { %v1988_v16 = vpop.f32.mrf.mxu1  ;;  %5645 = vst [vmem:[#allocation57_spill] sm:$0xff] %v4922_v33 }
 0x37b   : > { %5646 = vst [vmem:[#allocation39_spill] sm:$0xff] %v4925_v17  ;;  %v1989_v38 = vadd.f32 %v1988_v16, %v4808_v56  ;;  %v1986_v16 = vadd.f32 %v1985_v22, %v4824_v11  ;;  %v2137_v23 = vmul.f32 0.02, %v1984_v19 }
 0x37c   : > { %v4872_v49 = vpop.f32.mrf.mxu2 }
 0x37d   : > { %v4874_v61 = vpop.f32.mrf.mxu3  ;;  %v2145_v5 = vmul.f32 0.02, %v1989_v38  ;;  %v2141_v26 = vmul.f32 0.02, %v1986_v16 }
 0x37f   : > { %v2209_v24 = vmax.f32 %v1989_v38, %v2145_v5  ;;  %v4984_v5 = vadd.f32 %v4812_v37, %v4888_v15  ;;  %v4995_v37 = vmul.f32 0.02, %v4942_v31 }
 0x380   : > { %v1941_v29 = vpop.f32.mrf.mxu0 }
 0x381   : > { %v1942_v10 = vadd.f32 %v1941_v29, %v4816_v32 }
 0x382   : > { %v1990_v30 = vpop.f32.mrf.mxu1 }
 0x383   : > { %v1991_v40 = vadd.f32 %v1990_v30, %v4816_v32  ;;  %v4938_v30 = vpop.permute.xlu0 %1789  ;;  %v2148_v54 = vmul.f32 0.02, %v1942_v10 }
 0x384   : > { %v4882_v20 = vpop.f32.mrf.mxu2  ;;  %v4949_v45 = vadd.f32 %v4798_v18, %v4938_v30  ;;  %v1932_v18 = vadd.f32 %v4848_v4, %v4878_v1  ;;  %v4970_v4 = vadd.f32 %v4810_v36, %v4888_v15 }
 0x385   : > { %v4884_v41 = vpop.f32.mrf.mxu3  ;;  %v2149_v2 = vmul.f32 0.02, %v1991_v40  ;;  %v2212_v28 = vmax.f32 %v1942_v10, %v2148_v54  ;;  %v2205_v54 = vmax.f32 %v1986_v16, %v2141_v26  ;;  %v2201_v26 = vmax.f32 %v1984_v19, %v2137_v23 }
 0x387   : > { %v2213_v27 = vmax.f32 %v1991_v40, %v2149_v2  ;;  %v2132_v2 = vmul.f32 0.02, %v1932_v18 }
 0x388   : > { %v1944_v50 = vpop.f32.mrf.mxu0 }
 0x389   : > { %v1945_v35 = vadd.f32 %v1944_v50, %v4802_v8  ;;  %v1940_v50 = vadd.f32 %v1939_v47, %v4808_v56  ;;  %v1937_v47 = vadd.f32 %v1936_v51, %v4824_v11  ;;  %v2249_v10 = vpack.c.bf16 %v2213_v27, %v2209_v24 }
 0x38a   : > { %v1993_v46 = vpop.f32.mrf.mxu1 }
 0x38b   : > { %v1994_v60 = vadd.f32 %v1993_v46, %v4802_v8  ;;  %v2152_v46 = vmul.f32 0.02, %v1945_v35  ;;  %v2144_v13 = vmul.f32 0.02, %v1940_v50  ;;  %v2140_v22 = vmul.f32 0.02, %v1937_v47 }
 0x38c   : > { %v4896_v48 = vpop.f32.mrf.mxu2 }
 0x38d   : > { %v4910_v25 = vpop.f32.mrf.mxu3  ;;  %v2153_v44 = vmul.f32 0.02, %v1994_v60  ;;  %v2216_v21 = vmax.f32 %v1945_v35, %v2152_v46  ;;  %v4964_v35 = vadd.f32 %v4800_v0, %v4938_v30  ;;  %v1922_v0 = vadd.f32 %v4820_v57, %v4880_v34 }
 0x38f   : > { %v2217_v17 = vmax.f32 %v1994_v60, %v2153_v44  ;;  %v1930_v60 = vadd.f32 %v4842_v59, %v4830_v9  ;;  %v2208_v44 = vmax.f32 %v1940_v50, %v2144_v13  ;;  %v4977_v13 = vmul.f32 0.02, %v4934_v6 }
 0x390   : > { %v1946_v63 = vpop.f32.mrf.mxu0  ;;  %v2112_v50 = vmul.f32 0.02, %v4970_v4  ;;  %v2116_v46 = vmul.f32 0.02, %v1922_v0 }
 0x391   : > { %v1947_v29 = vadd.f32 %v1946_v63, %v4858_v14  ;;  %v2248_v59 = vpack.c.bf16 %v2212_v28, %v2208_v44  ;;  %v2128_v38 = vmul.f32 0.02, %v1930_v60 }
 0x392   : > { %v1995_v52 = vpop.f32.mrf.mxu1  ;;  %v2180_v44 = vmax.f32 %v1922_v0, %v2116_v46 }
 0x393   : > { %v1996_v7 = vadd.f32 %v1995_v52, %v4858_v14  ;;  %v2156_v63 = vmul.f32 0.02, %v1947_v29 }
 0x394   : > { %v4945_v42 = vpop.f32.mrf.mxu2 }
 0x395   : > { %v2157_v52 = vmul.f32 0.02, %v1996_v7  ;;  %v4952_v33 = vpop.f32.mrf.mxu3  ;;  %v2220_v51 = vmax.f32 %v1947_v29, %v2156_v63  ;;  %v2196_v29 = vmax.f32 %v1932_v18, %v2132_v2 }
 0x396   : > { %v2089_v23 = vadd.f32 %v4952_v33, %v4816_v32  ;;  %v2035_v33 = vadd.f32 %v4882_v20, %v4824_v11 }
 0x397   : > { %v2221_v62 = vmax.f32 %v1996_v7, %v2157_v52  ;;  %v2252_v12 = vpack.c.bf16 %v2220_v51, %v2216_v21  ;;  %v2136_v7 = vmul.f32 0.02, %v1935_v55  ;;  %v1979_v21 = vadd.f32 %v4846_v58, %v4830_v9 }
 0x398   : > { %v4991_v58 = vadd.f32 %v4822_v3, %v4880_v34  ;;  %v2245_v52 = vpack.c.bf16 %v2205_v54, %v2201_v26  ;;  %v2113_v3 = vmul.f32 0.02, %v4984_v5  ;;  %v2192_v51 = vmax.f32 %v1930_v60, %v2128_v38  ;;  %v5647_v26 = vld [vmem:[#allocation60_spill] sm:$0xff] }
 0x399   : > { %v2253_v43 = vpack.c.bf16 %v2221_v62, %v2217_v17  ;;  %2336 = vmatpush.bf16.msrb.mxu0 %v2252_v12  ;;  %v2204_v62 = vmax.f32 %v1937_v47, %v2140_v22  ;;  %v2133_v12 = vmul.f32 0.02, %v1981_v53  ;;  %v4980_v17 = vmul.f32 0.02, %v4949_v45 }
 0x39a   : > { %v2200_v57 = vmax.f32 %v1935_v55, %v2136_v7  ;;  %v2129_v28 = vmul.f32 0.02, %v1979_v21  ;;  %v2117_v22 = vmul.f32 0.02, %v4991_v58  ;;  %v2176_v7 = vmax.f32 %v4970_v4, %v2112_v50  ;;  %v5648_v50 = vld [vmem:[#allocation27_spill] sm:$0xff] }
 0x39b   : > { %2365 = vmatpush.bf16.msrb.mxu1 %v2253_v43  ;;  %v4987_v43 = vmul.f32 0.02, %v4964_v35  ;;  %v2197_v63 = vmax.f32 %v1981_v53, %v2133_v12  ;;  %v2172_v55 = vmax.f32 %v4949_v45, %v4980_v17  ;;  %v2040_v53 = vadd.f32 %v4945_v42, %v4816_v32  ;;  %v5658_v45 = vld [vmem:[#allocation17_spill] sm:$0xff] }
 0x39c   : > { %v2042_v40 = vpop.f32.mrf.mxu2  ;;  %v2244_v47 = vpack.c.bf16 %v2204_v62, %v2200_v57  ;;  %v2193_v27 = vmax.f32 %v1979_v21, %v2129_v28  ;;  %v2240_v24 = vpack.c.bf16 %v2196_v29, %v2192_v51  ;;  %v2087_v42 = vadd.f32 %v4910_v25, %v4808_v56 }
 0x39d   : > { %v2091_v36 = vpop.f32.mrf.mxu3  ;;  %2337 = vmatpush.bf16.msrb.mxu0 %v2248_v59  ;;  %v2043_v16 = vadd.f32 %v2042_v40, %v4802_v8  ;;  %v2173_v18 = vmax.f32 %v4964_v35, %v4987_v43  ;;  %v2177_v59 = vmax.f32 %v4984_v5, %v2113_v3  ;;  %v2181_v32 = vmax.f32 %v4991_v58, %v2117_v22 }
 0x39e   : > { %v2092_v19 = vadd.f32 %v2091_v36, %v4802_v8  ;;  %v2038_v8 = vadd.f32 %v4896_v48, %v4808_v56  ;;  %v2241_v21 = vpack.c.bf16 %v2197_v63, %v2193_v27  ;;  %v2150_v48 = vmul.f32 0.02, %v2040_v53 }
 0x39f   : > { %2366 = vmatpush.bf16.msrb.mxu1 %v2249_v10  ;;  %v2154_v2 = vmul.f32 0.02, %v2043_v16  ;;  %v2084_v54 = vadd.f32 %v4884_v41, %v4824_v11  ;;  %v2151_v36 = vmul.f32 0.02, %v2089_v23  ;;  %v2232_v5 = vpack.c.bf16 %v2180_v44, %v2176_v7 }
 0x3a0   : > { %v2155_v4 = vmul.f32 0.02, %v2092_v19  ;;  %v2033_v25 = vadd.f32 %v4872_v49, %v4870_v39  ;;  %v2146_v56 = vmul.f32 0.02, %v2038_v8  ;;  %v2082_v57 = vadd.f32 %v4874_v61, %v4870_v39  ;;  %v5650_v49 = vld [vmem:[#allocation58_spill] sm:$0xff] }
 0x3a1   : > { %2338 = vmatpush.bf16.msrb.mxu0 %v2244_v47  ;;  %v2147_v58 = vmul.f32 0.02, %v2087_v42  ;;  %v2030_v11 = vadd.f32 %v5648_v50, %v4878_v1  ;;  %v2142_v41 = vmul.f32 0.02, %v2035_v33  ;;  %v2214_v46 = vmax.f32 %v2040_v53, %v2150_v48  ;;  %v5649_v47 = vld [vmem:[#allocation48_spill] sm:$0xff]  ;;  %v5651_v39 = vld [vmem:[#allocation30_spill] sm:$0xff] }
 0x3a2   : > { %v2219_v20 = vmax.f32 %v2092_v19, %v2155_v4  ;;  %v2079_v63 = vadd.f32 %v5650_v49, %v4878_v1  ;;  %v2028_v61 = vadd.f32 %v5651_v39, %v4830_v9  ;;  %v2138_v51 = vmul.f32 0.02, %v2033_v25  ;;  %v5652_v53 = vld [vmem:[#allocation25_spill] sm:$0xff]  ;;  %v5656_v4 = vld [vmem:[#allocation63_spill] sm:$0xff] }
 0x3a3   : > { %2367 = vmatpush.bf16.msrb.mxu1 %v2245_v52  ;;  %v2215_v52 = vmax.f32 %v2089_v23, %v2151_v36  ;;  %v2210_v19 = vmax.f32 %v2038_v8, %v2146_v56  ;;  %v2233_v22 = vpack.c.bf16 %v2181_v32, %v2177_v59  ;;  %v2168_v27 = vmax.f32 %v4934_v6, %v4977_v13  ;;  %v5653_v13 = vld [vmem:[#allocation39_spill] sm:$0xff]  ;;  %v5657_v48 = vld [vmem:[#allocation57_spill] sm:$0xff] }
 0x3a4   : > { %v2044_v60 = vpop.f32.mrf.mxu2  ;;  %v2077_v7 = vadd.f32 %v5652_v53, %v4830_v9  ;;  %v2139_v44 = vmul.f32 0.02, %v2082_v57  ;;  %v2169_v1 = vmax.f32 %v4942_v31, %v4995_v37  ;;  %v2134_v23 = vmul.f32 0.02, %v2030_v11  ;;  %v5654_v9 = vld [vmem:[#allocation16_spill] sm:$0xff]  ;;  %v5655_v37 = vld [vmem:[#allocation15_spill] sm:$0xff] }
 0x3a5   : > { %v2045_v62 = vadd.f32 %v2044_v60, %v4858_v14  ;;  %v2093_v40 = vpop.f32.mrf.mxu3  ;;  %2339 = vmatpush.bf16.msrb.mxu0 %v2240_v24  ;;  %v2211_v60 = vmax.f32 %v2087_v42, %v2147_v58  ;;  %v2206_v24 = vmax.f32 %v2035_v33, %v2142_v41  ;;  %v2135_v8 = vmul.f32 0.02, %v2079_v63 }
 0x3a6   : > { %v2094_v0 = vadd.f32 %v2093_v40, %v4858_v14  ;;  %v2218_v14 = vmax.f32 %v2043_v16, %v2154_v2  ;;  %v2143_v16 = vmul.f32 0.02, %v2084_v54  ;;  %v2250_v2 = vpack.c.bf16 %v2214_v46, %v2210_v19 }
 0x3a7   : > { %v2158_v12 = vmul.f32 0.02, %v2045_v62  ;;  %2368 = vmatpush.bf16.msrb.mxu1 %v2241_v21  ;;  %v2251_v40 = vpack.c.bf16 %v2215_v52, %v2211_v60  ;;  %v2228_v6 = vpack.c.bf16 %v2172_v55, %v2168_v27  ;;  %v2165_v21 = vmax.f32 %v5654_v9, %v5653_v13  ;;  %v5659_v55 = vld [vmem:[#allocation59_spill] sm:$0xff]  ;;  %v5668_v52 = vld [vmem:[#allocation9_spill] sm:$0xff] }
 0x3a8   : > { %v2159_v10 = vmul.f32 0.02, %v2094_v0  ;;  %v2130_v59 = vmul.f32 0.02, %v2028_v61  ;;  %v2202_v42 = vmax.f32 %v2033_v25, %v2138_v51  ;;  %v2229_v31 = vpack.c.bf16 %v2173_v18, %v2169_v1  ;;  %v5662_v25 = vld [vmem:[#allocation36_spill] sm:$0xff]  ;;  %v5672_v27 = vld [vmem:[#allocation45_spill] sm:$0xff] }
 0x3a9   : > { %v2222_v38 = vmax.f32 %v2045_v62, %v2158_v12  ;;  %2340 = vmatpush.bf16.msrb.mxu0 %v5647_v26  ;;  %v2207_v62 = vmax.f32 %v2084_v54, %v2143_v16  ;;  %v2131_v32 = vmul.f32 0.02, %v2077_v7  ;;  %v2203_v33 = vmax.f32 %v2082_v57, %v2139_v44  ;;  %v5665_v26 = vld [vmem:[#allocation28_spill] sm:$0xff]  ;;  %v5677_v13 = vld [vmem:[#allocation37_spill] sm:$0xff] }
 0x3aa   : > { %v2223_v28 = vmax.f32 %v2094_v0, %v2159_v10  ;;  %v2160_v0 = vmax.f32 %v5656_v4, %v5655_v37  ;;  %v2161_v17 = vmax.f32 %v5658_v45, %v5657_v48  ;;  %v2020_v12 = vadd.f32 %v5659_v55, %v4880_v34  ;;  %v5660_v10 = vld [vmem:[#allocation51_spill] sm:$0xff] }
 0x3ab   : > { %v2254_v29 = vpack.c.bf16 %v2222_v38, %v2218_v14  ;;  %2369 = vmatpush.bf16.msrb.mxu1 %v5649_v47  ;;  %v2198_v54 = vmax.f32 %v2030_v11, %v2134_v23  ;;  %v2246_v36 = vpack.c.bf16 %v2206_v24, %v2202_v42  ;;  %v2069_v35 = vadd.f32 %v5660_v10, %v4880_v34  ;;  %v5664_v38 = vld [vmem:[#allocation32_spill] sm:$0xff]  ;;  %v5666_v11 = vld [vmem:[#allocation33_spill] sm:$0xff] }
 0x3ac   : > { %v2255_v3 = vpack.c.bf16 %v2223_v28, %v2219_v20  ;;  %v2199_v43 = vmax.f32 %v2079_v63, %v2135_v8  ;;  %v2247_v18 = vpack.c.bf16 %v2207_v62, %v2203_v33  ;;  %v2018_v57 = vadd.f32 %v5664_v38, %v4888_v15  ;;  %v3159_v28 = vld [vmem:[%s5247_s7] sm:$0xff]  ;;  %v5667_v47 = vld [vmem:[#allocation64_spill] sm:$0xff]  ;;  %v5678_v42 = vld [vmem:[#allocation49_spill] sm:$0xff] }
 0x3ad   : > { %2394 = vmatpush.bf16.msrb.mxu2 %v2254_v29  ;;  %2341 = vmatpush.bf16.msrb.mxu0 %v2232_v5  ;;  %v5661_v5 = vld [vmem:[#allocation10_spill] sm:$0xff]  ;;  %v2194_v58 = vmax.f32 %v2028_v61, %v2130_v59  ;;  %v2225_v20 = vpack.c.bf16 %v2165_v21, %v2161_v17  ;;  %v2067_v50 = vadd.f32 %v5665_v26, %v4888_v15  ;;  %v2118_v46 = vmul.f32 0.02, %v2020_v12  ;;  %v5674_v24 = vld [vmem:[#allocation8_spill] sm:$0xff] }
 0x3ae   : > { %2423 = vmatpush.bf16.msrb.mxu3 %v2255_v3  ;;  %v5663_v56 = vmax.f32 %v5661_v5, %v5662_v25  ;;  %v2195_v34 = vmax.f32 %v2077_v7, %v2131_v32  ;;  %v2015_v41 = vadd.f32 %v5666_v11, %v4938_v30  ;;  %v2064_v49 = vadd.f32 %v5667_v47, %v4938_v30  ;;  %v5669_v3 = vld [vmem:[#allocation34_spill] sm:$0xff]  ;;  %v5673_v30 = vld [vmem:[#allocation29_spill] sm:$0xff] }
 0x3af   : > { %2370 = vmatpush.bf16.msrb.mxu1 %v2233_v22  ;;  %v2242_v29 = vpack.c.bf16 %v2198_v54, %v2194_v58  ;;  %v2119_v63 = vmul.f32 0.02, %v2069_v35  ;;  %v2013_v39 = vadd.f32 %v5669_v3, %v5668_v52  ;;  %v2114_v61 = vmul.f32 0.02, %v2018_v57  ;;  %v5670_v15 = vld [vmem:[#allocation50_spill] sm:$0xff]  ;;  %v5107_v3 = vpop.permute.xlu1 %2309 }
 0x3b0   : > { %v2224_v14 = vpack.c.bf16 %v5663_v56, %v2160_v0  ;;  %v2243_v16 = vpack.c.bf16 %v2199_v43, %v2195_v34  ;;  %v2062_v51 = vadd.f32 %v5670_v15, %v5668_v52  ;;  %v2115_v19 = vmul.f32 0.02, %v2067_v50  ;;  %v5671_v22 = vld [vmem:[#allocation38_spill] sm:$0xff]  ;;  %v3160_v43 = vld [vmem:[%s5247_s7 + $0x8] sm:$0xff]  ;;  %v3161_v56 = vld [vmem:[%s5247_s7 + $0x10] sm:$0xff]  ;;  %v5113_v15 = vpop.permute.xlu2 %2294 }
 0x3b1   : > { %2395 = vmatpush.bf16.msrb.mxu2 %v2250_v2  ;;  %2342 = vmatpush.bf16.msrb.mxu0 %v2228_v6  ;;  %v2010_v53 = vadd.f32 %v5672_v27, %v5671_v22  ;;  %v2110_v7 = vmul.f32 0.02, %v2015_v41  ;;  %v2182_v44 = vmax.f32 %v2020_v12, %v2118_v46  ;;  %v2059_v60 = vadd.f32 %v5673_v30, %v5671_v22  ;;  %v5675_v2 = vld [vmem:[#allocation31_spill] sm:$0xff] }
 0x3b2   : > { %2424 = vmatpush.bf16.msrb.mxu3 %v2251_v40  ;;  %v2111_v1 = vmul.f32 0.02, %v2064_v49  ;;  %v2183_v23 = vmax.f32 %v2069_v35, %v2119_v63  ;;  %v2008_v8 = vadd.f32 %v5675_v2, %v5674_v24  ;;  %v2106_v62 = vmul.f32 0.02, %v2013_v39  ;;  %v5676_v6 = vld [vmem:[#allocation47_spill] sm:$0xff] }
 0x3b3   : > { %2371 = vmatpush.bf16.msrb.mxu1 %v2229_v31  ;;  %v2178_v40 = vmax.f32 %v2018_v57, %v2114_v61  ;;  %v2057_v9 = vadd.f32 %v5677_v13, %v5674_v24  ;;  %v2107_v21 = vmul.f32 0.02, %v2062_v51  ;;  %v2179_v59 = vmax.f32 %v2067_v50, %v2115_v19  ;;  %v5111_v61 = vpop.permute.xlu0 %2304 }
 0x3b4   : > { %v2102_v31 = vmul.f32 0.02, %v2010_v53  ;;  %v2174_v37 = vmax.f32 %v2015_v41, %v2110_v7  ;;  %v2103_v0 = vmul.f32 0.02, %v2059_v60  ;;  %v2175_v32 = vmax.f32 %v2064_v49, %v2111_v1 }
 0x3b5   : > { %2396 = vmatpush.bf16.msrb.mxu2 %v2246_v36  ;;  %2343 = vmatpush.bf16.msrb.mxu0 %v2224_v14  ;;  %v2234_v4 = vpack.c.bf16 %v2182_v44, %v2178_v40  ;;  %v2235_v33 = vpack.c.bf16 %v2183_v23, %v2179_v59  ;;  %v2098_v48 = vmul.f32 0.02, %v2008_v8  ;;  %v2170_v45 = vmax.f32 %v2013_v39, %v2106_v62  ;;  %v3162_v14 = vld [vmem:[%s5247_s7 + $0x18] sm:$0xff] }
 0x3b6   : > { %2425 = vmatpush.bf16.msrb.mxu3 %v2247_v18  ;;  %v2099_v17 = vmul.f32 0.02, %v2057_v9  ;;  %v2171_v55 = vmax.f32 %v2062_v51, %v2107_v21  ;;  %v2166_v12 = vmax.f32 %v2010_v53, %v2102_v31  ;;  %v2167_v36 = vmax.f32 %v2059_v60, %v2103_v0 }
 0x3b7   : > { %2372 = vmatpush.bf16.msrb.mxu1 %v2225_v20  ;;  %v2230_v54 = vpack.c.bf16 %v2174_v37, %v2170_v45  ;;  %v2162_v35 = vmax.f32 %v2008_v8, %v2098_v48  ;;  %v5119_v53 = vpop.permute.xlu1 %2284 }
 0x3b8   : > { %2344 = vmatmul.bf16.vlgmr.msrb.gmra.mxu0 %v3159_v28  ;;  %v2231_v10 = vpack.c.bf16 %v2175_v32, %v2171_v55  ;;  %v2163_v18 = vmax.f32 %v2057_v9, %v2099_v17 }
 0x3b9   : > { %2397 = vmatpush.bf16.msrb.mxu2 %v2242_v29  ;;  %v2226_v5 = vpack.c.bf16 %v2166_v12, %v2162_v35 }
 0x3ba   : > { %2426 = vmatpush.bf16.msrb.mxu3 %v2243_v16  ;;  %2373 = vmatmul.bf16.vlgmr.msrb.gmra.mxu1 %v3159_v28  ;;  %v2227_v25 = vpack.c.bf16 %v2167_v36, %v2163_v18 }
 0x3bb   : > { %v5122_v44 = vpop.permute.xlu0 %2299 }
 0x3bd   : > { %2398 = vmatpush.bf16.msrb.mxu2 %v5676_v6  ;;  %v5131_v6 = vpop.permute.xlu2 %2289 }
 0x3be   : > { %2427 = vmatpush.bf16.msrb.mxu3 %v5678_v42 }
 0x3bf   : > { %v5140_v55 = vpop.permute.xlu1 %2279 }
 0x3c1   : > { %2399 = vmatpush.bf16.msrb.mxu2 %v2234_v4 }
 0x3c2   : > { %2428 = vmatpush.bf16.msrb.mxu3 %v2235_v33 }
 0x3c5   : > { %2400 = vmatpush.bf16.msrb.mxu2 %v2230_v54 }
 0x3c6   : > { %2429 = vmatpush.bf16.msrb.mxu3 %v2231_v10 }
 0x3c8   : > { %2349 = vmatmul.bf16.gmra.mxu0 %v3160_v43 }
 0x3c9   : > { %2401 = vmatpush.bf16.msrb.mxu2 %v2226_v5 }
 0x3ca   : > { %2430 = vmatpush.bf16.msrb.mxu3 %v2227_v25  ;;  %2378 = vmatmul.bf16.gmra.mxu1 %v3160_v43  ;;  %v5144_v25 = vpop.permute.xlu0 %2274 }
 0x3cc   : > { %2402 = vmatmul.bf16.vlgmr.msrb.gmra.mxu2 %v3159_v28 }
 0x3cd   : > { %2431 = vmatmul.bf16.vlgmr.msrb.gmra.mxu3 %v3159_v28 }
 0x3d8   : > { %2354 = vmatmul.bf16.gmra.mxu0 %v3161_v56 }
 0x3da   : > { %2383 = vmatmul.bf16.gmra.mxu1 %v3161_v56 }
 0x3dc   : > { %2407 = vmatmul.bf16.gmra.mxu2 %v3160_v43 }
 0x3dd   : > { %2436 = vmatmul.bf16.gmra.mxu3 %v3160_v43 }
 0x3e8   : > { %2359 = vmatmul.bf16.gmra.mxu0 %v3162_v14 }
 0x3ea   : > { %2388 = vmatmul.bf16.gmra.mxu1 %v3162_v14 }
 0x3ec   : > { %2412 = vmatmul.bf16.gmra.mxu2 %v3161_v56 }
 0x3ed   : > { %2441 = vmatmul.bf16.gmra.mxu3 %v3161_v56 }
 0x3fc   : > { %2417 = vmatmul.bf16.gmra.mxu2 %v3162_v14 }
 0x3fd   : > { %2446 = vmatmul.bf16.gmra.mxu3 %v3162_v14 }
 0x435   : > { %v5093_v38 = vpop.f32.mrf.mxu0 }
 0x437   : > { %v5095_v57 = vpop.f32.mrf.mxu1 }
 0x43d   : > { %v2347_v58 = vpop.f32.mrf.mxu0 }
 0x43e   : > { %v2348_v35 = vadd.f32 %v2347_v58, %v5140_v55  ;;  %v2375_v58 = vadd.f32 %v5095_v57, %v5144_v25 }
 0x43f   : > { %v2376_v20 = vpop.f32.mrf.mxu1 }
 0x440   : > { %v2377_v56 = vadd.f32 %v2376_v20, %v5140_v55 }
 0x445   : > { %v2350_v28 = vpop.f32.mrf.mxu0 }
 0x446   : > { %v2351_v33 = vadd.f32 %v2350_v28, %v5119_v53 }
 0x447   : > { %v2379_v26 = vpop.f32.mrf.mxu1 }
 0x448   : > { %v2380_v12 = vadd.f32 %v2379_v26, %v5119_v53 }
 0x44d   : > { %v2352_v50 = vpop.f32.mrf.mxu0 }
 0x44e   : > { %v2353_v42 = vadd.f32 %v2352_v50, %v5131_v6 }
 0x44f   : > { %v2381_v34 = vpop.f32.mrf.mxu1  ;;  %v5097_v11 = vpop.f32.mrf.mxu2 }
 0x450   : > { %v5099_v41 = vpop.f32.mrf.mxu3  ;;  %v2382_v4 = vadd.f32 %v2381_v34, %v5131_v6  ;;  %v2464_v43 = vmul.f32 0.02, %v2353_v42  ;;  %v2346_v34 = vadd.f32 %v5093_v38, %v5144_v25  ;;  %v2453_v38 = vmul.f32 0.02, %v2375_v58 }
 0x452   : > { %v2465_v14 = vmul.f32 0.02, %v2382_v4 }
 0x455   : > { %v2355_v46 = vpop.f32.mrf.mxu0 }
 0x456   : > { %v2356_v24 = vadd.f32 %v2355_v46, %v5113_v15  ;;  %v2460_v46 = vmul.f32 0.02, %v2351_v33 }
 0x457   : > { %v2384_v29 = vpop.f32.mrf.mxu1  ;;  %v5101_v47 = vpop.f32.mrf.mxu2 }
 0x458   : > { %v5103_v49 = vpop.f32.mrf.mxu3  ;;  %v2385_v13 = vadd.f32 %v2384_v29, %v5113_v15  ;;  %v2468_v48 = vmul.f32 0.02, %v2356_v24 }
 0x45a   : > { %v2469_v54 = vmul.f32 0.02, %v2385_v13  ;;  %v2500_v26 = vmax.f32 %v2356_v24, %v2468_v48 }
 0x45d   : > { %v2357_v63 = vpop.f32.mrf.mxu0 }
 0x45e   : > { %v2358_v60 = vadd.f32 %v2357_v63, %v5122_v44  ;;  %v2461_v63 = vmul.f32 0.02, %v2380_v12 }
 0x45f   : > { %v2386_v16 = vpop.f32.mrf.mxu1  ;;  %v5105_v52 = vpop.f32.mrf.mxu2 }
 0x460   : > { %v5109_v39 = vpop.f32.mrf.mxu3  ;;  %v2387_v1 = vadd.f32 %v2386_v16, %v5122_v44  ;;  %v2472_v31 = vmul.f32 0.02, %v2358_v60  ;;  %v2501_v16 = vmax.f32 %v2385_v13, %v2469_v54  ;;  %v2493_v24 = vmax.f32 %v2380_v12, %v2461_v63 }
 0x462   : > { %v2473_v0 = vmul.f32 0.02, %v2387_v1  ;;  %v2504_v18 = vmax.f32 %v2358_v60, %v2472_v31  ;;  %v2497_v60 = vmax.f32 %v2382_v4, %v2465_v14  ;;  %v2485_v31 = vmax.f32 %v2375_v58, %v2453_v38  ;;  %v5154_v4 = vld [vmem:[%s5249_s9] sm:$0xff] }
 0x464   : > { %v2505_v28 = vmax.f32 %v2387_v1, %v2473_v0  ;;  %v2524_v20 = vpack.c.bf16 %v2504_v18, %v2500_v26  ;;  %v2521_v57 = vpack.c.bf16 %v2497_v60, %v2493_v24 }
 0x465   : > { %v2360_v51 = vpop.f32.mrf.mxu0 }
 0x466   : > { %v2361_v7 = vadd.f32 %v2360_v51, %v5111_v61  ;;  %v2525_v1 = vpack.c.bf16 %v2505_v28, %v2501_v16  ;;  %v2409_v28 = vadd.f32 %v5105_v52, %v5119_v53 }
 0x467   : > { %v2389_v19 = vpop.f32.mrf.mxu1  ;;  %v5115_v22 = vpop.f32.mrf.mxu2 }
 0x468   : > { %v5117_v27 = vpop.f32.mrf.mxu3  ;;  %v2390_v30 = vadd.f32 %v2389_v19, %v5111_v61  ;;  %v2476_v2 = vmul.f32 0.02, %v2361_v7  ;;  %v2456_v19 = vmul.f32 0.02, %v2348_v35 }
 0x46a   : > { %v2477_v9 = vmul.f32 0.02, %v2390_v30  ;;  %v2508_v45 = vmax.f32 %v2361_v7, %v2476_v2  ;;  %v2496_v7 = vmax.f32 %v2353_v42, %v2464_v43  ;;  %v2492_v2 = vmax.f32 %v2351_v33, %v2460_v46 }
 0x46c   : > { %v2509_v36 = vmax.f32 %v2390_v30, %v2477_v9  ;;  %v2457_v30 = vmul.f32 0.02, %v2377_v56 }
 0x46d   : > { %v2362_v23 = vpop.f32.mrf.mxu0 }
 0x46e   : > { %v2363_v8 = vadd.f32 %v2362_v23, %v5107_v3  ;;  %v2452_v23 = vmul.f32 0.02, %v2346_v34  ;;  %v2489_v9 = vmax.f32 %v2377_v56, %v2457_v30  ;;  %v2440_v56 = vadd.f32 %v5117_v27, %v5131_v6 }
 0x46f   : > { %v2391_v62 = vpop.f32.mrf.mxu1  ;;  %v5129_v40 = vpop.f32.mrf.mxu2 }
 0x470   : > { %v2392_v21 = vadd.f32 %v2391_v62, %v5107_v3  ;;  %v5135_v59 = vpop.f32.mrf.mxu3  ;;  %v2480_v37 = vmul.f32 0.02, %v2363_v8  ;;  %v2520_v62 = vpack.c.bf16 %v2496_v7, %v2492_v2  ;;  %v2517_v0 = vpack.c.bf16 %v2489_v9, %v2485_v31 }
 0x471   : > { %v2414_v12 = vadd.f32 %v5129_v40, %v5113_v15  ;;  %v2467_v63 = vmul.f32 0.02, %v2440_v56 }
 0x472   : > { %v2481_v32 = vmul.f32 0.02, %v2392_v21  ;;  %v2512_v17 = vmax.f32 %v2363_v8, %v2480_v37  ;;  %v2488_v8 = vmax.f32 %v2348_v35, %v2456_v19  ;;  %v2462_v19 = vmul.f32 0.02, %v2409_v28 }
 0x474   : > { %v2513_v10 = vmax.f32 %v2392_v21, %v2481_v32  ;;  %v2528_v5 = vpack.c.bf16 %v2512_v17, %v2508_v45  ;;  %v2484_v21 = vmax.f32 %v2346_v34, %v2452_v23  ;;  %v2494_v2 = vmax.f32 %v2409_v28, %v2462_v19 }
 0x476   : > { %v2529_v50 = vpack.c.bf16 %v2513_v10, %v2509_v36  ;;  %2581 = vmatpush.bf16.msra.mxu0 %v2528_v5  ;;  %v2516_v42 = vpack.c.bf16 %v2488_v8, %v2484_v21 }
 0x477   : > { %v2415_v29 = vpop.f32.mrf.mxu2 }
 0x478   : > { %v2444_v51 = vpop.f32.mrf.mxu3  ;;  %2600 = vmatpush.bf16.msra.mxu1 %v2529_v50  ;;  %v2416_v48 = vadd.f32 %v2415_v29, %v5122_v44  ;;  %v2470_v50 = vmul.f32 0.02, %v2414_v12 }
 0x479   : > { %v2445_v45 = vadd.f32 %v2444_v51, %v5122_v44  ;;  %v2411_v44 = vadd.f32 %v5115_v22, %v5131_v6  ;;  %v2406_v22 = vadd.f32 %v5101_v47, %v5140_v55  ;;  %v2435_v6 = vadd.f32 %v5103_v49, %v5140_v55  ;;  %v3164_v49 = vld [vmem:[%s5249_s9 + $0x8] sm:$0xff] }
 0x47a   : > { %2582 = vmatpush.bf16.msra.mxu0 %v2524_v20  ;;  %v2474_v18 = vmul.f32 0.02, %v2416_v48  ;;  %v2404_v51 = vadd.f32 %v5097_v11, %v5144_v25 }
 0x47b   : > { %v2475_v14 = vmul.f32 0.02, %v2445_v45  ;;  %v2466_v29 = vmul.f32 0.02, %v2411_v44  ;;  %v2458_v20 = vmul.f32 0.02, %v2406_v22 }
 0x47c   : > { %2601 = vmatpush.bf16.msra.mxu1 %v2525_v1  ;;  %v2506_v58 = vmax.f32 %v2416_v48, %v2474_v18  ;;  %v2459_v55 = vmul.f32 0.02, %v2435_v6  ;;  %v2499_v1 = vmax.f32 %v2440_v56, %v2467_v63  ;;  %v2454_v11 = vmul.f32 0.02, %v2404_v51 }
 0x47d   : > { %v2507_v52 = vmax.f32 %v2445_v45, %v2475_v14  ;;  %v2498_v30 = vmax.f32 %v2411_v44, %v2466_v29 }
 0x47e   : > { %2583 = vmatpush.bf16.msra.mxu0 %v2520_v62  ;;  %v2491_v8 = vmax.f32 %v2435_v6, %v2459_v55  ;;  %v2486_v9 = vmax.f32 %v2404_v51, %v2454_v11 }
 0x47f   : > { %v2418_v13 = vpop.f32.mrf.mxu2 }
 0x480   : > { %v2447_v37 = vpop.f32.mrf.mxu3  ;;  %2602 = vmatpush.bf16.msra.mxu1 %v2521_v57  ;;  %v2419_v32 = vadd.f32 %v2418_v13, %v5111_v61 }
 0x481   : > { %v2448_v33 = vadd.f32 %v2447_v37, %v5111_v61  ;;  %v2443_v61 = vadd.f32 %v5135_v59, %v5113_v15  ;;  %v2438_v15 = vadd.f32 %v5109_v39, %v5119_v53  ;;  %v2502_v39 = vmax.f32 %v2414_v12, %v2470_v50 }
 0x482   : > { %2584 = vmatpush.bf16.msra.mxu0 %v2516_v42  ;;  %v2478_v54 = vmul.f32 0.02, %v2419_v32  ;;  %v2433_v53 = vadd.f32 %v5099_v41, %v5144_v25  ;;  %v2490_v41 = vmax.f32 %v2406_v22, %v2458_v20  ;;  %v2522_v25 = vpack.c.bf16 %v2498_v30, %v2494_v2 }
 0x483   : > { %v2479_v35 = vmul.f32 0.02, %v2448_v33  ;;  %v2463_v7 = vmul.f32 0.02, %v2438_v15  ;;  %v2526_v60 = vpack.c.bf16 %v2506_v58, %v2502_v39 }
 0x484   : > { %2603 = vmatpush.bf16.msra.mxu1 %v2517_v0  ;;  %v2510_v34 = vmax.f32 %v2419_v32, %v2478_v54  ;;  %v2455_v38 = vmul.f32 0.02, %v2433_v53  ;;  %v2518_v21 = vpack.c.bf16 %v2490_v41, %v2486_v9  ;;  %v2553_v32 = vpop.permute.xlu2 %2552  ;;  %v2558_v54 = vpop.permute.xlu0 %2557 }
 0x485   : > { %3115 = vmatmul.msk.bf16.vlgmr.msra.gmra.mxu0 %vm2570_vm1, %v5154_v4  ;;  %v2511_v59 = vmax.f32 %v2448_v33, %v2479_v35  ;;  %v2495_v24 = vmax.f32 %v2438_v15, %v2463_v7 }
 0x486   : > { %v2487_v57 = vmax.f32 %v2433_v53, %v2455_v38  ;;  %v3165_v53 = vld [vmem:[%s5251_s11] sm:$0xff] }
 0x487   : > { %v2420_v17 = vpop.f32.mrf.mxu2  ;;  %3117 = vmatmul.msk.bf16.vlgmr.msra.gmra.mxu1 %vm2570_vm1, %v5154_v4  ;;  %v2523_v62 = vpack.c.bf16 %v2499_v1, %v2495_v24 }
 0x488   : > { %v2421_v36 = vadd.f32 %v2420_v17, %v5107_v3  ;;  %v2449_v10 = vpop.f32.mrf.mxu3  ;;  %v2519_v13 = vpack.c.bf16 %v2491_v8, %v2487_v57 }
 0x489   : > { %v2450_v43 = vadd.f32 %v2449_v10, %v5107_v3  ;;  %v2471_v3 = vmul.f32 0.02, %v2443_v61  ;;  %v2543_v10 = vpop.permute.xlu1 %2542 }
 0x48a   : > { %v2482_v5 = vmul.f32 0.02, %v2421_v36 }
 0x48b   : > { %v2483_v40 = vmul.f32 0.02, %v2450_v43  ;;  %v2503_v47 = vmax.f32 %v2443_v61, %v2471_v3 }
 0x48c   : > { %v2514_v46 = vmax.f32 %v2421_v36, %v2482_v5  ;;  %v2548_v17 = vpop.permute.xlu2 %2547 }
 0x48d   : > { %v2515_v26 = vmax.f32 %v2450_v43, %v2483_v40  ;;  %v2527_v23 = vpack.c.bf16 %v2507_v52, %v2503_v47 }
 0x48e   : > { %v2530_v27 = vpack.c.bf16 %v2514_v46, %v2510_v34 }
 0x48f   : > { %v2531_v16 = vpack.c.bf16 %v2515_v26, %v2511_v59 }
 0x490   : > { %2619 = vmatpush.bf16.msra.mxu2 %v2530_v27 }
 0x491   : > { %2638 = vmatpush.bf16.msra.mxu3 %v2531_v16 }
 0x494   : > { %2620 = vmatpush.bf16.msra.mxu2 %v2526_v60 }
 0x495   : > { %2639 = vmatpush.bf16.msra.mxu3 %v2527_v23  ;;  %3116 = vmatmul.msk.bf16.gmra.mxu0 %vm2570_vm1, %v3164_v49 }
 0x497   : > { %3118 = vmatmul.msk.bf16.gmra.mxu1 %vm2570_vm1, %v3164_v49 }
 0x498   : > { %2621 = vmatpush.bf16.msra.mxu2 %v2522_v25 }
 0x499   : > { %2640 = vmatpush.bf16.msra.mxu3 %v2523_v62 }
 0x49c   : > { %2622 = vmatpush.bf16.msra.mxu2 %v2518_v21 }
 0x49d   : > { %2641 = vmatpush.bf16.msra.mxu3 %v2519_v13 }
 0x49f   : > { %3119 = vmatmul.msk.bf16.vlgmr.msra.gmra.mxu2 %vm2570_vm1, %v5154_v4 }
 0x4a0   : > { %3121 = vmatmul.msk.bf16.vlgmr.msra.gmra.mxu3 %vm2570_vm1, %v5154_v4 }
 0x4af   : > { %3120 = vmatmul.msk.bf16.gmra.mxu2 %vm2570_vm1, %v3164_v49 }
 0x4b0   : > { %3122 = vmatmul.msk.bf16.gmra.mxu3 %vm2570_vm1, %v3164_v49 }
 0x502   : > { %v2586_v31 = vpop.f32.mrf.mxu0 }
 0x503   : > { %v2587_v4 = vadd.f32 %v2586_v31, %v2543_v10 }
 0x504   : > { %v2605_v37 = vpop.f32.mrf.mxu1 }
 0x505   : > { %v2606_v5 = vadd.f32 %v2605_v37, %v2543_v10  ;;  %v2653_v46 = vmul.f32 0.02, %v2587_v4 }
 0x507   : > { %v2654_v59 = vmul.f32 0.02, %v2606_v5  ;;  %v2669_v16 = vmax.f32 %v2587_v4, %v2653_v46 }
 0x509   : > { %v2670_v51 = vmax.f32 %v2606_v5, %v2654_v59 }
 0x50a   : > { %v2588_v42 = vpop.f32.mrf.mxu0 }
 0x50b   : > { %v2589_v36 = vadd.f32 %v2588_v42, %v2548_v17 }
 0x50c   : > { %v2607_v0 = vpop.f32.mrf.mxu1 }
 0x50d   : > { %v2608_v61 = vadd.f32 %v2607_v0, %v2548_v17  ;;  %v2657_v40 = vmul.f32 0.02, %v2589_v36 }
 0x50f   : > { %v2658_v50 = vmul.f32 0.02, %v2608_v61  ;;  %v2673_v29 = vmax.f32 %v2589_v36, %v2657_v40 }
 0x511   : > { %v2674_v6 = vmax.f32 %v2608_v61, %v2658_v50  ;;  %v2685_v19 = vpack.c.bf16 %v2673_v29, %v2669_v16 }
 0x512   : > { %v2591_v33 = vpop.f32.mrf.mxu0 }
 0x513   : > { %v2592_v45 = vadd.f32 %v2591_v33, %v2553_v32  ;;  %v2686_v39 = vpack.c.bf16 %v2674_v6, %v2670_v51 }
 0x514   : > { %v2610_v48 = vpop.f32.mrf.mxu1 }
 0x515   : > { %v2611_v12 = vadd.f32 %v2610_v48, %v2553_v32  ;;  %v2661_v43 = vmul.f32 0.02, %v2592_v45 }
 0x517   : > { %v2662_v56 = vmul.f32 0.02, %v2611_v12  ;;  %v2677_v15 = vmax.f32 %v2592_v45, %v2661_v43  ;;  %v2705_v43 = vpop.permute.xlu1 %2704 }
 0x519   : > { %v2678_v26 = vmax.f32 %v2611_v12, %v2662_v56 }
 0x51a   : > { %v2593_v35 = vpop.f32.mrf.mxu0 }
 0x51b   : > { %v2594_v44 = vadd.f32 %v2593_v35, %v2558_v54 }
 0x51c   : > { %v2612_v18 = vpop.f32.mrf.mxu1 }
 0x51d   : > { %v2613_v14 = vadd.f32 %v2612_v18, %v2558_v54  ;;  %v2665_v28 = vmul.f32 0.02, %v2594_v44  ;;  %v2700_v18 = vpop.permute.xlu0 %2699 }
 0x51f   : > { %v2666_v34 = vmul.f32 0.02, %v2613_v14  ;;  %v2681_v3 = vmax.f32 %v2594_v44, %v2665_v28 }
 0x521   : > { %v2682_v22 = vmax.f32 %v2613_v14, %v2666_v34  ;;  %v2689_v58 = vpack.c.bf16 %v2681_v3, %v2677_v15 }
 0x522   : > { %v2624_v27 = vpop.f32.mrf.mxu2 }
 0x523   : > { %v2690_v63 = vpack.c.bf16 %v2682_v22, %v2678_v26  ;;  %v2643_v52 = vpop.f32.mrf.mxu3  ;;  %2721 = vmatpush.bf16.msrb.mxu0 %v2689_v58  ;;  %v2625_v11 = vadd.f32 %v2624_v27, %v2543_v10  ;;  %v2793_v22 = vpop.permute.xlu2 %2792 }
 0x524   : > { %v2644_v41 = vadd.f32 %v2643_v52, %v2543_v10 }
 0x525   : > { %2735 = vmatpush.bf16.msrb.mxu1 %v2690_v63  ;;  %v2655_v13 = vmul.f32 0.02, %v2625_v11  ;;  %v2798_v3 = vpop.permute.xlu0 %2797 }
 0x526   : > { %v2656_v42 = vmul.f32 0.02, %v2644_v41 }
 0x527   : > { %2722 = vmatpush.bf16.msrb.mxu0 %v2685_v19  ;;  %v2671_v12 = vmax.f32 %v2625_v11, %v2655_v13 }
 0x528   : > { %v2672_v36 = vmax.f32 %v2644_v41, %v2656_v42 }
 0x529   : > { %2736 = vmatpush.bf16.msrb.mxu1 %v2686_v39 }
 0x52a   : > { %v2626_v7 = vpop.f32.mrf.mxu2  ;;  %3127 = vmatmul.msk.bf16.vlgmr.msrb.gmra.mxu0 %vm747_vm0, %v3165_v53 }
 0x52b   : > { %v2645_v47 = vpop.f32.mrf.mxu3  ;;  %v2627_v55 = vadd.f32 %v2626_v7, %v2548_v17 }
 0x52c   : > { %3128 = vmatmul.msk.bf16.vlgmr.msrb.gmra.mxu1 %vm747_vm0, %v3165_v53  ;;  %v2646_v1 = vadd.f32 %v2645_v47, %v2548_v17 }
 0x52d   : > { %v2659_v62 = vmul.f32 0.02, %v2627_v55 }
 0x52e   : > { %v2660_v57 = vmul.f32 0.02, %v2646_v1 }
 0x52f   : > { %v2675_v33 = vmax.f32 %v2627_v55, %v2659_v62 }
 0x530   : > { %v2676_v45 = vmax.f32 %v2646_v1, %v2660_v57 }
 0x531   : > { %v2687_v10 = vpack.c.bf16 %v2675_v33, %v2671_v12 }
 0x532   : > { %v2629_v20 = vpop.f32.mrf.mxu2 }
 0x533   : > { %v2648_v30 = vpop.f32.mrf.mxu3  ;;  %v2630_v60 = vadd.f32 %v2629_v20, %v2553_v32 }
 0x534   : > { %v2649_v49 = vadd.f32 %v2648_v30, %v2553_v32 }
 0x535   : > { %v2663_v2 = vmul.f32 0.02, %v2630_v60 }
 0x536   : > { %v2664_v25 = vmul.f32 0.02, %v2649_v49 }
 0x537   : > { %v2679_v31 = vmax.f32 %v2630_v60, %v2663_v2 }
 0x538   : > { %v2680_v0 = vmax.f32 %v2649_v49, %v2664_v25 }
 0x53a   : > { %v2631_v23 = vpop.f32.mrf.mxu2 }
 0x53b   : > { %v2632_v38 = vadd.f32 %v2631_v23, %v2558_v54  ;;  %v2650_v24 = vpop.f32.mrf.mxu3 }
 0x53c   : > { %v2651_v8 = vadd.f32 %v2650_v24, %v2558_v54  ;;  %v2688_v54 = vpack.c.bf16 %v2676_v45, %v2672_v36 }
 0x53d   : > { %v2667_v9 = vmul.f32 0.02, %v2632_v38 }
 0x53e   : > { %v2668_v21 = vmul.f32 0.02, %v2651_v8 }
 0x53f   : > { %v2683_v37 = vmax.f32 %v2632_v38, %v2667_v9 }
 0x540   : > { %v2684_v32 = vmax.f32 %v2651_v8, %v2668_v21 }
 0x541   : > { %v2691_v48 = vpack.c.bf16 %v2683_v37, %v2679_v31  ;;  %v2839_v31 = vpop.permute.xlu1 %2838 }
 0x542   : > { %v2692_v17 = vpack.c.bf16 %v2684_v32, %v2680_v0  ;;  %v2841_v45 = vperm.slane %v2839_v31, 0 }
 0x543   : > { %2749 = vmatpush.bf16.msrb.mxu2 %v2691_v48 }
 0x544   : > { %2763 = vmatpush.bf16.msrb.mxu3 %v2692_v17 }
 0x547   : > { %2750 = vmatpush.bf16.msrb.mxu2 %v2687_v10 }
 0x548   : > { %2764 = vmatpush.bf16.msrb.mxu3 %v2688_v54 }
 0x54a   : > { %3129 = vmatmul.msk.bf16.vlgmr.msrb.gmra.mxu2 %vm747_vm0, %v3165_v53 }
 0x54b   : > { %3130 = vmatmul.msk.bf16.vlgmr.msrb.gmra.mxu3 %vm747_vm0, %v3165_v53 }
 0x5a7   : > { %v2724_v35 = vpop.f32.mrf.mxu0 }
 0x5a8   : > { %v2725_v50 = vadd.f32 %v2724_v35, %v2700_v18 }
 0x5a9   : > { %v2738_v61 = vpop.f32.mrf.mxu1 }
 0x5aa   : > { %v2739_v5 = vadd.f32 %v2738_v61, %v2700_v18  ;;  %v2771_v59 = vmul.f32 0.02, %v2725_v50 }
 0x5ac   : > { %v2772_v40 = vmul.f32 0.02, %v2739_v5  ;;  %v2779_v27 = vmax.f32 %v2725_v50, %v2771_v59 }
 0x5ae   : > { %v2780_v46 = vmax.f32 %v2739_v5, %v2772_v40  ;;  %v2800_v52 = vmul.f32 %v2793_v22, %v2779_v27 }
 0x5af   : > { %v2726_v56 = vpop.f32.mrf.mxu0 }
 0x5b0   : > { %v2727_v28 = vadd.f32 %v2726_v56, %v2705_v43  ;;  %v2801_v29 = vmul.f32 %v2793_v22, %v2780_v46 }
 0x5b1   : > { %v2740_v4 = vpop.f32.mrf.mxu1 }
 0x5b2   : > { %v2741_v44 = vadd.f32 %v2740_v4, %v2705_v43  ;;  %v2775_v15 = vmul.f32 0.02, %v2727_v28 }
 0x5b4   : > { %v2776_v14 = vmul.f32 0.02, %v2741_v44  ;;  %v2783_v58 = vmax.f32 %v2727_v28, %v2775_v15 }
 0x5b6   : > { %v2784_v34 = vmax.f32 %v2741_v44, %v2776_v14  ;;  %v2804_v63 = vmul.f32 %v2798_v3, %v2783_v58 }
 0x5b8   : > { %v2805_v26 = vmul.f32 %v2798_v3, %v2784_v34  ;;  %v2808_v51 = vadd.f32 %v2804_v63, %v2800_v52 }
 0x5ba   : > { %v2815_v6 = vadd.f32 %v2805_v26, %v2801_v29  ;;  %v2809_v7 = vrot.slane %v2808_v51, 4 }
 0x5bc   : > { %v2816_v16 = vrot.slane %v2815_v6, 4  ;;  %v2810_v60 = vadd.f32 %v2809_v7, %v2808_v51 }
 0x5be   : > { %v2817_v19 = vadd.f32 %v2816_v16, %v2815_v6  ;;  %v2811_v38 = vrot.slane %v2810_v60, 2 }
 0x5c0   : > { %v2818_v20 = vrot.slane %v2817_v19, 2  ;;  %v2812_v21 = vadd.f32 %v2811_v38, %v2810_v60 }
 0x5c2   : > { %v2819_v55 = vadd.f32 %v2818_v20, %v2817_v19  ;;  %v2813_v17 = vrot.slane %v2812_v21, 1 }
 0x5c4   : > { %v2820_v8 = vrot.slane %v2819_v55, 1  ;;  %v2814_v35 = vadd.f32 %v2813_v17, %v2812_v21 }
 0x5c6   : > { %v2821_v0 = vadd.f32 %v2820_v8, %v2819_v55  ;;  %v2842_v56 = vadd.f32 %v2841_v45, %v2814_v35 }
 0x5c8   : > { %v2843_v10 = vadd.f32 %v2841_v45, %v2821_v0  ;;  %v2846_v15 = vmul.f32 0.01, %v2842_v56 }
 0x5ca   : > { %v2850_v58 = vadd.f32 0.99, %v2846_v15 }
 0x5cc   : > { %v2854_v16 = vmin.f32 %v2842_v56, %v2850_v58 }
 0x5cd   : > { %v2752_v39 = vpop.f32.mrf.mxu2 }
 0x5ce   : > { %v2766_v53 = vpop.f32.mrf.mxu3  ;;  %v2753_v47 = vadd.f32 %v2752_v39, %v2700_v18  ;;  %v2876_v39 = vlaneseq  ;;  %v2858_v20 = vmax.f32 %v2854_v16, %v2846_v15 }
 0x5cf   : > { %v2767_v30 = vadd.f32 %v2766_v53, %v2700_v18  ;;  %v2847_v18 = vmul.f32 0.01, %v2843_v10 }
 0x5d0   : > { %v2773_v49 = vmul.f32 0.02, %v2753_v47  ;;  %vm2878_vm5 = vcmp.lt.s32.totalorder %v2876_v39, 512 }
 0x5d1   : > { %v2774_v1 = vmul.f32 0.02, %v2767_v30  ;;  %v2851_v50 = vadd.f32 0.99, %v2847_v18 }
 0x5d2   : > { %v2781_v41 = vmax.f32 %v2753_v47, %v2773_v49 }
 0x5d3   : > { %v2782_v62 = vmax.f32 %v2767_v30, %v2774_v1  ;;  %v2855_v26 = vmin.f32 %v2843_v10, %v2851_v50 }
 0x5d4   : > { %v2802_v37 = vmul.f32 %v2793_v22, %v2781_v41 }
 0x5d5   : > { %v2754_v23 = vpop.f32.mrf.mxu2  ;;  %v2803_v32 = vmul.f32 %v2793_v22, %v2782_v62  ;;  %v2859_v63 = vmax.f32 %v2855_v26, %v2847_v18 }
 0x5d6   : > { %v2755_v11 = vadd.f32 %v2754_v23, %v2705_v43  ;;  %v2768_v2 = vpop.f32.mrf.mxu3 }
 0x5d7   : > { %v2769_v24 = vadd.f32 %v2768_v2, %v2705_v43  ;;  %v2866_v7 = vrot.slane %v2859_v63, 7 }
 0x5d8   : > { %v2777_v25 = vmul.f32 0.02, %v2755_v11 }
 0x5d9   : > { %v2778_v9 = vmul.f32 0.02, %v2769_v24  ;;  %v2870_v60 = vsel %vm2869_vm2, %v2858_v20, %v2866_v7 }
 0x5da   : > { %v2785_v57 = vmax.f32 %v2755_v11, %v2777_v25 }
 0x5db   : > { %v2786_v13 = vmax.f32 %v2769_v24, %v2778_v9 }
 0x5dc   : > { %v2806_v42 = vmul.f32 %v2798_v3, %v2785_v57 }
 0x5dd   : > { %v2807_v33 = vmul.f32 %v2798_v3, %v2786_v13 }
 0x5de   : > { %v2822_v48 = vadd.f32 %v2806_v42, %v2802_v37 }
 0x5df   : > { %v2829_v12 = vadd.f32 %v2807_v33, %v2803_v32 }
 0x5e0   : > { %v2823_v36 = vrot.slane %v2822_v48, 4 }
 0x5e1   : > { %v2830_v54 = vrot.slane %v2829_v12, 4 }
 0x5e2   : > { %v2824_v61 = vadd.f32 %v2823_v36, %v2822_v48 }
 0x5e3   : > { %v2831_v4 = vadd.f32 %v2830_v54, %v2829_v12 }
 0x5e4   : > { %v2825_v43 = vrot.slane %v2824_v61, 2 }
 0x5e5   : > { %v2832_v44 = vrot.slane %v2831_v4, 2 }
 0x5e6   : > { %v2826_v5 = vadd.f32 %v2825_v43, %v2824_v61 }
 0x5e7   : > { %v2833_v14 = vadd.f32 %v2832_v44, %v2831_v4 }
 0x5e8   : > { %v2827_v40 = vrot.slane %v2826_v5, 1 }
 0x5e9   : > { %v2834_v28 = vrot.slane %v2833_v14, 1 }
 0x5ea   : > { %v2828_v34 = vadd.f32 %v2827_v40, %v2826_v5 }
 0x5eb   : > { %v2835_v46 = vadd.f32 %v2834_v28, %v2833_v14 }
 0x5ec   : > { %v2844_v3 = vadd.f32 %v2841_v45, %v2828_v34 }
 0x5ed   : > { %v2845_v59 = vadd.f32 %v2841_v45, %v2835_v46 }
 0x5ee   : > { %v2848_v22 = vmul.f32 0.01, %v2844_v3 }
 0x5ef   : > { %v2849_v29 = vmul.f32 0.01, %v2845_v59 }
 0x5f0   : > { %v2852_v27 = vadd.f32 0.99, %v2848_v22 }
 0x5f1   : > { %v2853_v6 = vadd.f32 0.99, %v2849_v29 }
 0x5f2   : > { %v2856_v52 = vmin.f32 %v2844_v3, %v2852_v27 }
 0x5f3   : > { %v2857_v51 = vmin.f32 %v2845_v59, %v2853_v6 }
 0x5f4   : > { %v2860_v19 = vmax.f32 %v2856_v52, %v2848_v22 }
 0x5f5   : > { %v2861_v53 = vmax.f32 %v2857_v51, %v2849_v29 }
 0x5f6   : > { %v2867_v47 = vrot.slane %v2860_v19, 6 }
 0x5f7   : > { %v2868_v30 = vrot.slane %v2861_v53, 5 }
 0x5f9   : > { %v2872_v49 = vsel %vm2871_vm3, %v2867_v47, %v2868_v30 }
 0x5fa   : > { %v2874_v55 = vsel %vm2873_vm4, %v2870_v60, %v2872_v49 }
 0x5fb   : > { %2880 = vst.msk [vmem:[%s490_s18] sm:$0xf] %vm2878_vm5, %v2874_v55 }
 0x5fc   : > { %3236 = shalt.err (!%p3233_p3)
}
 0x5fd   : > { %3166 = dma.vmem_to_hbm [thread:$0]  (%p3395_p5), %s2895_s19, 64, %s2897_s14, %s2882_s16  }
 0x5fe PF: > { %p3172_p4 = scmp.ge.s32.totalorder %s3271_s23, 2  ;;  %s2908_s28 = sand.u32 1, %s3259_s20  }
 0x5ff   : > { %s2909_s18 = scalar_lea.sflag [#allocation4], %s2908_s28 }
 0x600   : > { %p3169_p7 = pnand %p3172_p4, %p3399_p6 }
 0x602   : > { %p3170_p8 = pneg %p3169_p7 }
 0x604   : > { %3254 = dma.done.wait (%p3170_p8), %s2909_s18, 64  }
 0x605   : > { %3256 = vsyncadd (%p3170_p8), %s2909_s18, 4294967232  ;;  %s5679_s1 = sld [smem:[#allocation6_spill]]  ;;  %p27_p9 = scmp.ge.s32.totalorder %s3382_s25, 4  }
 0x606   : > { %s5680_s22 = sld [smem:[#allocation7_spill]]  ;;  %s5681_s20 = smov %s3263_s21 }
 0x607   : > { %s5683_s23 = smov %s3382_s25  ;;  %29 = sbr.rel (!%p27_p9) target bundleno = 6 (0x6), region = 115 }
 0x60b   : > { %s5682_s21 = smov %s5679_s1 }
 0x60c   :  { %2915 = vsyncpa [#allocation4], 1 }
 0x60d   :  { %2917 = vsyncpa [#allocation4 + $0x1], 1 }

</bundles_post_ra>
